<compile_context>
chip_gen: v6e
topology: v6e:2x2x1
jax: 0.10.0
libtpu: 0.0.40
codegen_flags: <defaults>
</compile_context>

<pallas_src>
import numpy as np
import jax
import jax.numpy as jnp
from jax.experimental import pallas as pl
from jax.experimental.pallas import tpu as pltpu

# ----------------------------- model config (small shapes) ---------------------------------
B = 2
H_IN, W_IN = 36, 36          # module reshapes (B, H, W) -> (B, 1, H, W)
K = 5                        # conv kernel size
C1, C2 = 6, 16               # conv1 / conv2 out channels

def _conv_out(n, k):
    return n - k + 1

H1, W1 = _conv_out(H_IN, K), _conv_out(W_IN, K)      # 32, 32
H1P, W1P = H1 // 2, W1 // 2                          # 16, 16
H2, W2 = _conv_out(H1P, K), _conv_out(W1P, K)        # 12, 12
H2P, W2P = H2 // 2, W2 // 2                          # 6, 6
FLAT = C2 * H2P * W2P                                # 576 == linear_input_neurons() @ 36x36
FC1, FC2, FC3 = 120, 84, 2

H_PAD = ((H_IN + 7) // 8) * 8                        # 40: keeps the in-kernel tap stacking
                                                     #     at 8-aligned sublane offsets
FC1P = 128                                           # 120 fc1 rows + constant-1 lane + pad
FC2P = 88                                            # 84 fc2 rows + constant-1 lane + pad


# --------------------------------------- kernel --------------------------------------------
def cnn_eeg_kernel(x_ref, a1_ref, sw1_ref, sh1_ref, a2_ref, sw2_ref, sh2_ref,
                   a3_ref, a4_ref, a5_ref, out_ref):
    f32 = jnp.float32

    def mm(a, b):
        return jnp.dot(a, b, preferred_element_type=f32)

    def ones_row(n):
        return jnp.ones((1, n), f32)

    x2 = x_ref[...]                                        # (H_PAD, W_IN*B), cols = w*B + b

    # ---- conv1 (+ folded bias) + relu: ONE fused MXU matmul over the K width-taps --------
    rhs1 = jnp.concatenate(
        [x2[:, kw * B: kw * B + W1 * B] for kw in range(K)] + [ones_row(W1 * B)],
        axis=0)                                            # (K*H_PAD + 1, W1*B)
    h1 = jnp.maximum(mm(a1_ref[...], rhs1), 0.0)           # (C1*H1, W1*B)

    # ---- maxpool 2x2: one selection matmul per direction, then max of the two halves -----
    cw = mm(h1, sw1_ref[...])                              # (C1*H1, 2*W1P*B)
    cw1 = jnp.maximum(cw[:, :W1P * B], cw[:, W1P * B:])    # (C1*H1, W1P*B)
    sp = mm(sh1_ref[...], cw1)                             # (2*C1*H1P, W1P*B)
    p1 = jnp.maximum(sp[:C1 * H1P], sp[C1 * H1P:])         # (C1*H1P, W1P*B)

    # ---- conv2 (+ folded bias) + relu: ONE fused MXU matmul -------------------------------
    rhs2 = jnp.concatenate(
        [p1[:, kw * B: kw * B + W2 * B] for kw in range(K)] + [ones_row(W2 * B)],
        axis=0)                                            # (K*C1*H1P + 1, W2*B)
    h2 = jnp.maximum(mm(a2_ref[...], rhs2), 0.0)           # (C2*H2, W2*B)

    cw = mm(h2, sw2_ref[...])                              # (C2*H2, 2*W2P*B)
    cw2 = jnp.maximum(cw[:, :W2P * B], cw[:, W2P * B:])    # (C2*H2, W2P*B)
    sp = mm(sh2_ref[...], cw2)                             # (2*C2*H2P, W2P*B)
    p2 = jnp.maximum(sp[:C2 * H2P], sp[C2 * H2P:])         # (C2*H2P, W2P*B)

    # ---- FC stack with N = B; biases carried as a constant-1 row through the activations --
    rhsf = jnp.concatenate(
        [p2[:, w * B: (w + 1) * B] for w in range(W2P)] + [ones_row(B)],
        axis=0)                                            # (FLAT + 1, B)
    f1 = jnp.maximum(mm(a3_ref[...], rhsf), 0.0)           # (FC1P, B); row FC1 == 1
    f2 = jnp.maximum(mm(a4_ref[...], f1), 0.0)             # (FC2P, B); row FC2 == 1
    f3 = mm(a5_ref[...], f2)                               # (FC3, B)

    out_ref[...] = f3


# ---------------------------- parameter construction (glue) --------------------------------
def build_params(key):
    """PyTorch-style (shape-wise) parameters, deterministic init."""
    ks = jax.random.split(key, 10)

    def u(k, shape, fan_in):
        bound = 1.0 / np.sqrt(fan_in)
        return jax.random.uniform(k, shape, jnp.float32, -bound, bound)

    w1 = u(ks[0], (C1, 1, K, K), 1 * K * K)
    b1 = u(ks[1], (C1,), 1 * K * K)
    w2 = u(ks[2], (C2, C1, K, K), C1 * K * K)
    b2 = u(ks[3], (C2,), C1 * K * K)
    fw1 = u(ks[4], (FC1, FLAT), FLAT)
    fb1 = u(ks[5], (FC1,), FLAT)
    fw2 = u(ks[6], (FC2, FC1), FC1)
    fb2 = u(ks[7], (FC2,), FC1)
    fw3 = u(ks[8], (FC3, FC2), FC2)
    fb3 = u(ks[9], (FC3,), FC2)
    return (w1, b1, w2, b2, fw1, fb1, fw2, fb2, fw3, fb3)


def lower_params(raw):
    """Lower conv/pool/fc params into the fused matmul operands the kernel expects."""
    w1, b1, w2, b2, fw1, fb1, fw2, fb2, fw3, fb3 = (np.asarray(p, np.float32) for p in raw)

    # conv1, taps concatenated along the contraction axis; bias in the last column.
    # A1[o*H1 + h, kw*H_PAD + (h+kh)] = w1[o, 0, kh, kw]
    A1 = np.zeros((C1 * H1, K * H_PAD + 1), np.float32)
    for o in range(C1):
        for h in range(H1):
            for kh in range(K):
                for kw in range(K):
                    A1[o * H1 + h, kw * H_PAD + h + kh] = w1[o, 0, kh, kw]
            A1[o * H1 + h, K * H_PAD] = b1[o]

    # conv2: A2[o*H2 + h, kw*C1*H1P + c*H1P + (h+kh)] = w2[o, c, kh, kw]; bias in last column.
    A2 = np.zeros((C2 * H2, K * C1 * H1P + 1), np.float32)
    for o in range(C2):
        for h in range(H2):
            for c in range(C1):
                for kh in range(K):
                    for kw in range(K):
                        A2[o * H2 + h, kw * (C1 * H1P) + c * H1P + h + kh] = w2[o, c, kh, kw]
            A2[o * H2 + h, K * C1 * H1P] = b2[o]

    # merged 0/1 maxpool selection matrices: one matmul per direction, output = [even | odd].
    def lane_pool_sel(w_out):                       # cols = w*B + b layout
        n_out = w_out * B
        S = np.zeros((2 * n_out, 2 * n_out), np.float32)
        for w in range(w_out):
            for b in range(B):
                S[(2 * w) * B + b, w * B + b] = 1.0
                S[(2 * w + 1) * B + b, n_out + w * B + b] = 1.0
        return S

    def sub_pool_sel(n_out):                        # rows = c*H + h layout, [even ; odd]
        S = np.zeros((2 * n_out, 2 * n_out), np.float32)
        for i in range(n_out):
            S[i, 2 * i] = 1.0
            S[n_out + i, 2 * i + 1] = 1.0
        return S

    SW1 = lane_pool_sel(W1P)                        # (W1*B, 2*W1P*B)
    SH1 = sub_pool_sel(C1 * H1P)                    # (2*C1*H1P, C1*H1)
    SW2 = lane_pool_sel(W2P)                        # (W2*B, 2*W2P*B)
    SH2 = sub_pool_sel(C2 * H2P)                    # (2*C2*H2P, C2*H2)

    # fc1: columns reordered to the kernel's (w-major, then c,h) RHS stacking, which matches
    # the PyTorch (c,h,w) flatten per sample.  Bias in last column; row FC1 propagates a
    # constant 1 (the "bias lane") to fc2.
    A3 = np.zeros((FC1P, FLAT + 1), np.float32)
    A3[:FC1, :FLAT] = fw1.reshape(FC1, C2, H2P, W2P).transpose(0, 3, 1, 2).reshape(FC1, FLAT)
    A3[:FC1, FLAT] = fb1
    A3[FC1, FLAT] = 1.0

    # fc2: consumes fc1's bias lane (col FC1) for its own bias; row FC2 keeps the bias lane
    # alive for fc3.
    A4 = np.zeros((FC2P, FC1P), np.float32)
    A4[:FC2, :FC1] = fw2
    A4[:FC2, FC1] = fb2
    A4[FC2, FC1] = 1.0

    # fc3: bias picked from fc2's bias lane (col FC2).
    A5 = np.zeros((FC3, FC2P), np.float32)
    A5[:, :FC2] = fw3
    A5[:, FC2] = fb3

    lowered = (A1, SW1, SH1, A2, SW2, SH2, A3, A4, A5)
    return tuple(jnp.asarray(p) for p in lowered)


# ------------------------------------ pallas wrapper ---------------------------------------
def cnn_eeg_forward(x, lowered):
    # Layout plumbing (outside the kernel): (B, H, W) -> (H_PAD, W*B) with cols = w*B + b and
    # rows zero-padded to a multiple of 8 so the in-kernel tap stacking stays sublane-aligned.
    x2 = jnp.transpose(x, (1, 2, 0)).reshape(H_IN, W_IN * B)
    x2 = jnp.pad(x2, ((0, H_PAD - H_IN), (0, 0)))

    inputs = (x2,) + tuple(lowered)
    in_specs = [pl.BlockSpec(p.shape, lambda i, _nd=p.ndim: (0,) * _nd) for p in inputs]

    out = pl.pallas_call(
        cnn_eeg_kernel,
        out_shape=jax.ShapeDtypeStruct((FC3, B), jnp.float32),
        grid_spec=pltpu.PrefetchScalarGridSpec(
            num_scalar_prefetch=0,
            grid=(1,),                               # whole batch in one invocation
            in_specs=in_specs,
            out_specs=pl.BlockSpec((FC3, B), lambda i: (0, 0)),
        ),
        compiler_params=pltpu.CompilerParams(dimension_semantics=("arbitrary",)),
    )(*inputs)
    return out.T                                     # (B, FC3)


# ---------------------------------- pure-JAX reference -------------------------------------
def reference_forward(x, raw):
    w1, b1, w2, b2, fw1, fb1, fw2, fb2, fw3, fb3 = raw
    dn = ('NCHW', 'OIHW', 'NCHW')
    hp = jax.lax.Precision.HIGHEST
    y = x[:, None, :, :]
    y = jax.lax.conv_general_dilated(y, w1, (1, 1), 'VALID', dimension_numbers=dn, precision=hp)
    y = jnp.maximum(y + b1[None, :, None, None], 0.0)
    y = jax.lax.reduce_window(y, -jnp.inf, jax.lax.max, (1, 1, 2, 2), (1, 1, 2, 2), 'VALID')
    y = jax.lax.conv_general_dilated(y, w2, (1, 1), 'VALID', dimension_numbers=dn, precision=hp)
    y = jnp.maximum(y + b2[None, :, None, None], 0.0)
    y = jax.lax.reduce_window(y, -jnp.inf, jax.lax.max, (1, 1, 2, 2), (1, 1, 2, 2), 'VALID')
    y = y.reshape(y.shape[0], -1)
    y = jnp.maximum(jnp.dot(y, fw1.T, precision=hp) + fb1, 0.0)
    y = jnp.maximum(jnp.dot(y, fw2.T, precision=hp) + fb2, 0.0)
    return jnp.dot(y, fw3.T, precision=hp) + fb3


# ------------------------------------------ main -------------------------------------------
if __name__ == "__main__":
    key = jax.random.PRNGKey(0)
    kx, kp = jax.random.split(key)
    x = jax.random.normal(kx, (B, H_IN, W_IN), jnp.float32)

    raw = build_params(kp)
    lowered = lower_params(raw)

    out = jax.block_until_ready(cnn_eeg_forward(x, lowered))
    ref = jax.block_until_ready(reference_forward(x, raw))
    # f32 path throughout -> tolerance tightened from 2e-2 (v1) to 1e-3 per review.
    np.testing.assert_allclose(np.asarray(out), np.asarray(ref), rtol=1e-3, atol=1e-3)
    print("KERNEL_OK")
</pallas_src>

<mosaic_0001>
module attributes {stable_mosaic.version = 11 : i64} {
  func.func @cnn_eeg_kernel(%arg0: i32, %arg1: memref<40x72xf32, #tpu.memory_space<vmem>>, %arg2: memref<192x201xf32, #tpu.memory_space<vmem>>, %arg3: memref<64x64xf32, #tpu.memory_space<vmem>>, %arg4: memref<192x192xf32, #tpu.memory_space<vmem>>, %arg5: memref<192x481xf32, #tpu.memory_space<vmem>>, %arg6: memref<24x24xf32, #tpu.memory_space<vmem>>, %arg7: memref<192x192xf32, #tpu.memory_space<vmem>>, %arg8: memref<128x577xf32, #tpu.memory_space<vmem>>, %arg9: memref<88x128xf32, #tpu.memory_space<vmem>>, %arg10: memref<2x88xf32, #tpu.memory_space<vmem>>, %arg11: memref<2x2xf32, #tpu.memory_space<vmem>>) attributes {dimension_semantics = [#tpu.dimension_semantics<arbitrary>], iteration_bounds = array<i64: 1>, scalar_prefetch = 0 : i64, scratch_operands = 0 : i64, tpu.core_type = #tpu.core_type<tc>, window_params = [{pipeline_mode = #tpu.pipeline_mode<synchronous>, transform_indices = @transform_0, window_bounds = array<i64: 40, 72>}, {pipeline_mode = #tpu.pipeline_mode<synchronous>, transform_indices = @transform_1, window_bounds = array<i64: 192, 201>}, {pipeline_mode = #tpu.pipeline_mode<synchronous>, transform_indices = @transform_2, window_bounds = array<i64: 64, 64>}, {pipeline_mode = #tpu.pipeline_mode<synchronous>, transform_indices = @transform_3, window_bounds = array<i64: 192, 192>}, {pipeline_mode = #tpu.pipeline_mode<synchronous>, transform_indices = @transform_4, window_bounds = array<i64: 192, 481>}, {pipeline_mode = #tpu.pipeline_mode<synchronous>, transform_indices = @transform_5, window_bounds = array<i64: 24, 24>}, {pipeline_mode = #tpu.pipeline_mode<synchronous>, transform_indices = @transform_6, window_bounds = array<i64: 192, 192>}, {pipeline_mode = #tpu.pipeline_mode<synchronous>, transform_indices = @transform_7, window_bounds = array<i64: 128, 577>}, {pipeline_mode = #tpu.pipeline_mode<synchronous>, transform_indices = @transform_8, window_bounds = array<i64: 88, 128>}, {pipeline_mode = #tpu.pipeline_mode<synchronous>, transform_indices = @transform_9, window_bounds = array<i64: 2, 88>}, {pipeline_mode = #tpu.pipeline_mode<synchronous>, transform_indices = @transform_10, window_bounds = array<i64: 2, 2>}]} {
    %c0 = arith.constant 0 : index
    %c0_0 = arith.constant 0 : index
    %0 = vector.load %arg1[%c0, %c0_0] : memref<40x72xf32, #tpu.memory_space<vmem>>, vector<40x72xf32>
    %1 = vector.extract_strided_slice %0 {offsets = [0, 0], sizes = [40, 64], strides = [1, 1]} : vector<40x72xf32> to vector<40x64xf32>
    %2 = vector.extract_strided_slice %0 {offsets = [0, 2], sizes = [40, 64], strides = [1, 1]} : vector<40x72xf32> to vector<40x64xf32>
    %3 = vector.extract_strided_slice %0 {offsets = [0, 4], sizes = [40, 64], strides = [1, 1]} : vector<40x72xf32> to vector<40x64xf32>
    %4 = vector.extract_strided_slice %0 {offsets = [0, 6], sizes = [40, 64], strides = [1, 1]} : vector<40x72xf32> to vector<40x64xf32>
    %5 = vector.extract_strided_slice %0 {offsets = [0, 8], sizes = [40, 64], strides = [1, 1]} : vector<40x72xf32> to vector<40x64xf32>
    %cst = arith.constant 1.000000e+00 : f32
    %6 = vector.broadcast %cst : f32 to vector<1x64xf32>
    %7 = tpu.concatenate %1, %2, %3, %4, %5, %6 in 0 : vector<40x64xf32>, vector<40x64xf32>, vector<40x64xf32>, vector<40x64xf32>, vector<40x64xf32>, vector<1x64xf32> -> vector<201x64xf32>
    %c0_1 = arith.constant 0 : index
    %c0_2 = arith.constant 0 : index
    %8 = vector.load %arg2[%c0_1, %c0_2] : memref<192x201xf32, #tpu.memory_space<vmem>>, vector<192x201xf32>
    %cst_3 = arith.constant dense<0.000000e+00> : vector<192x64xf32>
    %9 = tpu.matmul %8, %7, %cst_3 {dimension_numbers = #tpu.dot_dimension_numbers<[1], [0], [0], [1], [0, 0, 1, 1], [], []>} : vector<192x201xf32>, vector<201x64xf32>, vector<192x64xf32> -> vector<192x64xf32>
    %cst_4 = arith.constant 0.000000e+00 : f32
    %10 = vector.broadcast %cst_4 : f32 to vector<192x64xf32>
    %11 = arith.maximumf %9, %10 : vector<192x64xf32>
    %c0_5 = arith.constant 0 : index
    %c0_6 = arith.constant 0 : index
    %12 = vector.load %arg3[%c0_5, %c0_6] : memref<64x64xf32, #tpu.memory_space<vmem>>, vector<64x64xf32>
    %cst_7 = arith.constant dense<0.000000e+00> : vector<192x64xf32>
    %13 = tpu.matmul %11, %12, %cst_7 {dimension_numbers = #tpu.dot_dimension_numbers<[1], [0], [0], [1], [0, 0, 1, 1], [], []>} : vector<192x64xf32>, vector<64x64xf32>, vector<192x64xf32> -> vector<192x64xf32>
    %14 = vector.extract_strided_slice %13 {offsets = [0, 0], sizes = [192, 32], strides = [1, 1]} : vector<192x64xf32> to vector<192x32xf32>
    %15 = vector.extract_strided_slice %13 {offsets = [0, 32], sizes = [192, 32], strides = [1, 1]} : vector<192x64xf32> to vector<192x32xf32>
    %16 = arith.maximumf %14, %15 : vector<192x32xf32>
    %c0_8 = arith.constant 0 : index
    %c0_9 = arith.constant 0 : index
    %17 = vector.load %arg4[%c0_8, %c0_9] : memref<192x192xf32, #tpu.memory_space<vmem>>, vector<192x192xf32>
    %cst_10 = arith.constant dense<0.000000e+00> : vector<192x32xf32>
    %18 = tpu.matmul %17, %16, %cst_10 {dimension_numbers = #tpu.dot_dimension_numbers<[1], [0], [0], [1], [0, 0, 1, 1], [], []>} : vector<192x192xf32>, vector<192x32xf32>, vector<192x32xf32> -> vector<192x32xf32>
    %19 = vector.extract_strided_slice %18 {offsets = [0, 0], sizes = [96, 32], strides = [1, 1]} : vector<192x32xf32> to vector<96x32xf32>
    %20 = vector.extract_strided_slice %18 {offsets = [96, 0], sizes = [96, 32], strides = [1, 1]} : vector<192x32xf32> to vector<96x32xf32>
    %21 = arith.maximumf %19, %20 : vector<96x32xf32>
    %22 = vector.extract_strided_slice %21 {offsets = [0, 0], sizes = [96, 24], strides = [1, 1]} : vector<96x32xf32> to vector<96x24xf32>
    %23 = vector.extract_strided_slice %21 {offsets = [0, 2], sizes = [96, 24], strides = [1, 1]} : vector<96x32xf32> to vector<96x24xf32>
    %24 = vector.extract_strided_slice %21 {offsets = [0, 4], sizes = [96, 24], strides = [1, 1]} : vector<96x32xf32> to vector<96x24xf32>
    %25 = vector.extract_strided_slice %21 {offsets = [0, 6], sizes = [96, 24], strides = [1, 1]} : vector<96x32xf32> to vector<96x24xf32>
    %26 = vector.extract_strided_slice %21 {offsets = [0, 8], sizes = [96, 24], strides = [1, 1]} : vector<96x32xf32> to vector<96x24xf32>
    %cst_11 = arith.constant 1.000000e+00 : f32
    %27 = vector.broadcast %cst_11 : f32 to vector<1x24xf32>
    %28 = tpu.concatenate %22, %23, %24, %25, %26, %27 in 0 : vector<96x24xf32>, vector<96x24xf32>, vector<96x24xf32>, vector<96x24xf32>, vector<96x24xf32>, vector<1x24xf32> -> vector<481x24xf32>
    %c0_12 = arith.constant 0 : index
    %c0_13 = arith.constant 0 : index
    %29 = vector.load %arg5[%c0_12, %c0_13] : memref<192x481xf32, #tpu.memory_space<vmem>>, vector<192x481xf32>
    %cst_14 = arith.constant dense<0.000000e+00> : vector<192x24xf32>
    %30 = tpu.matmul %29, %28, %cst_14 {dimension_numbers = #tpu.dot_dimension_numbers<[1], [0], [0], [1], [0, 0, 1, 1], [], []>} : vector<192x481xf32>, vector<481x24xf32>, vector<192x24xf32> -> vector<192x24xf32>
    %cst_15 = arith.constant 0.000000e+00 : f32
    %31 = vector.broadcast %cst_15 : f32 to vector<192x24xf32>
    %32 = arith.maximumf %30, %31 : vector<192x24xf32>
    %c0_16 = arith.constant 0 : index
    %c0_17 = arith.constant 0 : index
    %33 = vector.load %arg6[%c0_16, %c0_17] : memref<24x24xf32, #tpu.memory_space<vmem>>, vector<24x24xf32>
    %cst_18 = arith.constant dense<0.000000e+00> : vector<192x24xf32>
    %34 = tpu.matmul %32, %33, %cst_18 {dimension_numbers = #tpu.dot_dimension_numbers<[1], [0], [0], [1], [0, 0, 1, 1], [], []>} : vector<192x24xf32>, vector<24x24xf32>, vector<192x24xf32> -> vector<192x24xf32>
    %35 = vector.extract_strided_slice %34 {offsets = [0, 0], sizes = [192, 12], strides = [1, 1]} : vector<192x24xf32> to vector<192x12xf32>
    %36 = vector.extract_strided_slice %34 {offsets = [0, 12], sizes = [192, 12], strides = [1, 1]} : vector<192x24xf32> to vector<192x12xf32>
    %37 = arith.maximumf %35, %36 : vector<192x12xf32>
    %c0_19 = arith.constant 0 : index
    %c0_20 = arith.constant 0 : index
    %38 = vector.load %arg7[%c0_19, %c0_20] : memref<192x192xf32, #tpu.memory_space<vmem>>, vector<192x192xf32>
    %cst_21 = arith.constant dense<0.000000e+00> : vector<192x12xf32>
    %39 = tpu.matmul %38, %37, %cst_21 {dimension_numbers = #tpu.dot_dimension_numbers<[1], [0], [0], [1], [0, 0, 1, 1], [], []>} : vector<192x192xf32>, vector<192x12xf32>, vector<192x12xf32> -> vector<192x12xf32>
    %40 = vector.extract_strided_slice %39 {offsets = [0, 0], sizes = [96, 12], strides = [1, 1]} : vector<192x12xf32> to vector<96x12xf32>
    %41 = vector.extract_strided_slice %39 {offsets = [96, 0], sizes = [96, 12], strides = [1, 1]} : vector<192x12xf32> to vector<96x12xf32>
    %42 = arith.maximumf %40, %41 : vector<96x12xf32>
    %43 = vector.extract_strided_slice %42 {offsets = [0, 0], sizes = [96, 2], strides = [1, 1]} : vector<96x12xf32> to vector<96x2xf32>
    %44 = vector.extract_strided_slice %42 {offsets = [0, 2], sizes = [96, 2], strides = [1, 1]} : vector<96x12xf32> to vector<96x2xf32>
    %45 = vector.extract_strided_slice %42 {offsets = [0, 4], sizes = [96, 2], strides = [1, 1]} : vector<96x12xf32> to vector<96x2xf32>
    %46 = vector.extract_strided_slice %42 {offsets = [0, 6], sizes = [96, 2], strides = [1, 1]} : vector<96x12xf32> to vector<96x2xf32>
    %47 = vector.extract_strided_slice %42 {offsets = [0, 8], sizes = [96, 2], strides = [1, 1]} : vector<96x12xf32> to vector<96x2xf32>
    %48 = vector.extract_strided_slice %42 {offsets = [0, 10], sizes = [96, 2], strides = [1, 1]} : vector<96x12xf32> to vector<96x2xf32>
    %cst_22 = arith.constant 1.000000e+00 : f32
    %49 = vector.broadcast %cst_22 : f32 to vector<1x2xf32>
    %50 = tpu.concatenate %43, %44, %45, %46, %47, %48, %49 in 0 : vector<96x2xf32>, vector<96x2xf32>, vector<96x2xf32>, vector<96x2xf32>, vector<96x2xf32>, vector<96x2xf32>, vector<1x2xf32> -> vector<577x2xf32>
    %c0_23 = arith.constant 0 : index
    %c0_24 = arith.constant 0 : index
    %51 = vector.load %arg8[%c0_23, %c0_24] : memref<128x577xf32, #tpu.memory_space<vmem>>, vector<128x577xf32>
    %cst_25 = arith.constant dense<0.000000e+00> : vector<128x2xf32>
    %52 = tpu.matmul %51, %50, %cst_25 {dimension_numbers = #tpu.dot_dimension_numbers<[1], [0], [0], [1], [0, 0, 1, 1], [], []>} : vector<128x577xf32>, vector<577x2xf32>, vector<128x2xf32> -> vector<128x2xf32>
    %cst_26 = arith.constant 0.000000e+00 : f32
    %53 = vector.broadcast %cst_26 : f32 to vector<128x2xf32>
    %54 = arith.maximumf %52, %53 : vector<128x2xf32>
    %c0_27 = arith.constant 0 : index
    %c0_28 = arith.constant 0 : index
    %55 = vector.load %arg9[%c0_27, %c0_28] : memref<88x128xf32, #tpu.memory_space<vmem>>, vector<88x128xf32>
    %cst_29 = arith.constant dense<0.000000e+00> : vector<88x2xf32>
    %56 = tpu.matmul %55, %54, %cst_29 {dimension_numbers = #tpu.dot_dimension_numbers<[1], [0], [0], [1], [0, 0, 1, 1], [], []>} : vector<88x128xf32>, vector<128x2xf32>, vector<88x2xf32> -> vector<88x2xf32>
    %cst_30 = arith.constant 0.000000e+00 : f32
    %57 = vector.broadcast %cst_30 : f32 to vector<88x2xf32>
    %58 = arith.maximumf %56, %57 : vector<88x2xf32>
    %c0_31 = arith.constant 0 : index
    %c0_32 = arith.constant 0 : index
    %59 = vector.load %arg10[%c0_31, %c0_32] : memref<2x88xf32, #tpu.memory_space<vmem>>, vector<2x88xf32>
    %cst_33 = arith.constant dense<0.000000e+00> : vector<2x2xf32>
    %60 = tpu.matmul %59, %58, %cst_33 {dimension_numbers = #tpu.dot_dimension_numbers<[1], [0], [0], [1], [0, 0, 1, 1], [], []>} : vector<2x88xf32>, vector<88x2xf32>, vector<2x2xf32> -> vector<2x2xf32>
    %c0_34 = arith.constant 0 : index
    %c0_35 = arith.constant 0 : index
    %61 = vector.load %arg11[%c0_34, %c0_35] : memref<2x2xf32, #tpu.memory_space<vmem>>, vector<2x2xf32>
    tpu.vector_store %arg11[%c0_34, %c0_35], %60 {strides = array<i32>} : memref<2x2xf32, #tpu.memory_space<vmem>>, vector<2x2xf32>,
    return
  }
  func.func @transform_0(%arg0: i32) -> (i32, i32) {
    %c0_i32 = arith.constant 0 : i32
    %c0_i32_0 = arith.constant 0 : i32
    %c0_i32_1 = arith.constant 0 : i32
    return %c0_i32, %c0_i32_0 : i32, i32
  }
  func.func @transform_1(%arg0: i32) -> (i32, i32) {
    %c0_i32 = arith.constant 0 : i32
    %c0_i32_0 = arith.constant 0 : i32
    %c0_i32_1 = arith.constant 0 : i32
    return %c0_i32, %c0_i32_0 : i32, i32
  }
  func.func @transform_2(%arg0: i32) -> (i32, i32) {
    %c0_i32 = arith.constant 0 : i32
    %c0_i32_0 = arith.constant 0 : i32
    %c0_i32_1 = arith.constant 0 : i32
    return %c0_i32, %c0_i32_0 : i32, i32
  }
  func.func @transform_3(%arg0: i32) -> (i32, i32) {
    %c0_i32 = arith.constant 0 : i32
    %c0_i32_0 = arith.constant 0 : i32
    %c0_i32_1 = arith.constant 0 : i32
    return %c0_i32, %c0_i32_0 : i32, i32
  }
  func.func @transform_4(%arg0: i32) -> (i32, i32) {
    %c0_i32 = arith.constant 0 : i32
    %c0_i32_0 = arith.constant 0 : i32
    %c0_i32_1 = arith.constant 0 : i32
    return %c0_i32, %c0_i32_0 : i32, i32
  }
  func.func @transform_5(%arg0: i32) -> (i32, i32) {
    %c0_i32 = arith.constant 0 : i32
    %c0_i32_0 = arith.constant 0 : i32
    %c0_i32_1 = arith.constant 0 : i32
    return %c0_i32, %c0_i32_0 : i32, i32
  }
  func.func @transform_6(%arg0: i32) -> (i32, i32) {
    %c0_i32 = arith.constant 0 : i32
    %c0_i32_0 = arith.constant 0 : i32
    %c0_i32_1 = arith.constant 0 : i32
    return %c0_i32, %c0_i32_0 : i32, i32
  }
  func.func @transform_7(%arg0: i32) -> (i32, i32) {
    %c0_i32 = arith.constant 0 : i32
    %c0_i32_0 = arith.constant 0 : i32
    %c0_i32_1 = arith.constant 0 : i32
    return %c0_i32, %c0_i32_0 : i32, i32
  }
  func.func @transform_8(%arg0: i32) -> (i32, i32) {
    %c0_i32 = arith.constant 0 : i32
    %c0_i32_0 = arith.constant 0 : i32
    %c0_i32_1 = arith.constant 0 : i32
    return %c0_i32, %c0_i32_0 : i32, i32
  }
  func.func @transform_9(%arg0: i32) -> (i32, i32) {
    %c0_i32 = arith.constant 0 : i32
    %c0_i32_0 = arith.constant 0 : i32
    %c0_i32_1 = arith.constant 0 : i32
    return %c0_i32, %c0_i32_0 : i32, i32
  }
  func.func @transform_10(%arg0: i32) -> (i32, i32) {
    %c0_i32 = arith.constant 0 : i32
    %c0_i32_0 = arith.constant 0 : i32
    %c0_i32_1 = arith.constant 0 : i32
    return %c0_i32, %c0_i32_0 : i32, i32
  }
}

</mosaic_0001>

<bundles_post_ra>
// kernel: tpu_custom_call.1
= control target key start
LH: loop header
LB: loop body
LE: loop exit
PB: predicated region body
PF: predicated region fallthrough
CT: control target
= control target key end

     0   :  { %15 = vsyncpa [#allocation3], 0  ;;  %s6252_s0 = inlined_call_operand.hbm [shape: f32[40,72], index: 0, kind: input, shape index: {}]   ;;  %s6253_s1 = inlined_call_operand.vmem [shape: f32[192,201], index: 1, kind: input, shape index: {}]   ;;  %s6254_s2 = inlined_call_operand.vmem [shape: f32[64,64], index: 2, kind: input, shape index: {}]   ;;  %s6255_s3 = inlined_call_operand.hbm [shape: f32[192,192], index: 3, kind: input, shape index: {}]   ;;  %s6256_s4 = inlined_call_operand.vmem [shape: f32[192,481], index: 4, kind: input, shape index: {}]   ;;  %s6257_s5 = inlined_call_operand.hbm [shape: f32[24,24], index: 5, kind: input, shape index: {}]   ;;  %s6258_s6 = inlined_call_operand.hbm [shape: f32[192,192], index: 6, kind: input, shape index: {}]   ;;  %s6259_s7 = inlined_call_operand.vmem [shape: f32[128,577], index: 7, kind: input, shape index: {}]   ;;  %s6260_s8 = inlined_call_operand.hbm [shape: f32[88,128], index: 8, kind: input, shape index: {}]   ;;  %s6261_s9 = inlined_call_operand.vmem [shape: f32[2,88], index: 9, kind: input, shape index: {}]   ;;  %s6262_s10 = inlined_call_operand.hbm [shape: f32[2,2], index: 10, kind: output, shape index: {}]  }
   0x1   :  { %16 = vsyncpa [#allocation6], 0 }
   0x2   :  { %17 = vsyncpa [#allocation9], 0 }
   0x3   :  { %18 = vsyncpa [#allocation4], 0  ;;  %s4457_s13 = smov [#allocation5]  }
   0x4   :  { %s40_s14 = sshll.u32 %s4457_s13, 4  ;;  %s41_s14 = int_to_ptr.vmem [resolvable:$true] %s40_s14 }
   0x5   :  { %s4337_s15 = scalar_lea.vmem %s41_s14, 6144  ;;  %p4342_p1 = scmp.lt.s32.totalorder %s41_s14, %s41_s14 }
   0x6   :  { %p4338_p0 = scmp.ne.s32.totalorder %s41_s14, %s4337_s15  ;;  %p4343_p2 = scmp.lt.s32.totalorder %s4337_s15, %s4337_s15 }
   0x8   :  { %p4344_p3 = por %p4343_p2, %p4342_p1 }
   0xa   :  { %p4345_p4 = pnand %p4344_p3, %p4338_p0 }
   0xc   :  { %4348 = shalt.err (!%p4345_p4)
}
   0xd   :  { %s4458_s16 = smov 256   ;;  %s4459_s17 = smov 16  }
   0xe   :  { %46 = dma.hbm_to_vmem [thread:$0]  %s6255_s3, 6144, %s41_s14, [#allocation6], %s4458_s16, %s4458_s16, %s4459_s17  }
   0xf   :  { %s4460_s20 = smov [#allocation8]   ;;  %s4461_s22 = smov [#allocation2]  }
  0x10   :  { %s66_s21 = sshll.u32 %s4460_s20, 4  ;;  %s24_s23 = sshll.u32 %s4461_s22, 4  ;;  %s67_s21 = int_to_ptr.vmem [resolvable:$true] %s66_s21  ;;  %s25_s23 = int_to_ptr.vmem [resolvable:$true] %s24_s23 }
  0x11   :  { %s4357_s24 = scalar_lea.vmem %s67_s21, 6144  ;;  %p4362_p6 = scmp.lt.s32.totalorder %s67_s21, %s67_s21 }
  0x12   :  { %p4358_p5 = scmp.ne.s32.totalorder %s67_s21, %s4357_s24  ;;  %p4363_p7 = scmp.lt.s32.totalorder %s4357_s24, %s4357_s24 }
  0x14   :  { %p4364_p8 = por %p4363_p7, %p4362_p6 }
  0x16   :  { %p4365_p9 = pnand %p4364_p8, %p4358_p5 }
  0x18   :  { %4368 = shalt.err (!%p4365_p9)
}
  0x19   :  { %72 = dma.hbm_to_vmem [thread:$0]  %s6258_s6, 6144, %s67_s21, [#allocation9], %s4458_s16, %s4458_s16, %s4459_s17  }
  0x1a   :  { %s4377_s27 = scalar_lea.vmem %s25_s23, 640  ;;  %p4382_p11 = scmp.lt.s32.totalorder %s25_s23, %s25_s23 }
  0x1b   :  { %p4378_p10 = scmp.ne.s32.totalorder %s25_s23, %s4377_s27  ;;  %p4383_p12 = scmp.lt.s32.totalorder %s4377_s27, %s4377_s27 }
  0x1d   :  { %p4384_p13 = por %p4383_p12, %p4382_p11 }
  0x1f   :  { %p4385_p0 = pnand %p4384_p13, %p4378_p10 }
  0x21   :  { %4388 = shalt.err (!%p4385_p0)
}
  0x22   :  { %s4462_s3 = smov 128   ;;  %s4463_s28 = smov 8  }
  0x23   :  { %30 = dma.hbm_to_vmem [thread:$0]  %s6252_s0, 640, %s25_s23, [#allocation3], %s4462_s3, %s4462_s3, %s4463_s28  }
  0x24   :  { %s4464_s11 = smov [#allocation7]   ;;  %s4465_s13 = smov [#allocation10]  }
  0x25   :  { %s54_s12 = sshll.u32 %s4464_s11, 4  ;;  %s80_s14 = sshll.u32 %s4465_s13, 4  ;;  %s55_s12 = int_to_ptr.vmem [resolvable:$true] %s54_s12  ;;  %s81_s14 = int_to_ptr.vmem [resolvable:$true] %s80_s14 }
  0x26   :  { %s4397_s6 = scalar_lea.vmem %s55_s12, 384  ;;  %p4402_p2 = scmp.lt.s32.totalorder %s55_s12, %s55_s12 }
  0x27   :  { %p4398_p1 = scmp.ne.s32.totalorder %s55_s12, %s4397_s6  ;;  %p4403_p3 = scmp.lt.s32.totalorder %s4397_s6, %s4397_s6 }
  0x29   :  { %p4404_p4 = por %p4403_p3, %p4402_p2 }
  0x2b   :  { %p4405_p5 = pnand %p4404_p4, %p4398_p1 }
  0x2d   :  { %4408 = shalt.err (!%p4405_p5)
}
  0x2e   :  { %60 = dma.hbm_to_vmem [thread:$0]  %s6257_s5, 384, %s55_s12, [#allocation6], %s4462_s3, %s4462_s3, %s4463_s28  }
  0x2f   :  { %s4417_s17 = scalar_lea.vmem %s81_s14, 1408  ;;  %p4422_p7 = scmp.lt.s32.totalorder %s81_s14, %s81_s14 }
  0x30   :  { %p4418_p6 = scmp.ne.s32.totalorder %s81_s14, %s4417_s17  ;;  %p4423_p8 = scmp.lt.s32.totalorder %s4417_s17, %s4417_s17 }
  0x32   :  { %p4424_p9 = por %p4423_p8, %p4422_p7 }
  0x34   :  { %p4425_p10 = pnand %p4424_p9, %p4418_p6 }
  0x36   :  { %4428 = shalt.err (!%p4425_p10)
}
  0x37   :  { %86 = dma.hbm_to_vmem [thread:$0]  %s6260_s8, 1408, %s81_s14, [#allocation9], %s4462_s3, %s4462_s3, %s4463_s28  }
  0x38   :  { %4449 = dma.done.wait [#allocation3], 640  }
  0x39   :  { %4450 = vsyncadd [#allocation3], 4294966656 }
  0x3a   :  { %4451 = dma.done.wait [#allocation6], 6528  }
  0x3b   :  { %4452 = vsyncadd [#allocation6], 4294960768 }
  0x3c   :  { %4453 = dma.done.wait [#allocation9], 7552  }
  0x3d   :  { %4454 = vsyncadd [#allocation9], 4294959744  ;;  %v6263_v0 = vmov 0.0   ;;  %v4548_v1 = vld [vmem:[#allocation2] sm:$0xff]  ;;  %v4550_v2 = vld [vmem:[#allocation2 + $0x18] sm:$0xff]  ;;  %s4467_s5 = smov 122  }
  0x3e   :  { %299 = vmatprep.subr.mxu0 %v6263_v0  ;;  %144 = vrot.lane.b32.xlu0 %v4548_v1, %s4467_s5  ;;  %s4468_s19 = smov 124   ;;  %v4556_v3 = vld [vmem:[#allocation2 + $0x20] sm:$0xff]  ;;  %v4558_v4 = vld [vmem:[#allocation2 + $0x10] sm:$0xff]  ;;  %v4564_v5 = vld [vmem:[#allocation2 + $0x8] sm:$0xff]  ;;  %s4469_s8 = smov 126   ;;  %vm222_vm0 = vcmask 596992  }
  0x3f   :  { %135 = vrot.lane.b32.xlu1 %v4550_v2, %s4468_s19  ;;  %s4470_s20 = smov 120   ;;  %v175_v6 = vld [vmem:[%s6253_s1 + $0x8] sm:$0xff]  ;;  %v515_v17 = vld [vmem:[%s6254_s2 + $0x38] sm:$0xff]  ;;  %v514_v18 = vld [vmem:[%s6254_s2 + $0x30] sm:$0xff]  ;;  %vm295_vm1 = vcmask 1040384   ;;  %v4471_v26 = vmov 1.0  }
  0x40   :  { %3637 = vmatprep.mubr.msk.f32.mxu0 %vm222_vm0, %v175_v6  ;;  %4083 = vmatprep.subr.mxu1 %v515_v17  ;;  %v513_v20 = vld [vmem:[%s6254_s2 + $0x28] sm:$0xff]  ;;  %v512_v21 = vld [vmem:[%s6254_s2 + $0x20] sm:$0xff]  ;;  %v511_v22 = vld [vmem:[%s6254_s2 + $0x18] sm:$0xff]  ;;  %vm516_vm2 = vcmask 523264   ;;  %vm1463_vm3 = vcmask 793600   ;;  %vm1933_vm4 = vcmask 195584  }
  0x41   :  { %4084 = vmatpush3.msra.mxu1 %v515_v17  ;;  %v174_v33 = vld [vmem:[%s6253_s1] sm:$0xff]  ;;  %v177_v34 = vld [vmem:[%s6253_s1 + $0x18] sm:$0xff]  ;;  %v176_v35 = vld [vmem:[%s6253_s1 + $0x10] sm:$0xff]  ;;  %s4474_s13 = smov 118   ;;  %vm2900_vm5 = vcmask 531456   ;;  %vm4475_vm6 = vmmov 0  }
  0x42   :  { %137 = vrot.lane.b32.xlu0 %v4556_v3, %s4468_s19  ;;  %4085 = vmatprep.subr.mxu1 %v514_v18  ;;  %v179_v36 = vld [vmem:[%s6253_s1 + $0x28] sm:$0xff]  ;;  %v178_v37 = vld [vmem:[%s6253_s1 + $0x20] sm:$0xff]  ;;  %v181_v38 = vld [vmem:[%s6253_s1 + $0x38] sm:$0xff]  ;;  %vm3543_vm7 = vcmask 719872   ;;  %s4476_s29 = smov [#allocation11]   ;;  %vm3617_vm8 = vcmask 9216  }
  0x43   :  { %133 = vrot.lane.b32.xlu1 %v4558_v4, %s4468_s19  ;;  %4086 = vmatpush3.msra.mxu1 %v514_v18  ;;  %v180_v39 = vld [vmem:[%s6253_s1 + $0x30] sm:$0xff]  ;;  %v183_v40 = vld [vmem:[%s6253_s1 + $0x48] sm:$0xff]  ;;  %v182_v41 = vld [vmem:[%s6253_s1 + $0x40] sm:$0xff]  ;;  %s3625_s30 = sshll.u32 %s4476_s29, 4  ;;  %s3626_s30 = int_to_ptr.vmem [resolvable:$true] %s3625_s30 }
  0x44   :  { %4087 = vmatprep.subr.mxu1 %v513_v20  ;;  %v185_v42 = vld [vmem:[%s6253_s1 + $0x58] sm:$0xff]  ;;  %v184_v43 = vld [vmem:[%s6253_s1 + $0x50] sm:$0xff]  ;;  %v187_v44 = vld [vmem:[%s6253_s1 + $0x68] sm:$0xff]  ;;  %s4429_s11 = scalar_lea.vmem %s3626_s30, 32  ;;  %p4434_p12 = scmp.lt.s32.totalorder %s3626_s30, %s3626_s30 }
  0x45   :  { %4088 = vmatpush3.msra.mxu1 %v513_v20  ;;  %v186_v45 = vld [vmem:[%s6253_s1 + $0x60] sm:$0xff]  ;;  %v189_v46 = vld [vmem:[%s6253_s1 + $0x78] sm:$0xff]  ;;  %v188_v47 = vld [vmem:[%s6253_s1 + $0x70] sm:$0xff]  ;;  %p4430_p11 = scmp.ne.s32.totalorder %s3626_s30, %s4429_s11  ;;  %p4435_p13 = scmp.lt.s32.totalorder %s4429_s11, %s4429_s11 }
  0x46   :  { %131 = vrot.lane.b32.xlu0 %v4564_v5, %s4468_s19  ;;  %4089 = vmatprep.subr.mxu1 %v512_v21  ;;  %v191_v48 = vld [vmem:[%s6253_s1 + $0x88] sm:$0xff]  ;;  %v190_v49 = vld [vmem:[%s6253_s1 + $0x80] sm:$0xff]  ;;  %v193_v50 = vld [vmem:[%s6253_s1 + $0x98] sm:$0xff] }
  0x47   :  { %129 = vrot.lane.b32.xlu1 %v4548_v1, %s4468_s19  ;;  %4090 = vmatpush3.msra.mxu1 %v512_v21  ;;  %v192_v51 = vld [vmem:[%s6253_s1 + $0x90] sm:$0xff]  ;;  %v195_v52 = vld [vmem:[%s6253_s1 + $0xa8] sm:$0xff]  ;;  %v194_v53 = vld [vmem:[%s6253_s1 + $0xa0] sm:$0xff]  ;;  %p4436_p0 = por %p4435_p13, %p4434_p12 }
  0x48   :  { %4091 = vmatprep.subr.mxu1 %v511_v22  ;;  %v197_v54 = vld [vmem:[%s6253_s1 + $0xb8] sm:$0xff]  ;;  %v196_v55 = vld [vmem:[%s6253_s1 + $0xb0] sm:$0xff]  ;;  %v199_v56 = vld [vmem:[%s6253_s1 + $0xc8] sm:$0xff] }
  0x49   :  { %4092 = vmatpush3.msra.mxu1 %v511_v22  ;;  %v198_v57 = vld [vmem:[%s6253_s1 + $0xc0] sm:$0xff]  ;;  %v201_v58 = vld [vmem:[%s6253_s1 + $0xd8] sm:$0xff]  ;;  %v200_v59 = vld [vmem:[%s6253_s1 + $0xd0] sm:$0xff]  ;;  %p4437_p1 = pnand %p4436_p0, %p4430_p11 }
  0x4a   :  { %122 = vrot.lane.b32.xlu0 %v4556_v3, %s4469_s8  ;;  %v203_v60 = vld [vmem:[%s6253_s1 + $0xe8] sm:$0xff]  ;;  %v202_v61 = vld [vmem:[%s6253_s1 + $0xe0] sm:$0xff]  ;;  %v205_v62 = vld [vmem:[%s6253_s1 + $0xf8] sm:$0xff] }
  0x4b   :  { %120 = vrot.lane.b32.xlu1 %v4550_v2, %s4469_s8  ;;  %v204_v63 = vld [vmem:[%s6253_s1 + $0xf0] sm:$0xff]  ;;  %v211_v6 = vld [vmem:[%s6253_s1 + $0x128] sm:$0xff]  ;;  %v218_v17 = vld [vmem:[%s6253_s1 + $0x160] sm:$0xff] }
  0x4c   :  { %v221_v18 = vld [vmem:[%s6253_s1 + $0x178] sm:$0xff] }
  0x4e   :  { %118 = vrot.lane.b32.xlu0 %v4558_v4, %s4469_s8 }
  0x4f   :  { %116 = vrot.lane.b32.xlu1 %v4564_v5, %s4469_s8 }
  0x52   :  { %114 = vrot.lane.b32.xlu0 %v4548_v1, %s4469_s8 }
  0x53   :  { %167 = vrot.lane.b32.xlu1 %v4556_v3, %s4470_s20 }
  0x56   :  { %165 = vrot.lane.b32.xlu0 %v4550_v2, %s4470_s20 }
  0x57   :  { %163 = vrot.lane.b32.xlu1 %v4558_v4, %s4470_s20 }
  0x5a   :  { %161 = vrot.lane.b32.xlu0 %v4564_v5, %s4470_s20 }
  0x5b   :  { %159 = vrot.lane.b32.xlu1 %v4548_v1, %s4470_s20 }
  0x5e   :  { %152 = vrot.lane.b32.xlu0 %v4556_v3, %s4467_s5 }
  0x5f   :  { %150 = vrot.lane.b32.xlu1 %v4550_v2, %s4467_s5 }
  0x62   :  { %148 = vrot.lane.b32.xlu0 %v4558_v4, %s4467_s5 }
  0x63   :  { %146 = vrot.lane.b32.xlu1 %v4564_v5, %s4467_s5 }
  0xb0   :  { %v145_v7 = vpop.permute.xlu0 %144 }
  0xb1   :  { %v136_v8 = vpop.permute.xlu1 %135  ;;  %300 = vmatpush1.msra.mxu0 %v145_v7  ;;  %v509_v7 = vld [vmem:[%s6254_s2 + $0x8] sm:$0xff] }
  0xb2   :  { %301 = vmatprep.subr.mxu0 %v6263_v0 }
  0xb4   :  { %v138_v9 = vpop.permute.xlu0 %137 }
  0xb5   :  { %v134_v10 = vpop.permute.xlu1 %133  ;;  %302 = vmatpush1.msra.mxu0 %v138_v9  ;;  %v210_v9 = vld [vmem:[%s6253_s1 + $0x120] sm:$0xff] }
  0xb6   :  { %303 = vmatprep.subr.mxu0 %v6263_v0 }
  0xb7   :  { %304 = vmatpush1.msra.mxu0 %v136_v8  ;;  %v508_v8 = vld [vmem:[%s6254_s2] sm:$0xff] }
  0xb8   :  { %305 = vmatprep.subr.mxu0 %v6263_v0  ;;  %v132_v11 = vpop.permute.xlu0 %131 }
  0xb9   :  { %v130_v12 = vpop.permute.xlu1 %129  ;;  %306 = vmatpush1.msra.mxu0 %v134_v10  ;;  %v213_v10 = vld [vmem:[%s6253_s1 + $0x138] sm:$0xff] }
  0xba   :  { %307 = vmatprep.subr.mxu0 %v6263_v0 }
  0xbb   :  { %308 = vmatpush1.msra.mxu0 %v132_v11  ;;  %v212_v11 = vld [vmem:[%s6253_s1 + $0x130] sm:$0xff] }
  0xbc   :  { %309 = vmatprep.subr.mxu0 %v6263_v0  ;;  %v123_v13 = vpop.permute.xlu0 %122 }
  0xbd   :  { %v121_v14 = vpop.permute.xlu1 %120  ;;  %310 = vmatpush1.msra.mxu0 %v130_v12  ;;  %v215_v12 = vld [vmem:[%s6253_s1 + $0x148] sm:$0xff] }
  0xbe   :  { %311 = vmatprep.subr.mxu0 %v6263_v0 }
  0xbf   :  { %312 = vmatpush1.msra.mxu0 %v123_v13  ;;  %v214_v13 = vld [vmem:[%s6253_s1 + $0x140] sm:$0xff] }
  0xc0   :  { %313 = vmatprep.subr.mxu0 %v6263_v0  ;;  %v119_v15 = vpop.permute.xlu0 %118 }
  0xc1   :  { %314 = vmatpush1.msra.mxu0 %v121_v14  ;;  %v117_v16 = vpop.permute.xlu1 %116  ;;  %v217_v14 = vld [vmem:[%s6253_s1 + $0x158] sm:$0xff] }
  0xc2   :  { %315 = vmatprep.subr.mxu0 %v6263_v0 }
  0xc3   :  { %316 = vmatpush1.msra.mxu0 %v119_v15  ;;  %v216_v15 = vld [vmem:[%s6253_s1 + $0x150] sm:$0xff] }
  0xc4   :  { %317 = vmatprep.subr.mxu0 %v6263_v0  ;;  %v115_v19 = vpop.permute.xlu0 %114 }
  0xc5   :  { %318 = vmatpush1.msra.mxu0 %v117_v16  ;;  %v168_v23 = vpop.permute.xlu1 %167  ;;  %v219_v16 = vld [vmem:[%s6253_s1 + $0x168] sm:$0xff] }
  0xc6   :  { %319 = vmatprep.subr.mxu0 %v6263_v0 }
  0xc7   :  { %320 = vmatpush1.msra.mxu0 %v115_v19  ;;  %v220_v19 = vld [vmem:[%s6253_s1 + $0x170] sm:$0xff] }
  0xc8   :  { %321 = vmatprep.subr.mxu0 %v6263_v0  ;;  %v166_v24 = vpop.permute.xlu0 %165 }
  0xc9   :  { %322 = vmatpush1.msra.mxu0 %v4556_v3  ;;  %v164_v25 = vpop.permute.xlu1 %163  ;;  %v209_v3 = vld [vmem:[%s6253_s1 + $0x118] sm:$0xff] }
  0xca   :  { %323 = vmatprep.subr.mxu0 %v6263_v0 }
  0xcb   :  { %324 = vmatpush1.msra.mxu0 %v4550_v2  ;;  %v206_v2 = vld [vmem:[%s6253_s1 + $0x100] sm:$0xff] }
  0xcc   :  { %325 = vmatprep.subr.mxu0 %v6263_v0  ;;  %v162_v27 = vpop.permute.xlu0 %161 }
  0xcd   :  { %326 = vmatpush1.msra.mxu0 %v4558_v4  ;;  %v160_v28 = vpop.permute.xlu1 %159  ;;  %v510_v4 = vld [vmem:[%s6254_s2 + $0x10] sm:$0xff] }
  0xce   :  { %327 = vmatprep.subr.mxu0 %v6263_v0  ;;  %4093 = vmatprep.subr.mxu1 %v510_v4 }
  0xcf   :  { %328 = vmatpush1.msra.mxu0 %v4564_v5  ;;  %v208_v5 = vld [vmem:[%s6253_s1 + $0x110] sm:$0xff]  ;;  %4094 = vmatpush3.msra.mxu1 %v510_v4 }
  0xd0   :  { %329 = vmatprep.subr.mxu0 %v6263_v0  ;;  %v153_v29 = vpop.permute.xlu0 %152  ;;  %4095 = vmatprep.subr.mxu1 %v509_v7 }
  0xd1   :  { %330 = vmatpush1.msra.mxu0 %v4548_v1  ;;  %v151_v30 = vpop.permute.xlu1 %150  ;;  %v207_v1 = vld [vmem:[%s6253_s1 + $0x108] sm:$0xff]  ;;  %4096 = vmatpush3.msra.mxu1 %v509_v7  ;;  %s4472_s1 = smov 96  }
  0xd2   :  { %343 = vmatprep.subr.mxu0 %v6263_v0  ;;  %4097 = vmatprep.subr.mxu1 %v508_v8 }
  0xd3   :  { %3636 = vmatpush2.msk.msra.mxu0 %vm295_vm1, %v4471_v26  ;;  %4098 = vmatpush3.msra.mxu1 %v508_v8 }
  0xd4   :  { %345 = vmatprep.subr.mxu0 %v6263_v0  ;;  %v149_v31 = vpop.permute.xlu0 %148  ;;  %1014 = vmatprep.subr.mxu1 %v6263_v0 }
  0xd5   :  { %346 = vmatpush2.msra.mxu0 %v168_v23  ;;  %v147_v32 = vpop.permute.xlu1 %146 }
  0xd6   :  { %347 = vmatprep.subr.mxu0 %v6263_v0 }
  0xd7   :  { %348 = vmatpush2.msra.mxu0 %v166_v24 }
  0xd8   :  { %349 = vmatprep.subr.mxu0 %v6263_v0 }
  0xd9   :  { %350 = vmatpush2.msra.mxu0 %v164_v25 }
  0xda   :  { %351 = vmatprep.subr.mxu0 %v6263_v0 }
  0xdb   :  { %352 = vmatpush2.msra.mxu0 %v162_v27 }
  0xdc   :  { %353 = vmatprep.subr.mxu0 %v6263_v0 }
  0xdd   :  { %354 = vmatpush2.msra.mxu0 %v160_v28 }
  0xde   :  { %355 = vmatprep.subr.mxu0 %v6263_v0 }
  0xdf   :  { %356 = vmatpush2.msra.mxu0 %v153_v29 }
  0xe0   :  { %357 = vmatprep.subr.mxu0 %v6263_v0 }
  0xe1   :  { %358 = vmatpush2.msra.mxu0 %v151_v30 }
  0xe2   :  { %359 = vmatprep.subr.mxu0 %v6263_v0 }
  0xe3   :  { %360 = vmatpush2.msra.mxu0 %v149_v31 }
  0xe4   :  { %361 = vmatprep.subr.mxu0 %v6263_v0 }
  0xe5   :  { %362 = vmatpush2.msra.mxu0 %v147_v32 }
  0xe6   :  { %364 = vmatmul.mubr.f32.vlgmr.msra.gmra.mxu0 %v174_v33  ;;  %1536 = vmatprep.subr.mxu0 %v6263_v0 }
  0xe7   :  { %3638 = vmatprep.mubr.msk.f32.mxu0 %vm222_vm0, %v177_v34 }
  0xea   :  { %369 = vmatmul.mubr.f32.gmra.mxu0 %v176_v35 }
  0xeb   :  { %3639 = vmatprep.mubr.msk.f32.mxu0 %vm222_vm0, %v179_v36 }
  0xee   :  { %374 = vmatmul.mubr.f32.gmra.mxu0 %v178_v37 }
  0xef   :  { %3640 = vmatprep.mubr.msk.f32.mxu0 %vm222_vm0, %v181_v38 }
  0xf2   :  { %379 = vmatmul.mubr.f32.gmra.mxu0 %v180_v39 }
  0xf3   :  { %3641 = vmatprep.mubr.msk.f32.mxu0 %vm222_vm0, %v183_v40 }
  0xf6   :  { %384 = vmatmul.mubr.f32.gmra.mxu0 %v182_v41 }
  0xf7   :  { %3642 = vmatprep.mubr.msk.f32.mxu0 %vm222_vm0, %v185_v42 }
  0xfa   :  { %389 = vmatmul.mubr.f32.gmra.mxu0 %v184_v43 }
  0xfb   :  { %3643 = vmatprep.mubr.msk.f32.mxu0 %vm222_vm0, %v187_v44 }
  0xfe   :  { %394 = vmatmul.mubr.f32.gmra.mxu0 %v186_v45 }
  0xff   :  { %3644 = vmatprep.mubr.msk.f32.mxu0 %vm222_vm0, %v189_v46 }
 0x102   :  { %399 = vmatmul.mubr.f32.gmra.mxu0 %v188_v47 }
 0x103   :  { %3645 = vmatprep.mubr.msk.f32.mxu0 %vm222_vm0, %v191_v48 }
 0x106   :  { %404 = vmatmul.mubr.f32.gmra.mxu0 %v190_v49 }
 0x107   :  { %3646 = vmatprep.mubr.msk.f32.mxu0 %vm222_vm0, %v193_v50 }
 0x10a   :  { %409 = vmatmul.mubr.f32.gmra.mxu0 %v192_v51 }
 0x10b   :  { %3647 = vmatprep.mubr.msk.f32.mxu0 %vm222_vm0, %v195_v52 }
 0x10e   :  { %414 = vmatmul.mubr.f32.gmra.mxu0 %v194_v53 }
 0x10f   :  { %3648 = vmatprep.mubr.msk.f32.mxu0 %vm222_vm0, %v197_v54 }
 0x112   :  { %419 = vmatmul.mubr.f32.gmra.mxu0 %v196_v55 }
 0x113   :  { %3649 = vmatprep.mubr.msk.f32.mxu0 %vm222_vm0, %v199_v56 }
 0x116   :  { %424 = vmatmul.mubr.f32.gmra.mxu0 %v198_v57 }
 0x117   :  { %3650 = vmatprep.mubr.msk.f32.mxu0 %vm222_vm0, %v201_v58 }
 0x11a   :  { %429 = vmatmul.mubr.f32.gmra.mxu0 %v200_v59 }
 0x11b   :  { %3651 = vmatprep.mubr.msk.f32.mxu0 %vm222_vm0, %v203_v60 }
 0x11e   :  { %434 = vmatmul.mubr.f32.gmra.mxu0 %v202_v61 }
 0x11f   :  { %3652 = vmatprep.mubr.msk.f32.mxu0 %vm222_vm0, %v205_v62 }
 0x122   :  { %439 = vmatmul.mubr.f32.gmra.mxu0 %v204_v63 }
 0x123   :  { %3653 = vmatprep.mubr.msk.f32.mxu0 %vm222_vm0, %v207_v1 }
 0x126   :  { %444 = vmatmul.mubr.f32.gmra.mxu0 %v206_v2 }
 0x127   :  { %3654 = vmatprep.mubr.msk.f32.mxu0 %vm222_vm0, %v209_v3 }
 0x12a   :  { %449 = vmatmul.mubr.f32.gmra.mxu0 %v208_v5 }
 0x12b   :  { %3655 = vmatprep.mubr.msk.f32.mxu0 %vm222_vm0, %v211_v6 }
 0x12e   :  { %454 = vmatmul.mubr.f32.gmra.mxu0 %v210_v9 }
 0x12f   :  { %3656 = vmatprep.mubr.msk.f32.mxu0 %vm222_vm0, %v213_v10 }
 0x132   :  { %459 = vmatmul.mubr.f32.gmra.mxu0 %v212_v11 }
 0x133   :  { %3657 = vmatprep.mubr.msk.f32.mxu0 %vm222_vm0, %v215_v12 }
 0x136   :  { %464 = vmatmul.mubr.f32.gmra.mxu0 %v214_v13 }
 0x137   :  { %3658 = vmatprep.mubr.msk.f32.mxu0 %vm222_vm0, %v217_v14 }
 0x13a   :  { %469 = vmatmul.mubr.f32.gmra.mxu0 %v216_v15 }
 0x13b   :  { %3659 = vmatprep.mubr.msk.f32.mxu0 %vm222_vm0, %v219_v16 }
 0x13e   :  { %474 = vmatmul.mubr.f32.gmra.mxu0 %v218_v17 }
 0x13f   :  { %3660 = vmatprep.mubr.msk.f32.mxu0 %vm222_vm0, %v221_v18 }
 0x142   :  { %479 = vmatmul.mubr.f32.gmra.mxu0 %v220_v19 }
 0x1a6   :  { %v365_v20 = vpop.f32.mrf.mxu0 }
 0x1a7   :  { %v484_v21 = vmax.f32 %v365_v20, 0.0 }
 0x1a8   :  { %v367_v22 = vpop.f32.mrf.mxu0 }
 0x1a9   :  { %4099 = vmatprep.mubr.msk.f32.mxu1 %vm516_vm2, %v484_v21 }
 0x1aa   :  { %v370_v23 = vpop.f32.mrf.mxu0 }
 0x1ab   :  { %v485_v24 = vmax.f32 %v370_v23, 0.0 }
 0x1ac   :  { %v372_v25 = vpop.f32.mrf.mxu0 }
 0x1ad   :  { %4100 = vmatmul.mubr.msk.f32.vlgmr.msra.gmra.mxu1 %vm516_vm2, %v485_v24 }
 0x1ae   :  { %v375_v27 = vpop.f32.mrf.mxu0 }
 0x1af   :  { %v486_v28 = vmax.f32 %v375_v27, 0.0 }
 0x1b0   :  { %v377_v29 = vpop.f32.mrf.mxu0 }
 0x1b1   :  { %4102 = vmatprep.mubr.msk.f32.mxu1 %vm516_vm2, %v486_v28 }
 0x1b2   :  { %v380_v30 = vpop.f32.mrf.mxu0 }
 0x1b3   :  { %v487_v31 = vmax.f32 %v380_v30, 0.0 }
 0x1b4   :  { %v382_v32 = vpop.f32.mrf.mxu0 }
 0x1b5   :  { %4103 = vmatmul.mubr.msk.f32.gmra.mxu1 %vm516_vm2, %v487_v31 }
 0x1b6   :  { %v385_v33 = vpop.f32.mrf.mxu0 }
 0x1b7   :  { %v488_v34 = vmax.f32 %v385_v33, 0.0 }
 0x1b8   :  { %v387_v35 = vpop.f32.mrf.mxu0 }
 0x1b9   :  { %4105 = vmatprep.mubr.msk.f32.mxu1 %vm516_vm2, %v488_v34 }
 0x1ba   :  { %v390_v36 = vpop.f32.mrf.mxu0 }
 0x1bb   :  { %v489_v37 = vmax.f32 %v390_v36, 0.0 }
 0x1bc   :  { %v392_v38 = vpop.f32.mrf.mxu0 }
 0x1bd   :  { %4106 = vmatmul.mubr.msk.f32.gmra.mxu1 %vm516_vm2, %v489_v37 }
 0x1be   :  { %v395_v39 = vpop.f32.mrf.mxu0 }
 0x1bf   :  { %v490_v40 = vmax.f32 %v395_v39, 0.0 }
 0x1c0   :  { %v397_v41 = vpop.f32.mrf.mxu0 }
 0x1c1   :  { %4108 = vmatprep.mubr.msk.f32.mxu1 %vm516_vm2, %v490_v40 }
 0x1c2   :  { %v400_v42 = vpop.f32.mrf.mxu0 }
 0x1c3   :  { %v491_v43 = vmax.f32 %v400_v42, 0.0 }
 0x1c4   :  { %v402_v44 = vpop.f32.mrf.mxu0 }
 0x1c5   :  { %4109 = vmatmul.mubr.msk.f32.gmra.mxu1 %vm516_vm2, %v491_v43 }
 0x1c6   :  { %v405_v45 = vpop.f32.mrf.mxu0 }
 0x1c7   :  { %v492_v46 = vmax.f32 %v405_v45, 0.0 }
 0x1c8   :  { %v407_v47 = vpop.f32.mrf.mxu0 }
 0x1c9   :  { %4111 = vmatprep.mubr.msk.f32.mxu1 %vm516_vm2, %v492_v46 }
 0x1ca   :  { %v410_v48 = vpop.f32.mrf.mxu0 }
 0x1cb   :  { %v493_v49 = vmax.f32 %v410_v48, 0.0 }
 0x1cc   :  { %v412_v50 = vpop.f32.mrf.mxu0 }
 0x1cd   :  { %4112 = vmatmul.mubr.msk.f32.gmra.mxu1 %vm516_vm2, %v493_v49 }
 0x1ce   :  { %v415_v51 = vpop.f32.mrf.mxu0 }
 0x1cf   :  { %v494_v52 = vmax.f32 %v415_v51, 0.0 }
 0x1d0   :  { %v417_v53 = vpop.f32.mrf.mxu0 }
 0x1d1   :  { %4114 = vmatprep.mubr.msk.f32.mxu1 %vm516_vm2, %v494_v52 }
 0x1d2   :  { %v420_v54 = vpop.f32.mrf.mxu0 }
 0x1d3   :  { %v495_v55 = vmax.f32 %v420_v54, 0.0 }
 0x1d4   :  { %v422_v56 = vpop.f32.mrf.mxu0 }
 0x1d5   :  { %4115 = vmatmul.mubr.msk.f32.gmra.mxu1 %vm516_vm2, %v495_v55  ;;  %v895_v55 = vld [vmem:[#allocation5 + $0x8] sm:$0xff] }
 0x1d6   :  { %v425_v57 = vpop.f32.mrf.mxu0 }
 0x1d7   :  { %v496_v58 = vmax.f32 %v425_v57, 0.0 }
 0x1d8   :  { %v427_v59 = vpop.f32.mrf.mxu0 }
 0x1d9   :  { %4117 = vmatprep.mubr.msk.f32.mxu1 %vm516_vm2, %v496_v58 }
 0x1da   :  { %v430_v60 = vpop.f32.mrf.mxu0 }
 0x1db   :  { %v497_v61 = vmax.f32 %v430_v60, 0.0 }
 0x1dc   :  { %v432_v62 = vpop.f32.mrf.mxu0 }
 0x1dd   :  { %4118 = vmatmul.mubr.msk.f32.gmra.mxu1 %vm516_vm2, %v497_v61 }
 0x1de   :  { %v435_v63 = vpop.f32.mrf.mxu0 }
 0x1df   :  { %v498_v1 = vmax.f32 %v435_v63, 0.0 }
 0x1e0   :  { %v437_v2 = vpop.f32.mrf.mxu0 }
 0x1e1   :  { %4120 = vmatprep.mubr.msk.f32.mxu1 %vm516_vm2, %v498_v1 }
 0x1e2   :  { %v440_v3 = vpop.f32.mrf.mxu0 }
 0x1e3   :  { %v499_v4 = vmax.f32 %v440_v3, 0.0 }
 0x1e4   :  { %v442_v5 = vpop.f32.mrf.mxu0 }
 0x1e5   :  { %4121 = vmatmul.mubr.msk.f32.gmra.mxu1 %vm516_vm2, %v499_v4 }
 0x1e6   :  { %v445_v6 = vpop.f32.mrf.mxu0 }
 0x1e7   :  { %v500_v7 = vmax.f32 %v445_v6, 0.0 }
 0x1e8   :  { %v447_v8 = vpop.f32.mrf.mxu0 }
 0x1e9   :  { %4123 = vmatprep.mubr.msk.f32.mxu1 %vm516_vm2, %v500_v7 }
 0x1ea   :  { %v450_v9 = vpop.f32.mrf.mxu0 }
 0x1eb   :  { %v501_v10 = vmax.f32 %v450_v9, 0.0 }
 0x1ec   :  { %v452_v11 = vpop.f32.mrf.mxu0 }
 0x1ed   :  { %4124 = vmatmul.mubr.msk.f32.gmra.mxu1 %vm516_vm2, %v501_v10 }
 0x1ee   :  { %v455_v12 = vpop.f32.mrf.mxu0 }
 0x1ef   :  { %v502_v13 = vmax.f32 %v455_v12, 0.0 }
 0x1f0   :  { %v457_v14 = vpop.f32.mrf.mxu0 }
 0x1f1   :  { %4126 = vmatprep.mubr.msk.f32.mxu1 %vm516_vm2, %v502_v13 }
 0x1f2   :  { %v460_v15 = vpop.f32.mrf.mxu0 }
 0x1f3   :  { %v503_v16 = vmax.f32 %v460_v15, 0.0 }
 0x1f4   :  { %v462_v17 = vpop.f32.mrf.mxu0 }
 0x1f5   :  { %4127 = vmatmul.mubr.msk.f32.gmra.mxu1 %vm516_vm2, %v503_v16 }
 0x1f6   :  { %v465_v18 = vpop.f32.mrf.mxu0 }
 0x1f7   :  { %v504_v19 = vmax.f32 %v465_v18, 0.0 }
 0x1f8   :  { %v467_v20 = vpop.f32.mrf.mxu0 }
 0x1f9   :  { %4129 = vmatprep.mubr.msk.f32.mxu1 %vm516_vm2, %v504_v19 }
 0x1fa   :  { %v470_v21 = vpop.f32.mrf.mxu0 }
 0x1fb   :  { %v505_v22 = vmax.f32 %v470_v21, 0.0 }
 0x1fc   :  { %v472_v23 = vpop.f32.mrf.mxu0 }
 0x1fd   :  { %4130 = vmatmul.mubr.msk.f32.gmra.mxu1 %vm516_vm2, %v505_v22 }
 0x1fe   :  { %v475_v24 = vpop.f32.mrf.mxu0 }
 0x1ff   :  { %v506_v25 = vmax.f32 %v475_v24, 0.0 }
 0x200   :  { %v477_v27 = vpop.f32.mrf.mxu0 }
 0x201   :  { %4132 = vmatprep.mubr.msk.f32.mxu1 %vm516_vm2, %v506_v25 }
 0x202   :  { %v480_v28 = vpop.f32.mrf.mxu0 }
 0x203   :  { %v507_v29 = vmax.f32 %v480_v28, 0.0 }
 0x204   :  { %v482_v30 = vpop.f32.mrf.mxu0 }
 0x205   :  { %4133 = vmatmul.mubr.msk.f32.gmra.mxu1 %vm516_vm2, %v507_v29 }
 0x206   :  { %3685 = vmatprep.mubr.msk.f32.mxu1 %vm516_vm2, %v895_v55  ;;  %v909_v55 = vld [vmem:[#allocation5 + $0x78] sm:$0xff] }
 0x26d   :  { %v4848_v31 = vpop.f32.mrf.mxu1 }
 0x26f   :  { %v4850_v32 = vpop.f32.mrf.mxu1 }
 0x275   :  { %v4852_v33 = vpop.f32.mrf.mxu1 }
 0x277   :  { %v4854_v34 = vpop.f32.mrf.mxu1 }
 0x27d   :  { %v4856_v35 = vpop.f32.mrf.mxu1 }
 0x27f   :  { %v4858_v36 = vpop.f32.mrf.mxu1 }
 0x285   :  { %v4860_v37 = vpop.f32.mrf.mxu1 }
 0x287   :  { %v4862_v38 = vpop.f32.mrf.mxu1 }
 0x28d   :  { %v4864_v39 = vpop.f32.mrf.mxu1 }
 0x28f   :  { %v4866_v40 = vpop.f32.mrf.mxu1 }
 0x295   :  { %v4116_v41 = vpop.f32.mrf.mxu1 }
 0x297   :  { %v4868_v42 = vpop.f32.mrf.mxu1 }
 0x29d   :  { %v4119_v43 = vpop.f32.mrf.mxu1 }
 0x29f   :  { %v715_v44 = vpop.f32.mrf.mxu1 }
 0x2a5   :  { %v4122_v45 = vpop.f32.mrf.mxu1 }
 0x2a6   :  { %828 = vrot.lane.b32.xlu0 %v4122_v45, %s4472_s1 }
 0x2a7   :  { %v725_v46 = vpop.f32.mrf.mxu1 }
 0x2a8   :  { %826 = vrot.lane.b32.xlu1 %v725_v46, %s4472_s1 }
 0x2aa   :  { %824 = vrot.lane.b32.xlu0 %v4119_v43, %s4472_s1 }
 0x2ac   :  { %822 = vrot.lane.b32.xlu1 %v715_v44, %s4472_s1 }
 0x2ad   :  { %v4879_v47 = vpop.f32.mrf.mxu1 }
 0x2ae   :  { %820 = vrot.lane.b32.xlu0 %v4116_v41, %s4472_s1 }
 0x2af   :  { %v4885_v48 = vpop.f32.mrf.mxu1 }
 0x2b0   :  { %818 = vrot.lane.b32.xlu1 %v4868_v42, %s4472_s1 }
 0x2b2   :  { %816 = vrot.lane.b32.xlu0 %v4864_v39, %s4472_s1 }
 0x2b4   :  { %814 = vrot.lane.b32.xlu1 %v4866_v40, %s4472_s1 }
 0x2b5   :  { %v4889_v49 = vpop.f32.mrf.mxu1 }
 0x2b6   :  { %812 = vrot.lane.b32.xlu0 %v4860_v37, %s4472_s1 }
 0x2b7   :  { %v4895_v50 = vpop.f32.mrf.mxu1 }
 0x2b8   :  { %810 = vrot.lane.b32.xlu1 %v4862_v38, %s4472_s1 }
 0x2ba   :  { %808 = vrot.lane.b32.xlu0 %v4856_v35, %s4472_s1 }
 0x2bc   :  { %806 = vrot.lane.b32.xlu1 %v4858_v36, %s4472_s1 }
 0x2bd   :  { %v4899_v51 = vpop.f32.mrf.mxu1 }
 0x2be   :  { %804 = vrot.lane.b32.xlu0 %v4852_v33, %s4472_s1 }
 0x2bf   :  { %v4905_v52 = vpop.f32.mrf.mxu1 }
 0x2c0   :  { %802 = vrot.lane.b32.xlu1 %v4854_v34, %s4472_s1 }
 0x2c2   :  { %800 = vrot.lane.b32.xlu0 %v4848_v31, %s4472_s1 }
 0x2c4   :  { %798 = vrot.lane.b32.xlu1 %v4850_v32, %s4472_s1 }
 0x2c5   :  { %v4909_v53 = vpop.f32.mrf.mxu1 }
 0x2c6   :  { %844 = vrot.lane.b32.xlu0 %v4909_v53, %s4472_s1 }
 0x2c7   :  { %v4913_v54 = vpop.f32.mrf.mxu1 }
 0x2c8   :  { %842 = vrot.lane.b32.xlu1 %v4913_v54, %s4472_s1 }
 0x2ca   :  { %840 = vrot.lane.b32.xlu0 %v4899_v51, %s4472_s1 }
 0x2cc   :  { %838 = vrot.lane.b32.xlu1 %v4905_v52, %s4472_s1 }
 0x2ce   :  { %836 = vrot.lane.b32.xlu0 %v4889_v49, %s4472_s1 }
 0x2d0   :  { %834 = vrot.lane.b32.xlu1 %v4895_v50, %s4472_s1 }
 0x2d2   :  { %832 = vrot.lane.b32.xlu0 %v4879_v47, %s4472_s1 }
 0x2d4   :  { %830 = vrot.lane.b32.xlu1 %v4885_v48, %s4472_s1 }
 0x318   :  { %v829_v56 = vpop.permute.xlu0 %828 }
 0x319   :  { %v885_v57 = vmax.f32 %v4122_v45, %v829_v56  ;;  %v899_v45 = vld [vmem:[#allocation5 + $0x28] sm:$0xff]  ;;  %v908_v56 = vld [vmem:[#allocation5 + $0x70] sm:$0xff] }
 0x31a   :  { %v827_v58 = vpop.permute.xlu1 %826 }
 0x31b   :  { %v884_v59 = vmax.f32 %v725_v46, %v827_v58  ;;  %1015 = vmatpush1.msra.mxu1 %v885_v57  ;;  %v898_v46 = vld [vmem:[#allocation5 + $0x20] sm:$0xff]  ;;  %v911_v57 = vld [vmem:[#allocation5 + $0x88] sm:$0xff] }
 0x31c   :  { %1016 = vmatprep.subr.mxu1 %v6263_v0  ;;  %v825_v60 = vpop.permute.xlu0 %824  ;;  %v910_v58 = vld [vmem:[#allocation5 + $0x80] sm:$0xff] }
 0x31d   :  { %v883_v61 = vmax.f32 %v4119_v43, %v825_v60  ;;  %1017 = vmatpush1.msra.mxu1 %v884_v59  ;;  %v897_v43 = vld [vmem:[#allocation5 + $0x18] sm:$0xff]  ;;  %v912_v60 = vld [vmem:[#allocation5 + $0x90] sm:$0xff] }
 0x31e   :  { %1018 = vmatprep.subr.mxu1 %v6263_v0  ;;  %v823_v62 = vpop.permute.xlu1 %822  ;;  %v913_v59 = vld [vmem:[#allocation5 + $0x98] sm:$0xff] }
 0x31f   :  { %v882_v63 = vmax.f32 %v715_v44, %v823_v62  ;;  %1019 = vmatpush1.msra.mxu1 %v883_v61  ;;  %v896_v44 = vld [vmem:[#allocation5 + $0x10] sm:$0xff]  ;;  %v915_v61 = vld [vmem:[#allocation5 + $0xa8] sm:$0xff]  ;;  %v914_v62 = vld [vmem:[#allocation5 + $0xa0] sm:$0xff] }
 0x320   :  { %v821_v1 = vpop.permute.xlu0 %820  ;;  %1020 = vmatprep.subr.mxu1 %v6263_v0 }
 0x321   :  { %v881_v2 = vmax.f32 %v4116_v41, %v821_v1  ;;  %1021 = vmatpush1.msra.mxu1 %v882_v63  ;;  %v917_v63 = vld [vmem:[#allocation5 + $0xb8] sm:$0xff]  ;;  %v916_v1 = vld [vmem:[#allocation5 + $0xb0] sm:$0xff] }
 0x322   :  { %1022 = vmatprep.subr.mxu1 %v6263_v0  ;;  %v819_v3 = vpop.permute.xlu1 %818 }
 0x323   :  { %v880_v4 = vmax.f32 %v4868_v42, %v819_v3  ;;  %1023 = vmatpush1.msra.mxu1 %v881_v2  ;;  %v894_v42 = vld [vmem:[#allocation5] sm:$0xff]  ;;  %v919_v2 = vld [vmem:[#allocation5 + $0xc8] sm:$0xff] }
 0x324   :  { %v817_v5 = vpop.permute.xlu0 %816  ;;  %1024 = vmatprep.subr.mxu1 %v6263_v0  ;;  %v918_v3 = vld [vmem:[#allocation5 + $0xc0] sm:$0xff] }
 0x325   :  { %v879_v6 = vmax.f32 %v4864_v39, %v817_v5  ;;  %1025 = vmatpush1.msra.mxu1 %v880_v4  ;;  %v921_v4 = vld [vmem:[#allocation5 + $0xd8] sm:$0xff]  ;;  %v920_v5 = vld [vmem:[#allocation5 + $0xd0] sm:$0xff] }
 0x326   :  { %1026 = vmatprep.subr.mxu1 %v6263_v0  ;;  %v815_v7 = vpop.permute.xlu1 %814 }
 0x327   :  { %v878_v8 = vmax.f32 %v4866_v40, %v815_v7  ;;  %1027 = vmatpush1.msra.mxu1 %v879_v6  ;;  %v923_v6 = vld [vmem:[#allocation5 + $0xe8] sm:$0xff]  ;;  %v922_v7 = vld [vmem:[#allocation5 + $0xe0] sm:$0xff] }
 0x328   :  { %v813_v9 = vpop.permute.xlu0 %812  ;;  %1028 = vmatprep.subr.mxu1 %v6263_v0 }
 0x329   :  { %v877_v10 = vmax.f32 %v4860_v37, %v813_v9  ;;  %1029 = vmatpush1.msra.mxu1 %v878_v8  ;;  %v925_v8 = vld [vmem:[#allocation5 + $0xf8] sm:$0xff]  ;;  %v924_v9 = vld [vmem:[#allocation5 + $0xf0] sm:$0xff] }
 0x32a   :  { %1030 = vmatprep.subr.mxu1 %v6263_v0  ;;  %v811_v11 = vpop.permute.xlu1 %810 }
 0x32b   :  { %v876_v12 = vmax.f32 %v4862_v38, %v811_v11  ;;  %1031 = vmatpush1.msra.mxu1 %v877_v10  ;;  %v927_v10 = vld [vmem:[#allocation5 + $0x108] sm:$0xff]  ;;  %v926_v11 = vld [vmem:[#allocation5 + $0x100] sm:$0xff] }
 0x32c   :  { %v809_v13 = vpop.permute.xlu0 %808  ;;  %1032 = vmatprep.subr.mxu1 %v6263_v0 }
 0x32d   :  { %v875_v14 = vmax.f32 %v4856_v35, %v809_v13  ;;  %1033 = vmatpush1.msra.mxu1 %v876_v12  ;;  %v929_v12 = vld [vmem:[#allocation5 + $0x118] sm:$0xff]  ;;  %v928_v13 = vld [vmem:[#allocation5 + $0x110] sm:$0xff] }
 0x32e   :  { %1034 = vmatprep.subr.mxu1 %v6263_v0  ;;  %v807_v15 = vpop.permute.xlu1 %806 }
 0x32f   :  { %v874_v16 = vmax.f32 %v4858_v36, %v807_v15  ;;  %1035 = vmatpush1.msra.mxu1 %v875_v14  ;;  %v931_v14 = vld [vmem:[#allocation5 + $0x128] sm:$0xff]  ;;  %v930_v15 = vld [vmem:[#allocation5 + $0x120] sm:$0xff] }
 0x330   :  { %v805_v17 = vpop.permute.xlu0 %804  ;;  %1036 = vmatprep.subr.mxu1 %v6263_v0 }
 0x331   :  { %v873_v18 = vmax.f32 %v4852_v33, %v805_v17  ;;  %1037 = vmatpush1.msra.mxu1 %v874_v16  ;;  %v933_v16 = vld [vmem:[#allocation5 + $0x138] sm:$0xff]  ;;  %v932_v17 = vld [vmem:[#allocation5 + $0x130] sm:$0xff] }
 0x332   :  { %1038 = vmatprep.subr.mxu1 %v6263_v0  ;;  %v803_v19 = vpop.permute.xlu1 %802 }
 0x333   :  { %v872_v20 = vmax.f32 %v4854_v34, %v803_v19  ;;  %1039 = vmatpush1.msra.mxu1 %v873_v18  ;;  %v935_v18 = vld [vmem:[#allocation5 + $0x148] sm:$0xff]  ;;  %v934_v19 = vld [vmem:[#allocation5 + $0x140] sm:$0xff] }
 0x334   :  { %v801_v21 = vpop.permute.xlu0 %800  ;;  %1040 = vmatprep.subr.mxu1 %v6263_v0 }
 0x335   :  { %v871_v22 = vmax.f32 %v4848_v31, %v801_v21  ;;  %1041 = vmatpush1.msra.mxu1 %v872_v20  ;;  %v937_v20 = vld [vmem:[#allocation5 + $0x158] sm:$0xff]  ;;  %v936_v21 = vld [vmem:[#allocation5 + $0x150] sm:$0xff] }
 0x336   :  { %1042 = vmatprep.subr.mxu1 %v6263_v0  ;;  %v799_v23 = vpop.permute.xlu1 %798 }
 0x337   :  { %v870_v24 = vmax.f32 %v4850_v32, %v799_v23  ;;  %1043 = vmatpush1.msra.mxu1 %v871_v22  ;;  %v939_v22 = vld [vmem:[#allocation5 + $0x168] sm:$0xff]  ;;  %v938_v23 = vld [vmem:[#allocation5 + $0x160] sm:$0xff] }
 0x338   :  { %1044 = vmatprep.subr.mxu1 %v6263_v0  ;;  %v845_v25 = vpop.permute.xlu0 %844 }
 0x339   :  { %v893_v27 = vmax.f32 %v4909_v53, %v845_v25  ;;  %1045 = vmatpush1.msra.mxu1 %v870_v24  ;;  %v907_v53 = vld [vmem:[#allocation5 + $0x68] sm:$0xff]  ;;  %v941_v24 = vld [vmem:[#allocation5 + $0x178] sm:$0xff]  ;;  %v940_v25 = vld [vmem:[#allocation5 + $0x170] sm:$0xff] }
 0x33a   :  { %1062 = vmatprep.subr.mxu1 %v6263_v0  ;;  %v843_v28 = vpop.permute.xlu1 %842 }
 0x33b   :  { %v892_v29 = vmax.f32 %v4913_v54, %v843_v28  ;;  %1063 = vmatpush2.msra.mxu1 %v893_v27  ;;  %v906_v54 = vld [vmem:[#allocation5 + $0x60] sm:$0xff] }
 0x33c   :  { %1064 = vmatprep.subr.mxu1 %v6263_v0  ;;  %v841_v30 = vpop.permute.xlu0 %840 }
 0x33d   :  { %v891_v31 = vmax.f32 %v4899_v51, %v841_v30  ;;  %1065 = vmatpush2.msra.mxu1 %v892_v29  ;;  %v905_v51 = vld [vmem:[#allocation5 + $0x58] sm:$0xff] }
 0x33e   :  { %1066 = vmatprep.subr.mxu1 %v6263_v0  ;;  %v839_v32 = vpop.permute.xlu1 %838 }
 0x33f   :  { %v890_v33 = vmax.f32 %v4905_v52, %v839_v32  ;;  %1067 = vmatpush2.msra.mxu1 %v891_v31  ;;  %v904_v52 = vld [vmem:[#allocation5 + $0x50] sm:$0xff] }
 0x340   :  { %v837_v34 = vpop.permute.xlu0 %836  ;;  %1068 = vmatprep.subr.mxu1 %v6263_v0 }
 0x341   :  { %v889_v35 = vmax.f32 %v4889_v49, %v837_v34  ;;  %1069 = vmatpush2.msra.mxu1 %v890_v33  ;;  %v903_v49 = vld [vmem:[#allocation5 + $0x48] sm:$0xff] }
 0x342   :  { %1070 = vmatprep.subr.mxu1 %v6263_v0  ;;  %v835_v36 = vpop.permute.xlu1 %834 }
 0x343   :  { %v888_v37 = vmax.f32 %v4895_v50, %v835_v36  ;;  %1071 = vmatpush2.msra.mxu1 %v889_v35  ;;  %v902_v50 = vld [vmem:[#allocation5 + $0x40] sm:$0xff] }
 0x344   :  { %v833_v38 = vpop.permute.xlu0 %832  ;;  %1072 = vmatprep.subr.mxu1 %v6263_v0 }
 0x345   :  { %v887_v39 = vmax.f32 %v4879_v47, %v833_v38  ;;  %1073 = vmatpush2.msra.mxu1 %v888_v37  ;;  %v901_v47 = vld [vmem:[#allocation5 + $0x38] sm:$0xff] }
 0x346   :  { %1074 = vmatprep.subr.mxu1 %v6263_v0  ;;  %v831_v40 = vpop.permute.xlu1 %830 }
 0x347   :  { %v886_v41 = vmax.f32 %v4885_v48, %v831_v40  ;;  %1075 = vmatpush2.msra.mxu1 %v887_v39  ;;  %v900_v48 = vld [vmem:[#allocation5 + $0x30] sm:$0xff] }
 0x348   :  { %1076 = vmatprep.subr.mxu1 %v6263_v0 }
 0x349   :  { %1077 = vmatpush2.msra.mxu1 %v886_v41 }
 0x34a   :  { %1079 = vmatmul.mubr.f32.vlgmr.msra.gmra.mxu1 %v894_v42  ;;  %1721 = vmatprep.subr.mxu1 %v6263_v0 }
 0x34b   :  { %3686 = vmatprep.mubr.msk.f32.mxu1 %vm516_vm2, %v897_v43 }
 0x34e   :  { %1084 = vmatmul.mubr.f32.gmra.mxu1 %v896_v44 }
 0x34f   :  { %3687 = vmatprep.mubr.msk.f32.mxu1 %vm516_vm2, %v899_v45 }
 0x352   :  { %1089 = vmatmul.mubr.f32.gmra.mxu1 %v898_v46 }
 0x353   :  { %3688 = vmatprep.mubr.msk.f32.mxu1 %vm516_vm2, %v901_v47 }
 0x356   :  { %1094 = vmatmul.mubr.f32.gmra.mxu1 %v900_v48 }
 0x357   :  { %3689 = vmatprep.mubr.msk.f32.mxu1 %vm516_vm2, %v903_v49 }
 0x35a   :  { %1099 = vmatmul.mubr.f32.gmra.mxu1 %v902_v50 }
 0x35b   :  { %3690 = vmatprep.mubr.msk.f32.mxu1 %vm516_vm2, %v905_v51 }
 0x35e   :  { %1104 = vmatmul.mubr.f32.gmra.mxu1 %v904_v52 }
 0x35f   :  { %3691 = vmatprep.mubr.msk.f32.mxu1 %vm516_vm2, %v907_v53 }
 0x362   :  { %1109 = vmatmul.mubr.f32.gmra.mxu1 %v906_v54 }
 0x363   :  { %3692 = vmatprep.mubr.msk.f32.mxu1 %vm516_vm2, %v909_v55 }
 0x366   :  { %1114 = vmatmul.mubr.f32.gmra.mxu1 %v908_v56 }
 0x367   :  { %3693 = vmatprep.mubr.msk.f32.mxu1 %vm516_vm2, %v911_v57 }
 0x36a   :  { %1119 = vmatmul.mubr.f32.gmra.mxu1 %v910_v58 }
 0x36b   :  { %3694 = vmatprep.mubr.msk.f32.mxu1 %vm516_vm2, %v913_v59 }
 0x36e   :  { %1124 = vmatmul.mubr.f32.gmra.mxu1 %v912_v60 }
 0x36f   :  { %3695 = vmatprep.mubr.msk.f32.mxu1 %vm516_vm2, %v915_v61 }
 0x372   :  { %1129 = vmatmul.mubr.f32.gmra.mxu1 %v914_v62 }
 0x373   :  { %3696 = vmatprep.mubr.msk.f32.mxu1 %vm516_vm2, %v917_v63 }
 0x376   :  { %1134 = vmatmul.mubr.f32.gmra.mxu1 %v916_v1 }
 0x377   :  { %3697 = vmatprep.mubr.msk.f32.mxu1 %vm516_vm2, %v919_v2 }
 0x37a   :  { %1139 = vmatmul.mubr.f32.gmra.mxu1 %v918_v3 }
 0x37b   :  { %3698 = vmatprep.mubr.msk.f32.mxu1 %vm516_vm2, %v921_v4 }
 0x37e   :  { %1144 = vmatmul.mubr.f32.gmra.mxu1 %v920_v5 }
 0x37f   :  { %3699 = vmatprep.mubr.msk.f32.mxu1 %vm516_vm2, %v923_v6 }
 0x382   :  { %1149 = vmatmul.mubr.f32.gmra.mxu1 %v922_v7 }
 0x383   :  { %3700 = vmatprep.mubr.msk.f32.mxu1 %vm516_vm2, %v925_v8 }
 0x386   :  { %1154 = vmatmul.mubr.f32.gmra.mxu1 %v924_v9 }
 0x387   :  { %3701 = vmatprep.mubr.msk.f32.mxu1 %vm516_vm2, %v927_v10 }
 0x38a   :  { %1159 = vmatmul.mubr.f32.gmra.mxu1 %v926_v11 }
 0x38b   :  { %3702 = vmatprep.mubr.msk.f32.mxu1 %vm516_vm2, %v929_v12 }
 0x38e   :  { %1164 = vmatmul.mubr.f32.gmra.mxu1 %v928_v13 }
 0x38f   :  { %3703 = vmatprep.mubr.msk.f32.mxu1 %vm516_vm2, %v931_v14 }
 0x392   :  { %1169 = vmatmul.mubr.f32.gmra.mxu1 %v930_v15 }
 0x393   :  { %3704 = vmatprep.mubr.msk.f32.mxu1 %vm516_vm2, %v933_v16 }
 0x396   :  { %1174 = vmatmul.mubr.f32.gmra.mxu1 %v932_v17 }
 0x397   :  { %3705 = vmatprep.mubr.msk.f32.mxu1 %vm516_vm2, %v935_v18 }
 0x39a   :  { %1179 = vmatmul.mubr.f32.gmra.mxu1 %v934_v19 }
 0x39b   :  { %3706 = vmatprep.mubr.msk.f32.mxu1 %vm516_vm2, %v937_v20 }
 0x39e   :  { %1184 = vmatmul.mubr.f32.gmra.mxu1 %v936_v21 }
 0x39f   :  { %3707 = vmatprep.mubr.msk.f32.mxu1 %vm516_vm2, %v939_v22 }
 0x3a2   :  { %1189 = vmatmul.mubr.f32.gmra.mxu1 %v938_v23 }
 0x3a3   :  { %3708 = vmatprep.mubr.msk.f32.mxu1 %vm516_vm2, %v941_v24  ;;  %v1368_v24 = vld [vmem:[%s6256_s4 + $0x8] sm:$0xff] }
 0x3a4   :  { %1600 = vmatprep.mubr.f32.mxu0 %v1368_v24  ;;  %v1379_v24 = vld [vmem:[%s6256_s4 + $0x60] sm:$0xff] }
 0x3a6   :  { %1194 = vmatmul.mubr.f32.gmra.mxu1 %v940_v25  ;;  %v1370_v25 = vld [vmem:[%s6256_s4 + $0x18] sm:$0xff] }
 0x3a7   :  { %3710 = vmatprep.mubr.msk.f32.mxu1 %vm1463_vm3, %v1370_v25  ;;  %v1381_v25 = vld [vmem:[%s6256_s4 + $0x70] sm:$0xff] }
 0x40a   :  { %v1080_v27 = vpop.f32.mrf.mxu1 }
 0x40c   :  { %v1082_v28 = vpop.f32.mrf.mxu1 }
 0x40e   :  { %v1085_v29 = vpop.f32.mrf.mxu1 }
 0x410   :  { %v1087_v30 = vpop.f32.mrf.mxu1 }
 0x412   :  { %v1090_v31 = vpop.f32.mrf.mxu1 }
 0x414   :  { %v1092_v32 = vpop.f32.mrf.mxu1 }
 0x416   :  { %v1095_v33 = vpop.f32.mrf.mxu1 }
 0x418   :  { %v1097_v34 = vpop.f32.mrf.mxu1 }
 0x41a   :  { %v1100_v35 = vpop.f32.mrf.mxu1 }
 0x41c   :  { %v1102_v36 = vpop.f32.mrf.mxu1 }
 0x41e   :  { %v1105_v37 = vpop.f32.mrf.mxu1 }
 0x420   :  { %v1107_v38 = vpop.f32.mrf.mxu1 }
 0x422   :  { %v1110_v39 = vpop.f32.mrf.mxu1 }
 0x424   :  { %v1112_v40 = vpop.f32.mrf.mxu1 }
 0x426   :  { %v1115_v41 = vpop.f32.mrf.mxu1 }
 0x428   :  { %v1117_v42 = vpop.f32.mrf.mxu1 }
 0x42a   :  { %v1120_v43 = vpop.f32.mrf.mxu1 }
 0x42c   :  { %v1122_v44 = vpop.f32.mrf.mxu1 }
 0x42e   :  { %v1125_v45 = vpop.f32.mrf.mxu1 }
 0x430   :  { %v1127_v46 = vpop.f32.mrf.mxu1 }
 0x432   :  { %v1130_v47 = vpop.f32.mrf.mxu1 }
 0x434   :  { %v1132_v48 = vpop.f32.mrf.mxu1 }
 0x436   :  { %v1135_v49 = vpop.f32.mrf.mxu1 }
 0x438   :  { %v1137_v50 = vpop.f32.mrf.mxu1 }
 0x43a   :  { %v1140_v51 = vpop.f32.mrf.mxu1 }
 0x43b   :  { %v4996_v52 = vmax.f32 %v1080_v27, %v1140_v51 }
 0x43c   :  { %v1142_v53 = vpop.f32.mrf.mxu1 }
 0x43d   :  { %1223 = vrot.lane.b32.xlu1 %v4996_v52, %s4469_s8 }
 0x43e   :  { %v1145_v54 = vpop.f32.mrf.mxu1 }
 0x43f   :  { %v5000_v55 = vmax.f32 %v1085_v29, %v1145_v54 }
 0x440   :  { %v1147_v56 = vpop.f32.mrf.mxu1 }
 0x441   :  { %1295 = vrot.lane.b32.xlu1 %v4996_v52, %s4467_s5  ;;  %1225 = vrot.lane.b32.xlu0 %v5000_v55, %s4469_s8 }
 0x442   :  { %v1150_v57 = vpop.f32.mrf.mxu1 }
 0x443   :  { %v5006_v58 = vmax.f32 %v1090_v31, %v1150_v57 }
 0x444   :  { %v1152_v59 = vpop.f32.mrf.mxu1 }
 0x445   :  { %1297 = vrot.lane.b32.xlu0 %v5000_v55, %s4467_s5  ;;  %1227 = vrot.lane.b32.xlu1 %v5006_v58, %s4469_s8 }
 0x446   :  { %v1155_v60 = vpop.f32.mrf.mxu1 }
 0x447   :  { %v5012_v61 = vmax.f32 %v1095_v33, %v1155_v60 }
 0x448   :  { %v1157_v62 = vpop.f32.mrf.mxu1 }
 0x449   :  { %1299 = vrot.lane.b32.xlu1 %v5006_v58, %s4467_s5  ;;  %1229 = vrot.lane.b32.xlu0 %v5012_v61, %s4469_s8 }
 0x44a   :  { %v1160_v63 = vpop.f32.mrf.mxu1 }
 0x44b   :  { %v5018_v1 = vmax.f32 %v1100_v35, %v1160_v63 }
 0x44c   :  { %v1162_v2 = vpop.f32.mrf.mxu1 }
 0x44d   :  { %1301 = vrot.lane.b32.xlu0 %v5012_v61, %s4467_s5  ;;  %1303 = vrot.lane.b32.xlu1 %v5018_v1, %s4467_s5 }
 0x44e   :  { %v1165_v3 = vpop.f32.mrf.mxu1 }
 0x44f   :  { %v5024_v4 = vmax.f32 %v1105_v37, %v1165_v3 }
 0x450   :  { %v1167_v5 = vpop.f32.mrf.mxu1 }
 0x451   :  { %1305 = vrot.lane.b32.xlu0 %v5024_v4, %s4467_s5 }
 0x452   :  { %v1170_v6 = vpop.f32.mrf.mxu1 }
 0x453   :  { %v5028_v7 = vmax.f32 %v1110_v39, %v1170_v6 }
 0x454   :  { %v1172_v8 = vpop.f32.mrf.mxu1 }
 0x455   :  { %1307 = vrot.lane.b32.xlu1 %v5028_v7, %s4467_s5 }
 0x456   :  { %v1175_v9 = vpop.f32.mrf.mxu1 }
 0x457   :  { %v5032_v10 = vmax.f32 %v1115_v41, %v1175_v9 }
 0x458   :  { %v1177_v11 = vpop.f32.mrf.mxu1 }
 0x459   :  { %1271 = vrot.lane.b32.xlu1 %v5028_v7, %s4468_s19  ;;  %1309 = vrot.lane.b32.xlu0 %v5032_v10, %s4467_s5  ;;  %v1369_v11 = vld [vmem:[%s6256_s4 + $0x10] sm:$0xff] }
 0x45a   :  { %v1180_v12 = vpop.f32.mrf.mxu1 }
 0x45b   :  { %v5040_v15 = vmax.f32 %v1120_v43, %v1180_v12 }
 0x45c   :  { %v1182_v13 = vpop.f32.mrf.mxu1 }
 0x45d   :  { %1273 = vrot.lane.b32.xlu1 %v5032_v10, %s4468_s19 }
 0x45e   :  { %v1185_v14 = vpop.f32.mrf.mxu1 }
 0x45f   :  { %v5042_v16 = vmax.f32 %v1125_v45, %v1185_v14  ;;  %v1372_v14 = vld [vmem:[%s6256_s4 + $0x28] sm:$0xff] }
 0x460   :  { %v1187_v17 = vpop.f32.mrf.mxu1 }
 0x461   :  { %1311 = vrot.lane.b32.xlu1 %v5040_v15, %s4467_s5  ;;  %1313 = vrot.lane.b32.xlu0 %v5042_v16, %s4467_s5  ;;  %v1373_v17 = vld [vmem:[%s6256_s4 + $0x30] sm:$0xff] }
 0x462   :  { %v1190_v18 = vpop.f32.mrf.mxu1 }
 0x463   :  { %v1209_v19 = vmax.f32 %v1130_v47, %v1190_v18  ;;  %v1376_v18 = vld [vmem:[%s6256_s4 + $0x48] sm:$0xff] }
 0x464   :  { %v1192_v20 = vpop.f32.mrf.mxu1 }
 0x465   :  { %1277 = vrot.lane.b32.xlu0 %v5042_v16, %s4468_s19  ;;  %1315 = vrot.lane.b32.xlu1 %v1209_v19, %s4467_s5  ;;  %v1375_v20 = vld [vmem:[%s6256_s4 + $0x40] sm:$0xff] }
 0x466   :  { %v1195_v21 = vpop.f32.mrf.mxu1 }
 0x467   :  { %v1210_v23 = vmax.f32 %v1135_v49, %v1195_v21  ;;  %v1377_v21 = vld [vmem:[%s6256_s4 + $0x50] sm:$0xff] }
 0x468   :  { %v1197_v22 = vpop.f32.mrf.mxu1 }
 0x469   :  { %1279 = vrot.lane.b32.xlu0 %v1209_v19, %s4468_s19  ;;  %1269 = vrot.lane.b32.xlu1 %v5024_v4, %s4468_s19  ;;  %v1380_v22 = vld [vmem:[%s6256_s4 + $0x68] sm:$0xff] }
 0x46d   :  { %1267 = vrot.lane.b32.xlu1 %v5018_v1, %s4468_s19  ;;  %1317 = vrot.lane.b32.xlu0 %v1210_v23, %s4467_s5 }
 0x471   :  { %1351 = vrot.lane.b32.xlu1 %v1209_v19, %s4470_s20  ;;  %1275 = vrot.lane.b32.xlu0 %v5040_v15, %s4468_s19 }
 0x475   :  { %1349 = vrot.lane.b32.xlu1 %v5042_v16, %s4470_s20  ;;  %1265 = vrot.lane.b32.xlu0 %v5012_v61, %s4468_s19 }
 0x479   :  { %1347 = vrot.lane.b32.xlu1 %v5040_v15, %s4470_s20  ;;  %1263 = vrot.lane.b32.xlu0 %v5006_v58, %s4468_s19 }
 0x47d   :  { %1345 = vrot.lane.b32.xlu1 %v5032_v10, %s4470_s20  ;;  %1261 = vrot.lane.b32.xlu0 %v5000_v55, %s4468_s19 }
 0x481   :  { %1343 = vrot.lane.b32.xlu1 %v5028_v7, %s4470_s20  ;;  %1259 = vrot.lane.b32.xlu0 %v4996_v52, %s4468_s19 }
 0x485   :  { %1353 = vrot.lane.b32.xlu1 %v1210_v23, %s4470_s20  ;;  %1281 = vrot.lane.b32.xlu0 %v1210_v23, %s4468_s19 }
 0x489   :  { %1341 = vrot.lane.b32.xlu1 %v5024_v4, %s4470_s20  ;;  %1243 = vrot.lane.b32.xlu0 %v1209_v19, %s4469_s8 }
 0x48d   :  { %1339 = vrot.lane.b32.xlu1 %v5018_v1, %s4470_s20  ;;  %1241 = vrot.lane.b32.xlu0 %v5042_v16, %s4469_s8 }
 0x491   :  { %1337 = vrot.lane.b32.xlu1 %v5012_v61, %s4470_s20  ;;  %1239 = vrot.lane.b32.xlu0 %v5040_v15, %s4469_s8 }
 0x495   :  { %1335 = vrot.lane.b32.xlu1 %v5006_v58, %s4470_s20  ;;  %1245 = vrot.lane.b32.xlu0 %v1210_v23, %s4469_s8 }
 0x499   :  { %1333 = vrot.lane.b32.xlu1 %v5000_v55, %s4470_s20  ;;  %1237 = vrot.lane.b32.xlu0 %v5032_v10, %s4469_s8 }
 0x49d   :  { %1331 = vrot.lane.b32.xlu1 %v4996_v52, %s4470_s20  ;;  %1235 = vrot.lane.b32.xlu0 %v5028_v7, %s4469_s8 }
 0x4a1   :  { %1233 = vrot.lane.b32.xlu0 %v5024_v4, %s4469_s8 }
 0x4a5   :  { %1231 = vrot.lane.b32.xlu0 %v5018_v1, %s4469_s8 }
 0x4af   :  { %v1224_v27 = vpop.permute.xlu1 %1223 }
 0x4b3   :  { %v5111_v28 = vpop.permute.xlu1 %1295  ;;  %v1226_v29 = vpop.permute.xlu0 %1225 }
 0x4b7   :  { %v5113_v30 = vpop.permute.xlu0 %1297  ;;  %v1228_v31 = vpop.permute.xlu1 %1227 }
 0x4bb   :  { %v1230_v32 = vpop.permute.xlu0 %1229  ;;  %v5115_v33 = vpop.permute.xlu1 %1299 }
 0x4bc   :  { %1537 = vmatpush1.msra.mxu0 %v1230_v32  ;;  %v1390_v32 = vld [vmem:[%s6256_s4 + $0xb8] sm:$0xff] }
 0x4bd   :  { %1538 = vmatprep.subr.mxu0 %v6263_v0 }
 0x4be   :  { %1539 = vmatpush1.msra.mxu0 %v1228_v31  ;;  %v1388_v31 = vld [vmem:[%s6256_s4 + $0xa8] sm:$0xff] }
 0x4bf   :  { %1540 = vmatprep.subr.mxu0 %v6263_v0  ;;  %v5120_v34 = vpop.permute.xlu1 %1303  ;;  %v5123_v35 = vpop.permute.xlu0 %1301 }
 0x4c0   :  { %1541 = vmatpush1.msra.mxu0 %v1226_v29  ;;  %v1383_v29 = vld [vmem:[%s6256_s4 + $0x80] sm:$0xff] }
 0x4c1   :  { %1542 = vmatprep.subr.mxu0 %v6263_v0 }
 0x4c2   :  { %1543 = vmatpush1.msra.mxu0 %v1224_v27  ;;  %v1384_v27 = vld [vmem:[%s6256_s4 + $0x88] sm:$0xff] }
 0x4c3   :  { %1544 = vmatprep.subr.mxu0 %v6263_v0  ;;  %v1306_v37 = vpop.permute.xlu0 %1305 }
 0x4c4   :  { %1545 = vmatpush1.msra.mxu0 %v1210_v23  ;;  %v1382_v23 = vld [vmem:[%s6256_s4 + $0x78] sm:$0xff] }
 0x4c5   :  { %1546 = vmatprep.subr.mxu0 %v6263_v0 }
 0x4c6   :  { %1547 = vmatpush1.msra.mxu0 %v1209_v19  ;;  %v1378_v19 = vld [vmem:[%s6256_s4 + $0x58] sm:$0xff] }
 0x4c7   :  { %v1308_v36 = vpop.permute.xlu1 %1307  ;;  %1548 = vmatprep.subr.mxu0 %v6263_v0 }
 0x4c8   :  { %1549 = vmatpush1.msra.mxu0 %v5042_v16  ;;  %v1371_v16 = vld [vmem:[%s6256_s4 + $0x20] sm:$0xff] }
 0x4c9   :  { %1550 = vmatprep.subr.mxu0 %v6263_v0 }
 0x4ca   :  { %1551 = vmatpush1.msra.mxu0 %v5040_v15  ;;  %v1374_v15 = vld [vmem:[%s6256_s4 + $0x38] sm:$0xff] }
 0x4cb   :  { %v1272_v38 = vpop.permute.xlu1 %1271  ;;  %1552 = vmatprep.subr.mxu0 %v6263_v0  ;;  %v1310_v39 = vpop.permute.xlu0 %1309 }
 0x4cc   :  { %1553 = vmatpush1.msra.mxu0 %v5032_v10  ;;  %v1367_v10 = vld [vmem:[%s6256_s4] sm:$0xff] }
 0x4cd   :  { %1554 = vmatprep.subr.mxu0 %v6263_v0 }
 0x4ce   :  { %1555 = vmatpush1.msra.mxu0 %v5028_v7 }
 0x4cf   :  { %v1274_v40 = vpop.permute.xlu1 %1273  ;;  %1556 = vmatprep.subr.mxu0 %v6263_v0 }
 0x4d0   :  { %1557 = vmatpush1.msra.mxu0 %v5024_v4 }
 0x4d1   :  { %1558 = vmatprep.subr.mxu0 %v6263_v0 }
 0x4d2   :  { %1559 = vmatpush1.msra.mxu0 %v5018_v1 }
 0x4d3   :  { %v1312_v41 = vpop.permute.xlu1 %1311  ;;  %v1314_v42 = vpop.permute.xlu0 %1313  ;;  %1560 = vmatprep.subr.mxu0 %v6263_v0 }
 0x4d4   :  { %1561 = vmatpush1.msra.mxu0 %v5012_v61 }
 0x4d5   :  { %1562 = vmatprep.subr.mxu0 %v6263_v0 }
 0x4d6   :  { %1563 = vmatpush1.msra.mxu0 %v5006_v58 }
 0x4d7   :  { %v5142_v43 = vpop.permute.xlu0 %1277  ;;  %v1316_v44 = vpop.permute.xlu1 %1315  ;;  %1564 = vmatprep.subr.mxu0 %v6263_v0 }
 0x4d8   :  { %1565 = vmatpush1.msra.mxu0 %v5000_v55 }
 0x4d9   :  { %1566 = vmatprep.subr.mxu0 %v6263_v0 }
 0x4da   :  { %1567 = vmatpush1.msra.mxu0 %v4996_v52 }
 0x4db   :  { %v1280_v45 = vpop.permute.xlu0 %1279  ;;  %v1270_v46 = vpop.permute.xlu1 %1269  ;;  %1568 = vmatprep.subr.mxu0 %v6263_v0 }
 0x4dc   :  { %1569 = vmatpush2.msra.mxu0 %v1274_v40  ;;  %v1398_v40 = vld [vmem:[%s6256_s4 + $0xf8] sm:$0xff] }
 0x4dd   :  { %1570 = vmatprep.subr.mxu0 %v6263_v0 }
 0x4de   :  { %1571 = vmatpush2.msra.mxu0 %v1272_v38  ;;  %v1393_v38 = vld [vmem:[%s6256_s4 + $0xd0] sm:$0xff] }
 0x4df   :  { %v1268_v47 = vpop.permute.xlu1 %1267  ;;  %v1318_v48 = vpop.permute.xlu0 %1317  ;;  %1572 = vmatprep.subr.mxu0 %v6263_v0 }
 0x4e0   :  { %1573 = vmatpush2.msra.mxu0 %v1270_v46  ;;  %1722 = vmatpush1.msra.mxu1 %v1318_v48  ;;  %v1401_v46 = vld [vmem:[%s6256_s4 + $0x110] sm:$0xff]  ;;  %v1406_v48 = vld [vmem:[%s6256_s4 + $0x138] sm:$0xff] }
 0x4e1   :  { %1574 = vmatprep.subr.mxu0 %v6263_v0  ;;  %1723 = vmatprep.subr.mxu1 %v6263_v0 }
 0x4e2   :  { %1575 = vmatpush2.msra.mxu0 %v1268_v47  ;;  %1724 = vmatpush1.msra.mxu1 %v1316_v44  ;;  %v1402_v44 = vld [vmem:[%s6256_s4 + $0x118] sm:$0xff]  ;;  %v1404_v47 = vld [vmem:[%s6256_s4 + $0x128] sm:$0xff] }
 0x4e3   :  { %v1352_v49 = vpop.permute.xlu1 %1351  ;;  %1725 = vmatprep.subr.mxu1 %v6263_v0  ;;  %v1276_v50 = vpop.permute.xlu0 %1275  ;;  %1576 = vmatprep.subr.mxu0 %v6263_v0 }
 0x4e4   :  { %1726 = vmatpush1.msra.mxu1 %v1314_v42  ;;  %v1397_v42 = vld [vmem:[%s6256_s4 + $0xf0] sm:$0xff] }
 0x4e5   :  { %1727 = vmatprep.subr.mxu1 %v6263_v0 }
 0x4e6   :  { %1728 = vmatpush1.msra.mxu1 %v1312_v41  ;;  %v1395_v41 = vld [vmem:[%s6256_s4 + $0xe0] sm:$0xff] }
 0x4e7   :  { %v1350_v51 = vpop.permute.xlu1 %1349  ;;  %1729 = vmatprep.subr.mxu1 %v6263_v0  ;;  %v1266_v52 = vpop.permute.xlu0 %1265 }
 0x4e8   :  { %1577 = vmatpush2.msra.mxu0 %v1266_v52  ;;  %1730 = vmatpush1.msra.mxu1 %v1310_v39  ;;  %v1396_v39 = vld [vmem:[%s6256_s4 + $0xe8] sm:$0xff]  ;;  %v1410_v52 = vld [vmem:[%s6256_s4 + $0x158] sm:$0xff] }
 0x4e9   :  { %1731 = vmatprep.subr.mxu1 %v6263_v0  ;;  %1578 = vmatprep.subr.mxu0 %v6263_v0 }
 0x4ea   :  { %1732 = vmatpush1.msra.mxu1 %v1308_v36  ;;  %v1394_v36 = vld [vmem:[%s6256_s4 + $0xd8] sm:$0xff] }
 0x4eb   :  { %v1348_v53 = vpop.permute.xlu1 %1347  ;;  %1733 = vmatprep.subr.mxu1 %v6263_v0  ;;  %v1264_v54 = vpop.permute.xlu0 %1263 }
 0x4ec   :  { %1579 = vmatpush2.msra.mxu0 %v1264_v54  ;;  %1734 = vmatpush1.msra.mxu1 %v1306_v37  ;;  %v1391_v37 = vld [vmem:[%s6256_s4 + $0xc0] sm:$0xff]  ;;  %v1409_v54 = vld [vmem:[%s6256_s4 + $0x150] sm:$0xff] }
 0x4ed   :  { %1735 = vmatprep.subr.mxu1 %v6263_v0  ;;  %1580 = vmatprep.subr.mxu0 %v6263_v0 }
 0x4ee   :  { %1736 = vmatpush1.msra.mxu1 %v5120_v34  ;;  %v1389_v34 = vld [vmem:[%s6256_s4 + $0xb0] sm:$0xff] }
 0x4ef   :  { %v1346_v55 = vpop.permute.xlu1 %1345  ;;  %1737 = vmatprep.subr.mxu1 %v6263_v0  ;;  %v1262_v56 = vpop.permute.xlu0 %1261 }
 0x4f0   :  { %1581 = vmatpush2.msra.mxu0 %v1262_v56  ;;  %1738 = vmatpush1.msra.mxu1 %v5123_v35  ;;  %v1392_v35 = vld [vmem:[%s6256_s4 + $0xc8] sm:$0xff]  ;;  %v1414_v56 = vld [vmem:[%s6256_s4 + $0x178] sm:$0xff] }
 0x4f1   :  { %1739 = vmatprep.subr.mxu1 %v6263_v0  ;;  %1582 = vmatprep.subr.mxu0 %v6263_v0 }
 0x4f2   :  { %1740 = vmatpush1.msra.mxu1 %v5115_v33  ;;  %v1387_v33 = vld [vmem:[%s6256_s4 + $0xa0] sm:$0xff] }
 0x4f3   :  { %v1344_v57 = vpop.permute.xlu1 %1343  ;;  %1741 = vmatprep.subr.mxu1 %v6263_v0  ;;  %v1260_v58 = vpop.permute.xlu0 %1259 }
 0x4f4   :  { %1583 = vmatpush2.msra.mxu0 %v1260_v58  ;;  %1742 = vmatpush1.msra.mxu1 %v5113_v30  ;;  %v1385_v30 = vld [vmem:[%s6256_s4 + $0x90] sm:$0xff] }
 0x4f5   :  { %1743 = vmatprep.subr.mxu1 %v6263_v0  ;;  %1584 = vmatprep.subr.mxu0 %v6263_v0  ;;  %v1413_v58 = vld [vmem:[%s6256_s4 + $0x170] sm:$0xff] }
 0x4f6   :  { %1744 = vmatpush1.msra.mxu1 %v5111_v28  ;;  %v1386_v28 = vld [vmem:[%s6256_s4 + $0x98] sm:$0xff] }
 0x4f7   :  { %v1354_v59 = vpop.permute.xlu1 %1353  ;;  %1745 = vmatprep.subr.mxu1 %v6263_v0  ;;  %v1282_v60 = vpop.permute.xlu0 %1281 }
 0x4f8   :  { %1746 = vmatpush1.msra.mxu1 %v1282_v60  ;;  %v1418_v60 = vld [vmem:[%s6256_s4 + $0x198] sm:$0xff] }
 0x4f9   :  { %1747 = vmatprep.subr.mxu1 %v6263_v0 }
 0x4fa   :  { %1748 = vmatpush1.msra.mxu1 %v1280_v45  ;;  %v1399_v45 = vld [vmem:[%s6256_s4 + $0x100] sm:$0xff] }
 0x4fb   :  { %v1342_v61 = vpop.permute.xlu1 %1341  ;;  %1749 = vmatprep.subr.mxu1 %v6263_v0  ;;  %v1244_v62 = vpop.permute.xlu0 %1243 }
 0x4fc   :  { %1750 = vmatpush1.msra.mxu1 %v5142_v43  ;;  %v1400_v43 = vld [vmem:[%s6256_s4 + $0x108] sm:$0xff] }
 0x4fd   :  { %1751 = vmatprep.subr.mxu1 %v6263_v0 }
 0x4fe   :  { %1752 = vmatpush1.msra.mxu1 %v1276_v50  ;;  %v1405_v50 = vld [vmem:[%s6256_s4 + $0x130] sm:$0xff] }
 0x4ff   :  { %v1340_v63 = vpop.permute.xlu1 %1339  ;;  %1759 = vmatprep.subr.mxu1 %v6263_v0  ;;  %v1242_v1 = vpop.permute.xlu0 %1241 }
 0x500   :  { %3709 = vmatpush2.msk.msra.mxu1 %vm295_vm1, %v4471_v26 }
 0x501   :  { %1761 = vmatprep.subr.mxu1 %v6263_v0 }
 0x502   :  { %1762 = vmatpush2.msra.mxu1 %v1354_v59  ;;  %v1416_v59 = vld [vmem:[%s6256_s4 + $0x188] sm:$0xff] }
 0x503   :  { %1763 = vmatprep.subr.mxu1 %v6263_v0  ;;  %v1240_v2 = vpop.permute.xlu0 %1239  ;;  %v1338_v3 = vpop.permute.xlu1 %1337 }
 0x504   :  { %1764 = vmatpush2.msra.mxu1 %v1352_v49  ;;  %v1403_v49 = vld [vmem:[%s6256_s4 + $0x120] sm:$0xff] }
 0x505   :  { %1765 = vmatprep.subr.mxu1 %v6263_v0 }
 0x506   :  { %1766 = vmatpush2.msra.mxu1 %v1350_v51  ;;  %v1408_v51 = vld [vmem:[%s6256_s4 + $0x148] sm:$0xff] }
 0x507   :  { %1767 = vmatprep.subr.mxu1 %v6263_v0  ;;  %v1246_v4 = vpop.permute.xlu0 %1245  ;;  %v1336_v5 = vpop.permute.xlu1 %1335 }
 0x508   :  { %1585 = vmatpush2.msra.mxu0 %v1246_v4  ;;  %1768 = vmatpush2.msra.mxu1 %v1348_v53  ;;  %v1407_v53 = vld [vmem:[%s6256_s4 + $0x140] sm:$0xff]  ;;  %v1424_v4 = vld [vmem:[%s6256_s4 + $0x1c8] sm:$0xff] }
 0x509   :  { %1586 = vmatprep.subr.mxu0 %v6263_v0  ;;  %1769 = vmatprep.subr.mxu1 %v6263_v0 }
 0x50a   :  { %1587 = vmatpush2.msra.mxu0 %v1244_v62  ;;  %1770 = vmatpush2.msra.mxu1 %v1346_v55  ;;  %v1412_v55 = vld [vmem:[%s6256_s4 + $0x168] sm:$0xff]  ;;  %v1417_v62 = vld [vmem:[%s6256_s4 + $0x190] sm:$0xff] }
 0x50b   :  { %1771 = vmatprep.subr.mxu1 %v6263_v0  ;;  %v1238_v6 = vpop.permute.xlu0 %1237  ;;  %1588 = vmatprep.subr.mxu0 %v6263_v0  ;;  %v1334_v8 = vpop.permute.xlu1 %1333 }
 0x50c   :  { %1589 = vmatpush2.msra.mxu0 %v1242_v1  ;;  %1772 = vmatpush2.msra.mxu1 %v1344_v57  ;;  %v1411_v57 = vld [vmem:[%s6256_s4 + $0x160] sm:$0xff]  ;;  %v1422_v1 = vld [vmem:[%s6256_s4 + $0x1b8] sm:$0xff] }
 0x50d   :  { %1590 = vmatprep.subr.mxu0 %v6263_v0  ;;  %1773 = vmatprep.subr.mxu1 %v6263_v0 }
 0x50e   :  { %1591 = vmatpush2.msra.mxu0 %v1240_v2  ;;  %1774 = vmatpush2.msra.mxu1 %v1342_v61  ;;  %v1415_v61 = vld [vmem:[%s6256_s4 + $0x180] sm:$0xff] }
 0x50f   :  { %1775 = vmatprep.subr.mxu1 %v6263_v0  ;;  %v1236_v7 = vpop.permute.xlu0 %1235  ;;  %1592 = vmatprep.subr.mxu0 %v6263_v0  ;;  %v1332_v12 = vpop.permute.xlu1 %1331  ;;  %v1419_v2 = vld [vmem:[%s6256_s4 + $0x1a0] sm:$0xff] }
 0x510   :  { %1593 = vmatpush2.msra.mxu0 %v1238_v6  ;;  %1776 = vmatpush2.msra.mxu1 %v1340_v63  ;;  %v1420_v63 = vld [vmem:[%s6256_s4 + $0x1a8] sm:$0xff]  ;;  %v1423_v6 = vld [vmem:[%s6256_s4 + $0x1c0] sm:$0xff] }
 0x511   :  { %1594 = vmatprep.subr.mxu0 %v6263_v0  ;;  %1777 = vmatprep.subr.mxu1 %v6263_v0 }
 0x512   :  { %1595 = vmatpush2.msra.mxu0 %v1236_v7  ;;  %1778 = vmatpush2.msra.mxu1 %v1338_v3  ;;  %v1421_v3 = vld [vmem:[%s6256_s4 + $0x1b0] sm:$0xff] }
 0x513   :  { %1779 = vmatprep.subr.mxu1 %v6263_v0  ;;  %v1234_v9 = vpop.permute.xlu0 %1233  ;;  %1596 = vmatprep.subr.mxu0 %v6263_v0  ;;  %v1425_v7 = vld [vmem:[%s6256_s4 + $0x1d0] sm:$0xff] }
 0x514   :  { %1597 = vmatpush2.msra.mxu0 %v1234_v9  ;;  %1780 = vmatpush2.msra.mxu1 %v1336_v5  ;;  %v1426_v5 = vld [vmem:[%s6256_s4 + $0x1d8] sm:$0xff] }
 0x515   :  { %1781 = vmatprep.subr.mxu1 %v6263_v0  ;;  %1598 = vmatprep.subr.mxu0 %v6263_v0  ;;  %v1430_v9 = vld [vmem:[%s6256_s4 + $0x1f8] sm:$0xff] }
 0x516   :  { %1782 = vmatpush2.msra.mxu1 %v1334_v8  ;;  %v1428_v8 = vld [vmem:[%s6256_s4 + $0x1e8] sm:$0xff] }
 0x517   :  { %1783 = vmatprep.subr.mxu1 %v6263_v0  ;;  %v1232_v13 = vpop.permute.xlu0 %1231 }
 0x518   :  { %1599 = vmatpush2.msra.mxu0 %v1232_v13  ;;  %1784 = vmatpush2.msra.mxu1 %v1332_v12  ;;  %v1432_v12 = vld [vmem:[%s6256_s4 + $0x208] sm:$0xff]  ;;  %v1434_v13 = vld [vmem:[%s6256_s4 + $0x218] sm:$0xff] }
 0x519   :  { %1601 = vmatmul.mubr.f32.vlgmr.msra.gmra.mxu0 %v1367_v10  ;;  %1786 = vmatmul.mubr.f32.vlgmr.msra.gmra.mxu1 %v1369_v11  ;;  %v1427_v10 = vld [vmem:[%s6256_s4 + $0x1e0] sm:$0xff]  ;;  %v1429_v11 = vld [vmem:[%s6256_s4 + $0x1f0] sm:$0xff] }
 0x51a   :  { %1605 = vmatprep.mubr.f32.mxu0 %v1372_v14  ;;  %3711 = vmatprep.mubr.msk.f32.mxu1 %vm1463_vm3, %v1374_v15  ;;  %v1431_v14 = vld [vmem:[%s6256_s4 + $0x200] sm:$0xff]  ;;  %v1433_v15 = vld [vmem:[%s6256_s4 + $0x210] sm:$0xff] }
 0x51b   :  { %2431 = vmatprep.subr.mxu1 %v6263_v0 }
 0x51d   :  { %1606 = vmatmul.mubr.f32.gmra.mxu0 %v1371_v16  ;;  %1791 = vmatmul.mubr.f32.gmra.mxu1 %v1373_v17  ;;  %v1436_v16 = vld [vmem:[%s6256_s4 + $0x228] sm:$0xff]  ;;  %v1438_v17 = vld [vmem:[%s6256_s4 + $0x238] sm:$0xff] }
 0x51e   :  { %1610 = vmatprep.mubr.f32.mxu0 %v1376_v18  ;;  %3712 = vmatprep.mubr.msk.f32.mxu1 %vm1463_vm3, %v1378_v19  ;;  %v1435_v18 = vld [vmem:[%s6256_s4 + $0x220] sm:$0xff]  ;;  %v1437_v19 = vld [vmem:[%s6256_s4 + $0x230] sm:$0xff] }
 0x521   :  { %1611 = vmatmul.mubr.f32.gmra.mxu0 %v1375_v20  ;;  %1796 = vmatmul.mubr.f32.gmra.mxu1 %v1377_v21  ;;  %v1440_v20 = vld [vmem:[%s6256_s4 + $0x248] sm:$0xff]  ;;  %v1442_v21 = vld [vmem:[%s6256_s4 + $0x258] sm:$0xff] }
 0x522   :  { %1615 = vmatprep.mubr.f32.mxu0 %v1380_v22  ;;  %3713 = vmatprep.mubr.msk.f32.mxu1 %vm1463_vm3, %v1382_v23  ;;  %v1932_v22 = vld [vmem:[#allocation7 + $0x10] sm:$0xff]  ;;  %v1931_v23 = vld [vmem:[#allocation7 + $0x8] sm:$0xff] }
 0x523   :  { %4135 = vmatprep.subr.mxu0 %v1932_v22 }
 0x524   :  { %4136 = vmatpush3.msra.mxu0 %v1932_v22 }
 0x525   :  { %1616 = vmatmul.mubr.f32.gmra.mxu0 %v1379_v24  ;;  %1801 = vmatmul.mubr.f32.gmra.mxu1 %v1381_v25  ;;  %v1439_v24 = vld [vmem:[%s6256_s4 + $0x240] sm:$0xff]  ;;  %v1441_v25 = vld [vmem:[%s6256_s4 + $0x250] sm:$0xff] }
 0x526   :  { %1620 = vmatprep.mubr.f32.mxu0 %v1384_v27  ;;  %3714 = vmatprep.mubr.msk.f32.mxu1 %vm1463_vm3, %v1386_v28  ;;  %v1444_v27 = vld [vmem:[%s6256_s4 + $0x268] sm:$0xff]  ;;  %v1446_v28 = vld [vmem:[%s6256_s4 + $0x278] sm:$0xff] }
 0x527   :  { %4137 = vmatprep.subr.mxu0 %v1931_v23 }
 0x528   :  { %4138 = vmatpush3.msra.mxu0 %v1931_v23 }
 0x529   :  { %1621 = vmatmul.mubr.f32.gmra.mxu0 %v1383_v29  ;;  %1806 = vmatmul.mubr.f32.gmra.mxu1 %v1385_v30  ;;  %v1930_v29 = vld [vmem:[#allocation7] sm:$0xff]  ;;  %v1443_v30 = vld [vmem:[%s6256_s4 + $0x260] sm:$0xff] }
 0x52a   :  { %1625 = vmatprep.mubr.f32.mxu0 %v1388_v31  ;;  %3715 = vmatprep.mubr.msk.f32.mxu1 %vm1463_vm3, %v1390_v32  ;;  %v1445_v31 = vld [vmem:[%s6256_s4 + $0x270] sm:$0xff]  ;;  %v1448_v32 = vld [vmem:[%s6256_s4 + $0x288] sm:$0xff] }
 0x52b   :  { %4139 = vmatprep.subr.mxu0 %v1930_v29 }
 0x52c   :  { %4140 = vmatpush3.msra.mxu0 %v1930_v29 }
 0x52d   :  { %1626 = vmatmul.mubr.f32.gmra.mxu0 %v1387_v33  ;;  %1811 = vmatmul.mubr.f32.gmra.mxu1 %v1389_v34  ;;  %v1450_v33 = vld [vmem:[%s6256_s4 + $0x298] sm:$0xff]  ;;  %v1447_v34 = vld [vmem:[%s6256_s4 + $0x280] sm:$0xff] }
 0x52e   :  { %1630 = vmatprep.mubr.f32.mxu0 %v1392_v35  ;;  %3716 = vmatprep.mubr.msk.f32.mxu1 %vm1463_vm3, %v1394_v36  ;;  %v1449_v35 = vld [vmem:[%s6256_s4 + $0x290] sm:$0xff]  ;;  %v1452_v36 = vld [vmem:[%s6256_s4 + $0x2a8] sm:$0xff] }
 0x531   :  { %1631 = vmatmul.mubr.f32.gmra.mxu0 %v1391_v37  ;;  %1816 = vmatmul.mubr.f32.gmra.mxu1 %v1393_v38  ;;  %v1454_v37 = vld [vmem:[%s6256_s4 + $0x2b8] sm:$0xff]  ;;  %v1451_v38 = vld [vmem:[%s6256_s4 + $0x2a0] sm:$0xff] }
 0x532   :  { %1635 = vmatprep.mubr.f32.mxu0 %v1396_v39  ;;  %3717 = vmatprep.mubr.msk.f32.mxu1 %vm1463_vm3, %v1398_v40  ;;  %v1453_v39 = vld [vmem:[%s6256_s4 + $0x2b0] sm:$0xff]  ;;  %v1456_v40 = vld [vmem:[%s6256_s4 + $0x2c8] sm:$0xff] }
 0x535   :  { %1636 = vmatmul.mubr.f32.gmra.mxu0 %v1395_v41  ;;  %1821 = vmatmul.mubr.f32.gmra.mxu1 %v1397_v42  ;;  %v1458_v41 = vld [vmem:[%s6256_s4 + $0x2d8] sm:$0xff]  ;;  %v1455_v42 = vld [vmem:[%s6256_s4 + $0x2c0] sm:$0xff] }
 0x536   :  { %1640 = vmatprep.mubr.f32.mxu0 %v1400_v43  ;;  %3718 = vmatprep.mubr.msk.f32.mxu1 %vm1463_vm3, %v1402_v44  ;;  %v1457_v43 = vld [vmem:[%s6256_s4 + $0x2d0] sm:$0xff]  ;;  %v1460_v44 = vld [vmem:[%s6256_s4 + $0x2e8] sm:$0xff] }
 0x539   :  { %1641 = vmatmul.mubr.f32.gmra.mxu0 %v1399_v45  ;;  %1826 = vmatmul.mubr.f32.gmra.mxu1 %v1401_v46  ;;  %v1462_v45 = vld [vmem:[%s6256_s4 + $0x2f8] sm:$0xff]  ;;  %v1459_v46 = vld [vmem:[%s6256_s4 + $0x2e0] sm:$0xff] }
 0x53a   :  { %1645 = vmatprep.mubr.f32.mxu0 %v1404_v47  ;;  %3719 = vmatprep.mubr.msk.f32.mxu1 %vm1463_vm3, %v1406_v48  ;;  %v1461_v47 = vld [vmem:[%s6256_s4 + $0x2f0] sm:$0xff]  ;;  %s4473_s4 = smov 116  }
 0x53d   :  { %1646 = vmatmul.mubr.f32.gmra.mxu0 %v1403_v49  ;;  %1831 = vmatmul.mubr.f32.gmra.mxu1 %v1405_v50 }
 0x53e   :  { %1650 = vmatprep.mubr.f32.mxu0 %v1408_v51  ;;  %3720 = vmatprep.mubr.msk.f32.mxu1 %vm1463_vm3, %v1410_v52 }
 0x541   :  { %1651 = vmatmul.mubr.f32.gmra.mxu0 %v1407_v53  ;;  %1836 = vmatmul.mubr.f32.gmra.mxu1 %v1409_v54 }
 0x542   :  { %1655 = vmatprep.mubr.f32.mxu0 %v1412_v55  ;;  %3721 = vmatprep.mubr.msk.f32.mxu1 %vm1463_vm3, %v1414_v56 }
 0x545   :  { %1656 = vmatmul.mubr.f32.gmra.mxu0 %v1411_v57  ;;  %1841 = vmatmul.mubr.f32.gmra.mxu1 %v1413_v58 }
 0x546   :  { %1660 = vmatprep.mubr.f32.mxu0 %v1416_v59  ;;  %3722 = vmatprep.mubr.msk.f32.mxu1 %vm1463_vm3, %v1418_v60 }
 0x549   :  { %1661 = vmatmul.mubr.f32.gmra.mxu0 %v1415_v61  ;;  %1846 = vmatmul.mubr.f32.gmra.mxu1 %v1417_v62 }
 0x54a   :  { %1665 = vmatprep.mubr.f32.mxu0 %v1420_v63  ;;  %3723 = vmatprep.mubr.msk.f32.mxu1 %vm1463_vm3, %v1422_v1 }
 0x54d   :  { %1666 = vmatmul.mubr.f32.gmra.mxu0 %v1419_v2  ;;  %1851 = vmatmul.mubr.f32.gmra.mxu1 %v1421_v3 }
 0x54e   :  { %1670 = vmatprep.mubr.f32.mxu0 %v1424_v4  ;;  %3724 = vmatprep.mubr.msk.f32.mxu1 %vm1463_vm3, %v1426_v5 }
 0x551   :  { %1671 = vmatmul.mubr.f32.gmra.mxu0 %v1423_v6  ;;  %1856 = vmatmul.mubr.f32.gmra.mxu1 %v1425_v7 }
 0x552   :  { %1675 = vmatprep.mubr.f32.mxu0 %v1428_v8  ;;  %3725 = vmatprep.mubr.msk.f32.mxu1 %vm1463_vm3, %v1430_v9 }
 0x555   :  { %1676 = vmatmul.mubr.f32.gmra.mxu0 %v1427_v10  ;;  %1861 = vmatmul.mubr.f32.gmra.mxu1 %v1429_v11 }
 0x556   :  { %1680 = vmatprep.mubr.f32.mxu0 %v1432_v12  ;;  %3726 = vmatprep.mubr.msk.f32.mxu1 %vm1463_vm3, %v1434_v13 }
 0x559   :  { %1681 = vmatmul.mubr.f32.gmra.mxu0 %v1431_v14  ;;  %1866 = vmatmul.mubr.f32.gmra.mxu1 %v1433_v15 }
 0x55a   :  { %1685 = vmatprep.mubr.f32.mxu0 %v1436_v16  ;;  %3727 = vmatprep.mubr.msk.f32.mxu1 %vm1463_vm3, %v1438_v17 }
 0x55d   :  { %1686 = vmatmul.mubr.f32.gmra.mxu0 %v1435_v18  ;;  %1871 = vmatmul.mubr.f32.gmra.mxu1 %v1437_v19 }
 0x55e   :  { %1690 = vmatprep.mubr.f32.mxu0 %v1440_v20  ;;  %3728 = vmatprep.mubr.msk.f32.mxu1 %vm1463_vm3, %v1442_v21 }
 0x561   :  { %1691 = vmatmul.mubr.f32.gmra.mxu0 %v1439_v24  ;;  %1876 = vmatmul.mubr.f32.gmra.mxu1 %v1441_v25 }
 0x562   :  { %1695 = vmatprep.mubr.f32.mxu0 %v1444_v27  ;;  %3729 = vmatprep.mubr.msk.f32.mxu1 %vm1463_vm3, %v1446_v28 }
 0x565   :  { %1696 = vmatmul.mubr.f32.gmra.mxu0 %v1443_v30  ;;  %1881 = vmatmul.mubr.f32.gmra.mxu1 %v1445_v31 }
 0x566   :  { %1700 = vmatprep.mubr.f32.mxu0 %v1448_v32  ;;  %3730 = vmatprep.mubr.msk.f32.mxu1 %vm1463_vm3, %v1450_v33 }
 0x569   :  { %1701 = vmatmul.mubr.f32.gmra.mxu0 %v1447_v34  ;;  %1886 = vmatmul.mubr.f32.gmra.mxu1 %v1449_v35 }
 0x56a   :  { %1705 = vmatprep.mubr.f32.mxu0 %v1452_v36  ;;  %3731 = vmatprep.mubr.msk.f32.mxu1 %vm1463_vm3, %v1454_v37 }
 0x56d   :  { %1706 = vmatmul.mubr.f32.gmra.mxu0 %v1451_v38  ;;  %1891 = vmatmul.mubr.f32.gmra.mxu1 %v1453_v39 }
 0x56e   :  { %1710 = vmatprep.mubr.f32.mxu0 %v1456_v40  ;;  %3732 = vmatprep.mubr.msk.f32.mxu1 %vm1463_vm3, %v1458_v41 }
 0x571   :  { %1711 = vmatmul.mubr.f32.gmra.mxu0 %v1455_v42  ;;  %1896 = vmatmul.mubr.f32.gmra.mxu1 %v1457_v43 }
 0x572   :  { %1715 = vmatprep.mubr.f32.mxu0 %v1460_v44  ;;  %3733 = vmatprep.mubr.msk.f32.mxu1 %vm1463_vm3, %v1462_v45 }
 0x575   :  { %1716 = vmatmul.mubr.f32.gmra.mxu0 %v1459_v46  ;;  %1901 = vmatmul.mubr.f32.gmra.mxu1 %v1461_v47 }
 0x5d9   :  { %v1602_v48 = vpop.f32.mrf.mxu0  ;;  %v1787_v49 = vpop.f32.mrf.mxu1 }
 0x5da   :  { %v1788_v50 = vadd.f32 %v1787_v49, %v1602_v48 }
 0x5db   :  { %v1604_v51 = vpop.f32.mrf.mxu0  ;;  %v1789_v52 = vpop.f32.mrf.mxu1 }
 0x5dc   :  { %v1906_v53 = vmax.f32 %v1788_v50, 0.0 }
 0x5dd   :  { %v1607_v54 = vpop.f32.mrf.mxu0  ;;  %v1792_v55 = vpop.f32.mrf.mxu1 }
 0x5de   :  { %v1793_v56 = vadd.f32 %v1792_v55, %v1607_v54  ;;  %4141 = vmatprep.mubr.msk.f32.mxu0 %vm1933_vm4, %v1906_v53 }
 0x5df   :  { %v1609_v57 = vpop.f32.mrf.mxu0  ;;  %v1794_v58 = vpop.f32.mrf.mxu1 }
 0x5e0   :  { %v1907_v59 = vmax.f32 %v1793_v56, 0.0 }
 0x5e1   :  { %v1612_v60 = vpop.f32.mrf.mxu0  ;;  %v1797_v61 = vpop.f32.mrf.mxu1 }
 0x5e2   :  { %v1798_v62 = vadd.f32 %v1797_v61, %v1612_v60  ;;  %4142 = vmatmul.mubr.msk.f32.vlgmr.msra.gmra.mxu0 %vm1933_vm4, %v1907_v59 }
 0x5e3   :  { %v1614_v63 = vpop.f32.mrf.mxu0  ;;  %v1799_v1 = vpop.f32.mrf.mxu1 }
 0x5e4   :  { %v1908_v2 = vmax.f32 %v1798_v62, 0.0 }
 0x5e5   :  { %v1617_v3 = vpop.f32.mrf.mxu0  ;;  %v1802_v4 = vpop.f32.mrf.mxu1 }
 0x5e6   :  { %v1803_v5 = vadd.f32 %v1802_v4, %v1617_v3  ;;  %4144 = vmatprep.mubr.msk.f32.mxu0 %vm1933_vm4, %v1908_v2 }
 0x5e7   :  { %v1619_v6 = vpop.f32.mrf.mxu0  ;;  %v1804_v7 = vpop.f32.mrf.mxu1 }
 0x5e8   :  { %v1909_v8 = vmax.f32 %v1803_v5, 0.0 }
 0x5e9   :  { %v1622_v9 = vpop.f32.mrf.mxu0  ;;  %v1807_v10 = vpop.f32.mrf.mxu1 }
 0x5ea   :  { %v1808_v11 = vadd.f32 %v1807_v10, %v1622_v9  ;;  %4145 = vmatmul.mubr.msk.f32.gmra.mxu0 %vm1933_vm4, %v1909_v8 }
 0x5eb   :  { %v1624_v12 = vpop.f32.mrf.mxu0  ;;  %v1809_v13 = vpop.f32.mrf.mxu1 }
 0x5ec   :  { %v1910_v14 = vmax.f32 %v1808_v11, 0.0 }
 0x5ed   :  { %v1627_v15 = vpop.f32.mrf.mxu0  ;;  %v1812_v16 = vpop.f32.mrf.mxu1 }
 0x5ee   :  { %v1813_v17 = vadd.f32 %v1812_v16, %v1627_v15  ;;  %4147 = vmatprep.mubr.msk.f32.mxu0 %vm1933_vm4, %v1910_v14 }
 0x5ef   :  { %v1629_v18 = vpop.f32.mrf.mxu0  ;;  %v1814_v19 = vpop.f32.mrf.mxu1 }
 0x5f0   :  { %v1911_v20 = vmax.f32 %v1813_v17, 0.0 }
 0x5f1   :  { %v1632_v21 = vpop.f32.mrf.mxu0  ;;  %v1817_v22 = vpop.f32.mrf.mxu1 }
 0x5f2   :  { %v1818_v23 = vadd.f32 %v1817_v22, %v1632_v21  ;;  %4148 = vmatmul.mubr.msk.f32.gmra.mxu0 %vm1933_vm4, %v1911_v20 }
 0x5f3   :  { %v1634_v24 = vpop.f32.mrf.mxu0  ;;  %v1819_v25 = vpop.f32.mrf.mxu1 }
 0x5f4   :  { %v1912_v27 = vmax.f32 %v1818_v23, 0.0 }
 0x5f5   :  { %v1637_v28 = vpop.f32.mrf.mxu0  ;;  %v1822_v29 = vpop.f32.mrf.mxu1 }
 0x5f6   :  { %v1823_v30 = vadd.f32 %v1822_v29, %v1637_v28  ;;  %4150 = vmatprep.mubr.msk.f32.mxu0 %vm1933_vm4, %v1912_v27 }
 0x5f7   :  { %v1639_v31 = vpop.f32.mrf.mxu0  ;;  %v1824_v32 = vpop.f32.mrf.mxu1 }
 0x5f8   :  { %v1913_v33 = vmax.f32 %v1823_v30, 0.0 }
 0x5f9   :  { %v1642_v34 = vpop.f32.mrf.mxu0  ;;  %v1827_v35 = vpop.f32.mrf.mxu1 }
 0x5fa   :  { %v1828_v36 = vadd.f32 %v1827_v35, %v1642_v34  ;;  %4151 = vmatmul.mubr.msk.f32.gmra.mxu0 %vm1933_vm4, %v1913_v33 }
 0x5fb   :  { %v1644_v37 = vpop.f32.mrf.mxu0  ;;  %v1829_v38 = vpop.f32.mrf.mxu1 }
 0x5fc   :  { %v1914_v39 = vmax.f32 %v1828_v36, 0.0 }
 0x5fd   :  { %v1647_v40 = vpop.f32.mrf.mxu0  ;;  %v1832_v41 = vpop.f32.mrf.mxu1 }
 0x5fe   :  { %v1833_v42 = vadd.f32 %v1832_v41, %v1647_v40  ;;  %4153 = vmatprep.mubr.msk.f32.mxu0 %vm1933_vm4, %v1914_v39 }
 0x5ff   :  { %v1649_v43 = vpop.f32.mrf.mxu0  ;;  %v1834_v44 = vpop.f32.mrf.mxu1 }
 0x600   :  { %v1915_v45 = vmax.f32 %v1833_v42, 0.0 }
 0x601   :  { %v1652_v46 = vpop.f32.mrf.mxu0  ;;  %v1837_v47 = vpop.f32.mrf.mxu1 }
 0x602   :  { %v1838_v48 = vadd.f32 %v1837_v47, %v1652_v46  ;;  %4154 = vmatmul.mubr.msk.f32.gmra.mxu0 %vm1933_vm4, %v1915_v45 }
 0x603   :  { %v1654_v49 = vpop.f32.mrf.mxu0  ;;  %v1839_v50 = vpop.f32.mrf.mxu1 }
 0x604   :  { %v1916_v51 = vmax.f32 %v1838_v48, 0.0 }
 0x605   :  { %v1657_v52 = vpop.f32.mrf.mxu0  ;;  %v1842_v53 = vpop.f32.mrf.mxu1 }
 0x606   :  { %v1843_v54 = vadd.f32 %v1842_v53, %v1657_v52  ;;  %4156 = vmatprep.mubr.msk.f32.mxu0 %vm1933_vm4, %v1916_v51 }
 0x607   :  { %v1659_v55 = vpop.f32.mrf.mxu0  ;;  %v1844_v56 = vpop.f32.mrf.mxu1 }
 0x608   :  { %v1917_v57 = vmax.f32 %v1843_v54, 0.0 }
 0x609   :  { %v1662_v58 = vpop.f32.mrf.mxu0  ;;  %v1847_v59 = vpop.f32.mrf.mxu1 }
 0x60a   :  { %v1848_v60 = vadd.f32 %v1847_v59, %v1662_v58  ;;  %4157 = vmatmul.mubr.msk.f32.gmra.mxu0 %vm1933_vm4, %v1917_v57 }
 0x60b   :  { %v1664_v61 = vpop.f32.mrf.mxu0  ;;  %v1849_v62 = vpop.f32.mrf.mxu1 }
 0x60c   :  { %v1918_v63 = vmax.f32 %v1848_v60, 0.0 }
 0x60d   :  { %v1667_v1 = vpop.f32.mrf.mxu0  ;;  %v1852_v2 = vpop.f32.mrf.mxu1 }
 0x60e   :  { %v1853_v3 = vadd.f32 %v1852_v2, %v1667_v1  ;;  %4159 = vmatprep.mubr.msk.f32.mxu0 %vm1933_vm4, %v1918_v63 }
 0x60f   :  { %v1669_v4 = vpop.f32.mrf.mxu0  ;;  %v1854_v5 = vpop.f32.mrf.mxu1 }
 0x610   :  { %v1919_v6 = vmax.f32 %v1853_v3, 0.0 }
 0x611   :  { %v1672_v7 = vpop.f32.mrf.mxu0  ;;  %v1857_v8 = vpop.f32.mrf.mxu1 }
 0x612   :  { %v1858_v9 = vadd.f32 %v1857_v8, %v1672_v7  ;;  %4160 = vmatmul.mubr.msk.f32.gmra.mxu0 %vm1933_vm4, %v1919_v6 }
 0x613   :  { %v1674_v10 = vpop.f32.mrf.mxu0  ;;  %v1859_v11 = vpop.f32.mrf.mxu1 }
 0x614   :  { %v1920_v12 = vmax.f32 %v1858_v9, 0.0 }
 0x615   :  { %v1677_v13 = vpop.f32.mrf.mxu0  ;;  %v1862_v14 = vpop.f32.mrf.mxu1 }
 0x616   :  { %v1863_v15 = vadd.f32 %v1862_v14, %v1677_v13  ;;  %4162 = vmatprep.mubr.msk.f32.mxu0 %vm1933_vm4, %v1920_v12 }
 0x617   :  { %v1679_v16 = vpop.f32.mrf.mxu0  ;;  %v1864_v17 = vpop.f32.mrf.mxu1 }
 0x618   :  { %v1921_v18 = vmax.f32 %v1863_v15, 0.0 }
 0x619   :  { %v1682_v19 = vpop.f32.mrf.mxu0  ;;  %v1867_v20 = vpop.f32.mrf.mxu1 }
 0x61a   :  { %v1868_v21 = vadd.f32 %v1867_v20, %v1682_v19  ;;  %4163 = vmatmul.mubr.msk.f32.gmra.mxu0 %vm1933_vm4, %v1921_v18 }
 0x61b   :  { %v1684_v22 = vpop.f32.mrf.mxu0  ;;  %v1869_v23 = vpop.f32.mrf.mxu1 }
 0x61c   :  { %v1922_v24 = vmax.f32 %v1868_v21, 0.0 }
 0x61d   :  { %v1687_v25 = vpop.f32.mrf.mxu0  ;;  %v1872_v27 = vpop.f32.mrf.mxu1 }
 0x61e   :  { %v1873_v28 = vadd.f32 %v1872_v27, %v1687_v25  ;;  %4165 = vmatprep.mubr.msk.f32.mxu0 %vm1933_vm4, %v1922_v24 }
 0x61f   :  { %v1689_v29 = vpop.f32.mrf.mxu0  ;;  %v1874_v30 = vpop.f32.mrf.mxu1 }
 0x620   :  { %v1923_v31 = vmax.f32 %v1873_v28, 0.0  ;;  %v2312_v30 = vld [vmem:[#allocation8 + $0x8] sm:$0xff] }
 0x621   :  { %v1692_v32 = vpop.f32.mrf.mxu0  ;;  %v1877_v33 = vpop.f32.mrf.mxu1  ;;  %3758 = vmatprep.mubr.msk.f32.mxu1 %vm516_vm2, %v2312_v30  ;;  %v2326_v30 = vld [vmem:[#allocation8 + $0x78] sm:$0xff] }
 0x622   :  { %v1878_v34 = vadd.f32 %v1877_v33, %v1692_v32  ;;  %4166 = vmatmul.mubr.msk.f32.gmra.mxu0 %vm1933_vm4, %v1923_v31 }
 0x623   :  { %v1694_v35 = vpop.f32.mrf.mxu0  ;;  %v1879_v36 = vpop.f32.mrf.mxu1 }
 0x624   :  { %v1924_v37 = vmax.f32 %v1878_v34, 0.0 }
 0x625   :  { %v1697_v38 = vpop.f32.mrf.mxu0  ;;  %v1882_v39 = vpop.f32.mrf.mxu1 }
 0x626   :  { %v1883_v40 = vadd.f32 %v1882_v39, %v1697_v38  ;;  %4168 = vmatprep.mubr.msk.f32.mxu0 %vm1933_vm4, %v1924_v37 }
 0x627   :  { %v1699_v41 = vpop.f32.mrf.mxu0  ;;  %v1884_v42 = vpop.f32.mrf.mxu1 }
 0x628   :  { %v1925_v43 = vmax.f32 %v1883_v40, 0.0 }
 0x629   :  { %v1702_v44 = vpop.f32.mrf.mxu0  ;;  %v1887_v45 = vpop.f32.mrf.mxu1 }
 0x62a   :  { %v1888_v46 = vadd.f32 %v1887_v45, %v1702_v44  ;;  %4169 = vmatmul.mubr.msk.f32.gmra.mxu0 %vm1933_vm4, %v1925_v43 }
 0x62b   :  { %v1704_v47 = vpop.f32.mrf.mxu0  ;;  %v1889_v48 = vpop.f32.mrf.mxu1 }
 0x62c   :  { %v1926_v49 = vmax.f32 %v1888_v46, 0.0 }
 0x62d   :  { %v1707_v50 = vpop.f32.mrf.mxu0  ;;  %v1892_v51 = vpop.f32.mrf.mxu1 }
 0x62e   :  { %v1893_v52 = vadd.f32 %v1892_v51, %v1707_v50  ;;  %4171 = vmatprep.mubr.msk.f32.mxu0 %vm1933_vm4, %v1926_v49 }
 0x62f   :  { %v1709_v53 = vpop.f32.mrf.mxu0  ;;  %v1894_v54 = vpop.f32.mrf.mxu1 }
 0x630   :  { %v1927_v55 = vmax.f32 %v1893_v52, 0.0 }
 0x631   :  { %v1712_v56 = vpop.f32.mrf.mxu0  ;;  %v1897_v57 = vpop.f32.mrf.mxu1 }
 0x632   :  { %v1898_v58 = vadd.f32 %v1897_v57, %v1712_v56  ;;  %4172 = vmatmul.mubr.msk.f32.gmra.mxu0 %vm1933_vm4, %v1927_v55 }
 0x633   :  { %v1714_v59 = vpop.f32.mrf.mxu0  ;;  %v1899_v60 = vpop.f32.mrf.mxu1 }
 0x634   :  { %v1928_v61 = vmax.f32 %v1898_v58, 0.0 }
 0x635   :  { %v1717_v62 = vpop.f32.mrf.mxu0  ;;  %v1902_v63 = vpop.f32.mrf.mxu1 }
 0x636   :  { %v1903_v1 = vadd.f32 %v1902_v63, %v1717_v62  ;;  %4174 = vmatprep.mubr.msk.f32.mxu0 %vm1933_vm4, %v1928_v61 }
 0x637   :  { %v1719_v2 = vpop.f32.mrf.mxu0  ;;  %v1904_v3 = vpop.f32.mrf.mxu1 }
 0x638   :  { %v1929_v4 = vmax.f32 %v1903_v1, 0.0 }
 0x63a   :  { %4175 = vmatmul.mubr.msk.f32.gmra.mxu0 %vm1933_vm4, %v1929_v4 }
 0x6a2   :  { %v5530_v5 = vpop.f32.mrf.mxu0 }
 0x6a4   :  { %v5532_v6 = vpop.f32.mrf.mxu0 }
 0x6aa   :  { %v5534_v7 = vpop.f32.mrf.mxu0 }
 0x6ac   :  { %v5536_v8 = vpop.f32.mrf.mxu0 }
 0x6b2   :  { %v5538_v9 = vpop.f32.mrf.mxu0 }
 0x6b4   :  { %v5540_v10 = vpop.f32.mrf.mxu0 }
 0x6ba   :  { %v5542_v11 = vpop.f32.mrf.mxu0 }
 0x6bc   :  { %v5544_v12 = vpop.f32.mrf.mxu0 }
 0x6c2   :  { %v5546_v13 = vpop.f32.mrf.mxu0 }
 0x6c4   :  { %v5548_v14 = vpop.f32.mrf.mxu0 }
 0x6ca   :  { %v4158_v15 = vpop.f32.mrf.mxu0 }
 0x6cc   :  { %v5550_v16 = vpop.f32.mrf.mxu0 }
 0x6d2   :  { %v4161_v17 = vpop.f32.mrf.mxu0 }
 0x6d4   :  { %v2132_v18 = vpop.f32.mrf.mxu0 }
 0x6da   :  { %v4164_v19 = vpop.f32.mrf.mxu0 }
 0x6db   :  { %2245 = vrot.lane.b32.xlu0 %v4164_v19, %s4473_s4 }
 0x6dc   :  { %v2142_v20 = vpop.f32.mrf.mxu0 }
 0x6dd   :  { %2243 = vrot.lane.b32.xlu1 %v2142_v20, %s4473_s4 }
 0x6df   :  { %2241 = vrot.lane.b32.xlu0 %v4161_v17, %s4473_s4 }
 0x6e1   :  { %2239 = vrot.lane.b32.xlu1 %v2132_v18, %s4473_s4 }
 0x6e2   :  { %v5561_v21 = vpop.f32.mrf.mxu0 }
 0x6e3   :  { %2237 = vrot.lane.b32.xlu0 %v4158_v15, %s4473_s4 }
 0x6e4   :  { %v5567_v22 = vpop.f32.mrf.mxu0 }
 0x6e5   :  { %2235 = vrot.lane.b32.xlu1 %v5550_v16, %s4473_s4 }
 0x6e7   :  { %2233 = vrot.lane.b32.xlu0 %v5546_v13, %s4473_s4 }
 0x6e9   :  { %2231 = vrot.lane.b32.xlu1 %v5548_v14, %s4473_s4 }
 0x6ea   :  { %v5571_v23 = vpop.f32.mrf.mxu0 }
 0x6eb   :  { %2229 = vrot.lane.b32.xlu0 %v5542_v11, %s4473_s4 }
 0x6ec   :  { %v5577_v24 = vpop.f32.mrf.mxu0 }
 0x6ed   :  { %2227 = vrot.lane.b32.xlu1 %v5544_v12, %s4473_s4 }
 0x6ef   :  { %2225 = vrot.lane.b32.xlu0 %v5538_v9, %s4473_s4 }
 0x6f1   :  { %2223 = vrot.lane.b32.xlu1 %v5540_v10, %s4473_s4 }
 0x6f2   :  { %v5581_v25 = vpop.f32.mrf.mxu0 }
 0x6f3   :  { %2221 = vrot.lane.b32.xlu0 %v5534_v7, %s4473_s4 }
 0x6f4   :  { %v5587_v27 = vpop.f32.mrf.mxu0 }
 0x6f5   :  { %2219 = vrot.lane.b32.xlu1 %v5536_v8, %s4473_s4 }
 0x6f7   :  { %2217 = vrot.lane.b32.xlu0 %v5530_v5, %s4473_s4 }
 0x6f9   :  { %2215 = vrot.lane.b32.xlu1 %v5532_v6, %s4473_s4 }
 0x6fa   :  { %v5591_v28 = vpop.f32.mrf.mxu0 }
 0x6fb   :  { %2261 = vrot.lane.b32.xlu0 %v5591_v28, %s4473_s4 }
 0x6fc   :  { %v5595_v29 = vpop.f32.mrf.mxu0 }
 0x6fd   :  { %2259 = vrot.lane.b32.xlu1 %v5595_v29, %s4473_s4 }
 0x6ff   :  { %2257 = vrot.lane.b32.xlu0 %v5581_v25, %s4473_s4 }
 0x701   :  { %2255 = vrot.lane.b32.xlu1 %v5587_v27, %s4473_s4 }
 0x703   :  { %2253 = vrot.lane.b32.xlu0 %v5571_v23, %s4473_s4 }
 0x705   :  { %2251 = vrot.lane.b32.xlu1 %v5577_v24, %s4473_s4 }
 0x707   :  { %2249 = vrot.lane.b32.xlu0 %v5561_v21, %s4473_s4 }
 0x709   :  { %2247 = vrot.lane.b32.xlu1 %v5567_v22, %s4473_s4 }
 0x74d   :  { %v2246_v31 = vpop.permute.xlu0 %2245 }
 0x74e   :  { %v2302_v32 = vmax.f32 %v4164_v19, %v2246_v31  ;;  %v2316_v19 = vld [vmem:[#allocation8 + $0x28] sm:$0xff]  ;;  %v2325_v31 = vld [vmem:[#allocation8 + $0x70] sm:$0xff] }
 0x74f   :  { %v2244_v33 = vpop.permute.xlu1 %2243 }
 0x750   :  { %v2301_v34 = vmax.f32 %v2142_v20, %v2244_v33  ;;  %2432 = vmatpush1.msra.mxu1 %v2302_v32  ;;  %v2315_v20 = vld [vmem:[#allocation8 + $0x20] sm:$0xff]  ;;  %v2328_v32 = vld [vmem:[#allocation8 + $0x88] sm:$0xff] }
 0x751   :  { %2433 = vmatprep.subr.mxu1 %v6263_v0  ;;  %v2242_v35 = vpop.permute.xlu0 %2241  ;;  %v2327_v33 = vld [vmem:[#allocation8 + $0x80] sm:$0xff] }
 0x752   :  { %v2300_v36 = vmax.f32 %v4161_v17, %v2242_v35  ;;  %2434 = vmatpush1.msra.mxu1 %v2301_v34  ;;  %v2314_v17 = vld [vmem:[#allocation8 + $0x18] sm:$0xff]  ;;  %v2329_v35 = vld [vmem:[#allocation8 + $0x90] sm:$0xff] }
 0x753   :  { %2435 = vmatprep.subr.mxu1 %v6263_v0  ;;  %v2240_v37 = vpop.permute.xlu1 %2239  ;;  %v2330_v34 = vld [vmem:[#allocation8 + $0x98] sm:$0xff] }
 0x754   :  { %v2299_v38 = vmax.f32 %v2132_v18, %v2240_v37  ;;  %2436 = vmatpush1.msra.mxu1 %v2300_v36  ;;  %v2313_v18 = vld [vmem:[#allocation8 + $0x10] sm:$0xff]  ;;  %v2332_v36 = vld [vmem:[#allocation8 + $0xa8] sm:$0xff]  ;;  %v2331_v37 = vld [vmem:[#allocation8 + $0xa0] sm:$0xff] }
 0x755   :  { %v2238_v39 = vpop.permute.xlu0 %2237  ;;  %2437 = vmatprep.subr.mxu1 %v6263_v0 }
 0x756   :  { %v2298_v40 = vmax.f32 %v4158_v15, %v2238_v39  ;;  %2438 = vmatpush1.msra.mxu1 %v2299_v38  ;;  %v2334_v38 = vld [vmem:[#allocation8 + $0xb8] sm:$0xff]  ;;  %v2333_v39 = vld [vmem:[#allocation8 + $0xb0] sm:$0xff] }
 0x757   :  { %2439 = vmatprep.subr.mxu1 %v6263_v0  ;;  %v2236_v41 = vpop.permute.xlu1 %2235 }
 0x758   :  { %v2297_v42 = vmax.f32 %v5550_v16, %v2236_v41  ;;  %2440 = vmatpush1.msra.mxu1 %v2298_v40  ;;  %v2311_v16 = vld [vmem:[#allocation8] sm:$0xff]  ;;  %v2336_v40 = vld [vmem:[#allocation8 + $0xc8] sm:$0xff] }
 0x759   :  { %v2234_v43 = vpop.permute.xlu0 %2233  ;;  %2441 = vmatprep.subr.mxu1 %v6263_v0  ;;  %v2335_v41 = vld [vmem:[#allocation8 + $0xc0] sm:$0xff] }
 0x75a   :  { %v2296_v44 = vmax.f32 %v5546_v13, %v2234_v43  ;;  %2442 = vmatpush1.msra.mxu1 %v2297_v42  ;;  %v2338_v42 = vld [vmem:[#allocation8 + $0xd8] sm:$0xff]  ;;  %v2337_v43 = vld [vmem:[#allocation8 + $0xd0] sm:$0xff] }
 0x75b   :  { %2443 = vmatprep.subr.mxu1 %v6263_v0  ;;  %v2232_v45 = vpop.permute.xlu1 %2231 }
 0x75c   :  { %v2295_v46 = vmax.f32 %v5548_v14, %v2232_v45  ;;  %2444 = vmatpush1.msra.mxu1 %v2296_v44  ;;  %v2340_v44 = vld [vmem:[#allocation8 + $0xe8] sm:$0xff]  ;;  %v2339_v45 = vld [vmem:[#allocation8 + $0xe0] sm:$0xff] }
 0x75d   :  { %v2230_v47 = vpop.permute.xlu0 %2229  ;;  %2445 = vmatprep.subr.mxu1 %v6263_v0 }
 0x75e   :  { %v2294_v48 = vmax.f32 %v5542_v11, %v2230_v47  ;;  %2446 = vmatpush1.msra.mxu1 %v2295_v46  ;;  %v2342_v46 = vld [vmem:[#allocation8 + $0xf8] sm:$0xff]  ;;  %v2341_v47 = vld [vmem:[#allocation8 + $0xf0] sm:$0xff] }
 0x75f   :  { %2447 = vmatprep.subr.mxu1 %v6263_v0  ;;  %v2228_v49 = vpop.permute.xlu1 %2227 }
 0x760   :  { %v2293_v50 = vmax.f32 %v5544_v12, %v2228_v49  ;;  %2448 = vmatpush1.msra.mxu1 %v2294_v48  ;;  %v2344_v48 = vld [vmem:[#allocation8 + $0x108] sm:$0xff]  ;;  %v2343_v49 = vld [vmem:[#allocation8 + $0x100] sm:$0xff] }
 0x761   :  { %v2226_v51 = vpop.permute.xlu0 %2225  ;;  %2449 = vmatprep.subr.mxu1 %v6263_v0 }
 0x762   :  { %v2292_v52 = vmax.f32 %v5538_v9, %v2226_v51  ;;  %2450 = vmatpush1.msra.mxu1 %v2293_v50  ;;  %v2346_v50 = vld [vmem:[#allocation8 + $0x118] sm:$0xff]  ;;  %v2345_v51 = vld [vmem:[#allocation8 + $0x110] sm:$0xff] }
 0x763   :  { %2451 = vmatprep.subr.mxu1 %v6263_v0  ;;  %v2224_v53 = vpop.permute.xlu1 %2223 }
 0x764   :  { %v2291_v54 = vmax.f32 %v5540_v10, %v2224_v53  ;;  %2452 = vmatpush1.msra.mxu1 %v2292_v52  ;;  %v2348_v52 = vld [vmem:[#allocation8 + $0x128] sm:$0xff]  ;;  %v2347_v53 = vld [vmem:[#allocation8 + $0x120] sm:$0xff] }
 0x765   :  { %v2222_v55 = vpop.permute.xlu0 %2221  ;;  %2453 = vmatprep.subr.mxu1 %v6263_v0 }
 0x766   :  { %v2290_v56 = vmax.f32 %v5534_v7, %v2222_v55  ;;  %2454 = vmatpush1.msra.mxu1 %v2291_v54  ;;  %v2350_v54 = vld [vmem:[#allocation8 + $0x138] sm:$0xff]  ;;  %v2349_v55 = vld [vmem:[#allocation8 + $0x130] sm:$0xff] }
 0x767   :  { %2455 = vmatprep.subr.mxu1 %v6263_v0  ;;  %v2220_v57 = vpop.permute.xlu1 %2219 }
 0x768   :  { %v2289_v58 = vmax.f32 %v5536_v8, %v2220_v57  ;;  %2456 = vmatpush1.msra.mxu1 %v2290_v56  ;;  %v2352_v56 = vld [vmem:[#allocation8 + $0x148] sm:$0xff]  ;;  %v2351_v57 = vld [vmem:[#allocation8 + $0x140] sm:$0xff] }
 0x769   :  { %v2218_v59 = vpop.permute.xlu0 %2217  ;;  %2457 = vmatprep.subr.mxu1 %v6263_v0 }
 0x76a   :  { %v2288_v60 = vmax.f32 %v5530_v5, %v2218_v59  ;;  %2458 = vmatpush1.msra.mxu1 %v2289_v58  ;;  %v2354_v58 = vld [vmem:[#allocation8 + $0x158] sm:$0xff]  ;;  %v2353_v59 = vld [vmem:[#allocation8 + $0x150] sm:$0xff] }
 0x76b   :  { %2459 = vmatprep.subr.mxu1 %v6263_v0  ;;  %v2216_v61 = vpop.permute.xlu1 %2215 }
 0x76c   :  { %v2287_v62 = vmax.f32 %v5532_v6, %v2216_v61  ;;  %2460 = vmatpush1.msra.mxu1 %v2288_v60  ;;  %v2356_v60 = vld [vmem:[#allocation8 + $0x168] sm:$0xff]  ;;  %v2355_v61 = vld [vmem:[#allocation8 + $0x160] sm:$0xff] }
 0x76d   :  { %2461 = vmatprep.subr.mxu1 %v6263_v0  ;;  %v2262_v63 = vpop.permute.xlu0 %2261 }
 0x76e   :  { %v2310_v1 = vmax.f32 %v5591_v28, %v2262_v63  ;;  %2462 = vmatpush1.msra.mxu1 %v2287_v62  ;;  %v2324_v28 = vld [vmem:[#allocation8 + $0x68] sm:$0xff]  ;;  %v2358_v62 = vld [vmem:[#allocation8 + $0x178] sm:$0xff]  ;;  %v2357_v63 = vld [vmem:[#allocation8 + $0x170] sm:$0xff] }
 0x76f   :  { %2479 = vmatprep.subr.mxu1 %v6263_v0  ;;  %v2260_v2 = vpop.permute.xlu1 %2259 }
 0x770   :  { %v2309_v3 = vmax.f32 %v5595_v29, %v2260_v2  ;;  %2480 = vmatpush2.msra.mxu1 %v2310_v1  ;;  %v2323_v29 = vld [vmem:[#allocation8 + $0x60] sm:$0xff] }
 0x771   :  { %2481 = vmatprep.subr.mxu1 %v6263_v0  ;;  %v2258_v4 = vpop.permute.xlu0 %2257 }
 0x772   :  { %v2308_v5 = vmax.f32 %v5581_v25, %v2258_v4  ;;  %2482 = vmatpush2.msra.mxu1 %v2309_v3  ;;  %v2322_v25 = vld [vmem:[#allocation8 + $0x58] sm:$0xff] }
 0x773   :  { %2483 = vmatprep.subr.mxu1 %v6263_v0  ;;  %v2256_v6 = vpop.permute.xlu1 %2255 }
 0x774   :  { %v2307_v7 = vmax.f32 %v5587_v27, %v2256_v6  ;;  %2484 = vmatpush2.msra.mxu1 %v2308_v5  ;;  %v2321_v27 = vld [vmem:[#allocation8 + $0x50] sm:$0xff] }
 0x775   :  { %v2254_v8 = vpop.permute.xlu0 %2253  ;;  %2485 = vmatprep.subr.mxu1 %v6263_v0 }
 0x776   :  { %v2306_v9 = vmax.f32 %v5571_v23, %v2254_v8  ;;  %2486 = vmatpush2.msra.mxu1 %v2307_v7  ;;  %v2320_v23 = vld [vmem:[#allocation8 + $0x48] sm:$0xff] }
 0x777   :  { %2487 = vmatprep.subr.mxu1 %v6263_v0  ;;  %v2252_v10 = vpop.permute.xlu1 %2251 }
 0x778   :  { %v2305_v11 = vmax.f32 %v5577_v24, %v2252_v10  ;;  %2488 = vmatpush2.msra.mxu1 %v2306_v9  ;;  %v2319_v24 = vld [vmem:[#allocation8 + $0x40] sm:$0xff] }
 0x779   :  { %v2250_v12 = vpop.permute.xlu0 %2249  ;;  %2489 = vmatprep.subr.mxu1 %v6263_v0 }
 0x77a   :  { %v2304_v13 = vmax.f32 %v5561_v21, %v2250_v12  ;;  %2490 = vmatpush2.msra.mxu1 %v2305_v11  ;;  %v2318_v21 = vld [vmem:[#allocation8 + $0x38] sm:$0xff] }
 0x77b   :  { %2491 = vmatprep.subr.mxu1 %v6263_v0  ;;  %v2248_v14 = vpop.permute.xlu1 %2247 }
 0x77c   :  { %v2303_v15 = vmax.f32 %v5567_v22, %v2248_v14  ;;  %2492 = vmatpush2.msra.mxu1 %v2304_v13  ;;  %v2317_v22 = vld [vmem:[#allocation8 + $0x30] sm:$0xff] }
 0x77d   :  { %2493 = vmatprep.subr.mxu1 %v6263_v0 }
 0x77e   :  { %2494 = vmatpush2.msra.mxu1 %v2303_v15 }
 0x77f   :  { %2496 = vmatmul.mubr.f32.vlgmr.msra.gmra.mxu1 %v2311_v16 }
 0x780   :  { %3759 = vmatprep.mubr.msk.f32.mxu1 %vm516_vm2, %v2314_v17 }
 0x783   :  { %2501 = vmatmul.mubr.f32.gmra.mxu1 %v2313_v18 }
 0x784   :  { %3760 = vmatprep.mubr.msk.f32.mxu1 %vm516_vm2, %v2316_v19 }
 0x787   :  { %2506 = vmatmul.mubr.f32.gmra.mxu1 %v2315_v20 }
 0x788   :  { %3761 = vmatprep.mubr.msk.f32.mxu1 %vm516_vm2, %v2318_v21 }
 0x78b   :  { %2511 = vmatmul.mubr.f32.gmra.mxu1 %v2317_v22 }
 0x78c   :  { %3762 = vmatprep.mubr.msk.f32.mxu1 %vm516_vm2, %v2320_v23 }
 0x78f   :  { %2516 = vmatmul.mubr.f32.gmra.mxu1 %v2319_v24 }
 0x790   :  { %3763 = vmatprep.mubr.msk.f32.mxu1 %vm516_vm2, %v2322_v25 }
 0x793   :  { %2521 = vmatmul.mubr.f32.gmra.mxu1 %v2321_v27 }
 0x794   :  { %3764 = vmatprep.mubr.msk.f32.mxu1 %vm516_vm2, %v2324_v28 }
 0x797   :  { %2526 = vmatmul.mubr.f32.gmra.mxu1 %v2323_v29 }
 0x798   :  { %3765 = vmatprep.mubr.msk.f32.mxu1 %vm516_vm2, %v2326_v30 }
 0x79b   :  { %2531 = vmatmul.mubr.f32.gmra.mxu1 %v2325_v31 }
 0x79c   :  { %3766 = vmatprep.mubr.msk.f32.mxu1 %vm516_vm2, %v2328_v32 }
 0x79f   :  { %2536 = vmatmul.mubr.f32.gmra.mxu1 %v2327_v33 }
 0x7a0   :  { %3767 = vmatprep.mubr.msk.f32.mxu1 %vm516_vm2, %v2330_v34 }
 0x7a3   :  { %2541 = vmatmul.mubr.f32.gmra.mxu1 %v2329_v35 }
 0x7a4   :  { %3768 = vmatprep.mubr.msk.f32.mxu1 %vm516_vm2, %v2332_v36 }
 0x7a7   :  { %2546 = vmatmul.mubr.f32.gmra.mxu1 %v2331_v37 }
 0x7a8   :  { %3769 = vmatprep.mubr.msk.f32.mxu1 %vm516_vm2, %v2334_v38 }
 0x7ab   :  { %2551 = vmatmul.mubr.f32.gmra.mxu1 %v2333_v39 }
 0x7ac   :  { %3770 = vmatprep.mubr.msk.f32.mxu1 %vm516_vm2, %v2336_v40 }
 0x7af   :  { %2556 = vmatmul.mubr.f32.gmra.mxu1 %v2335_v41 }
 0x7b0   :  { %3771 = vmatprep.mubr.msk.f32.mxu1 %vm516_vm2, %v2338_v42 }
 0x7b3   :  { %2561 = vmatmul.mubr.f32.gmra.mxu1 %v2337_v43 }
 0x7b4   :  { %3772 = vmatprep.mubr.msk.f32.mxu1 %vm516_vm2, %v2340_v44 }
 0x7b7   :  { %2566 = vmatmul.mubr.f32.gmra.mxu1 %v2339_v45 }
 0x7b8   :  { %3773 = vmatprep.mubr.msk.f32.mxu1 %vm516_vm2, %v2342_v46 }
 0x7bb   :  { %2571 = vmatmul.mubr.f32.gmra.mxu1 %v2341_v47 }
 0x7bc   :  { %3774 = vmatprep.mubr.msk.f32.mxu1 %vm516_vm2, %v2344_v48 }
 0x7bf   :  { %2576 = vmatmul.mubr.f32.gmra.mxu1 %v2343_v49 }
 0x7c0   :  { %3775 = vmatprep.mubr.msk.f32.mxu1 %vm516_vm2, %v2346_v50 }
 0x7c3   :  { %2581 = vmatmul.mubr.f32.gmra.mxu1 %v2345_v51 }
 0x7c4   :  { %3776 = vmatprep.mubr.msk.f32.mxu1 %vm516_vm2, %v2348_v52 }
 0x7c7   :  { %2586 = vmatmul.mubr.f32.gmra.mxu1 %v2347_v53 }
 0x7c8   :  { %3777 = vmatprep.mubr.msk.f32.mxu1 %vm516_vm2, %v2350_v54 }
 0x7cb   :  { %2591 = vmatmul.mubr.f32.gmra.mxu1 %v2349_v55 }
 0x7cc   :  { %3778 = vmatprep.mubr.msk.f32.mxu1 %vm516_vm2, %v2352_v56 }
 0x7cf   :  { %2596 = vmatmul.mubr.f32.gmra.mxu1 %v2351_v57 }
 0x7d0   :  { %3779 = vmatprep.mubr.msk.f32.mxu1 %vm516_vm2, %v2354_v58 }
 0x7d3   :  { %2601 = vmatmul.mubr.f32.gmra.mxu1 %v2353_v59 }
 0x7d4   :  { %3780 = vmatprep.mubr.msk.f32.mxu1 %vm516_vm2, %v2356_v60 }
 0x7d7   :  { %2606 = vmatmul.mubr.f32.gmra.mxu1 %v2355_v61 }
 0x7d8   :  { %3781 = vmatprep.mubr.msk.f32.mxu1 %vm516_vm2, %v2358_v62  ;;  %v2821_v62 = vld [vmem:[%s6259_s7 + $0x8] sm:$0xff] }
 0x7d9   :  { %3013 = vmatprep.mubr.f32.mxu0 %v2821_v62 }
 0x7db   :  { %2611 = vmatmul.mubr.f32.gmra.mxu1 %v2357_v63  ;;  %v2823_v63 = vld [vmem:[%s6259_s7 + $0x18] sm:$0xff] }
 0x7dc   :  { %3158 = vmatprep.mubr.f32.mxu1 %v2823_v63  ;;  %v2850_v63 = vld [vmem:[%s6259_s7 + $0xf0] sm:$0xff] }
 0x83f   :  { %v2497_v1 = vpop.f32.mrf.mxu1 }
 0x841   :  { %v2499_v2 = vpop.f32.mrf.mxu1 }
 0x843   :  { %v2502_v3 = vpop.f32.mrf.mxu1 }
 0x845   :  { %v2504_v4 = vpop.f32.mrf.mxu1 }
 0x847   :  { %v2507_v5 = vpop.f32.mrf.mxu1 }
 0x849   :  { %v2509_v6 = vpop.f32.mrf.mxu1 }
 0x84b   :  { %v2512_v7 = vpop.f32.mrf.mxu1 }
 0x84d   :  { %v2514_v8 = vpop.f32.mrf.mxu1 }
 0x84f   :  { %v2517_v9 = vpop.f32.mrf.mxu1 }
 0x851   :  { %v2519_v10 = vpop.f32.mrf.mxu1 }
 0x853   :  { %v2522_v11 = vpop.f32.mrf.mxu1 }
 0x855   :  { %v2524_v12 = vpop.f32.mrf.mxu1 }
 0x857   :  { %v2527_v13 = vpop.f32.mrf.mxu1 }
 0x859   :  { %v2529_v14 = vpop.f32.mrf.mxu1 }
 0x85b   :  { %v2532_v15 = vpop.f32.mrf.mxu1 }
 0x85d   :  { %v2534_v16 = vpop.f32.mrf.mxu1 }
 0x85f   :  { %v5677_v17 = vpop.f32.mrf.mxu1 }
 0x861   :  { %v2539_v18 = vpop.f32.mrf.mxu1 }
 0x863   :  { %v2542_v19 = vpop.f32.mrf.mxu1 }
 0x865   :  { %v2544_v20 = vpop.f32.mrf.mxu1 }
 0x867   :  { %v5679_v21 = vpop.f32.mrf.mxu1 }
 0x869   :  { %v2549_v22 = vpop.f32.mrf.mxu1 }
 0x86b   :  { %v5681_v23 = vpop.f32.mrf.mxu1 }
 0x86d   :  { %v2554_v24 = vpop.f32.mrf.mxu1 }
 0x86f   :  { %v2557_v25 = vpop.f32.mrf.mxu1 }
 0x870   :  { %v5683_v27 = vmax.f32 %v2497_v1, %v2557_v25 }
 0x871   :  { %v2559_v28 = vpop.f32.mrf.mxu1 }
 0x872   :  { %2784 = vrot.lane.b32.xlu0 %v5683_v27, %s4474_s13  ;;  %2640 = vrot.lane.b32.xlu1 %v5683_v27, %s4469_s8 }
 0x873   :  { %v2562_v29 = vpop.f32.mrf.mxu1 }
 0x874   :  { %v5689_v30 = vmax.f32 %v2502_v3, %v2562_v29 }
 0x875   :  { %v2564_v31 = vpop.f32.mrf.mxu1 }
 0x876   :  { %2676 = vrot.lane.b32.xlu1 %v5683_v27, %s4468_s19  ;;  %2678 = vrot.lane.b32.xlu0 %v5689_v30, %s4468_s19 }
 0x877   :  { %v2567_v32 = vpop.f32.mrf.mxu1 }
 0x878   :  { %v5699_v35 = vmax.f32 %v2507_v5, %v2567_v32 }
 0x879   :  { %v2569_v33 = vpop.f32.mrf.mxu1 }
 0x87a   :  { %2786 = vrot.lane.b32.xlu0 %v5689_v30, %s4474_s13  ;;  %2642 = vrot.lane.b32.xlu1 %v5689_v30, %s4469_s8 }
 0x87b   :  { %v2572_v34 = vpop.f32.mrf.mxu1 }
 0x87c   :  { %v5701_v36 = vmax.f32 %v2512_v7, %v2572_v34 }
 0x87d   :  { %v2574_v37 = vpop.f32.mrf.mxu1 }
 0x87e   :  { %2644 = vrot.lane.b32.xlu1 %v5699_v35, %s4469_s8  ;;  %2682 = vrot.lane.b32.xlu0 %v5701_v36, %s4468_s19 }
 0x87f   :  { %v2577_v38 = vpop.f32.mrf.mxu1 }
 0x880   :  { %v5711_v41 = vmax.f32 %v2517_v9, %v2577_v38 }
 0x881   :  { %v2579_v39 = vpop.f32.mrf.mxu1 }
 0x882   :  { %2680 = vrot.lane.b32.xlu1 %v5699_v35, %s4468_s19  ;;  %2790 = vrot.lane.b32.xlu0 %v5701_v36, %s4474_s13 }
 0x883   :  { %v2582_v40 = vpop.f32.mrf.mxu1 }
 0x884   :  { %v5717_v44 = vmax.f32 %v2522_v11, %v2582_v40 }
 0x885   :  { %v2584_v42 = vpop.f32.mrf.mxu1 }
 0x886   :  { %2788 = vrot.lane.b32.xlu1 %v5699_v35, %s4474_s13  ;;  %2684 = vrot.lane.b32.xlu0 %v5711_v41, %s4468_s19 }
 0x887   :  { %v2587_v43 = vpop.f32.mrf.mxu1 }
 0x888   :  { %v5727_v49 = vmax.f32 %v2527_v13, %v2587_v43 }
 0x889   :  { %v2589_v45 = vpop.f32.mrf.mxu1 }
 0x88a   :  { %2646 = vrot.lane.b32.xlu1 %v5701_v36, %s4469_s8  ;;  %2686 = vrot.lane.b32.xlu0 %v5717_v44, %s4468_s19 }
 0x88b   :  { %v2592_v46 = vpop.f32.mrf.mxu1 }
 0x88c   :  { %v5733_v52 = vmax.f32 %v2532_v15, %v2592_v46 }
 0x88d   :  { %v2594_v47 = vpop.f32.mrf.mxu1 }
 0x88e   :  { %2648 = vrot.lane.b32.xlu1 %v5711_v41, %s4469_s8  ;;  %2650 = vrot.lane.b32.xlu0 %v5717_v44, %s4469_s8 }
 0x88f   :  { %v2597_v48 = vpop.f32.mrf.mxu1 }
 0x890   :  { %v5750_v59 = vmax.f32 %v5677_v17, %v2597_v48  ;;  %v2830_v48 = vld [vmem:[%s6259_s7 + $0x50] sm:$0xff] }
 0x891   :  { %v2599_v50 = vpop.f32.mrf.mxu1 }
 0x892   :  { %2722 = vrot.lane.b32.xlu1 %v5717_v44, %s4467_s5  ;;  %2688 = vrot.lane.b32.xlu0 %v5727_v49, %s4468_s19 }
 0x893   :  { %v2602_v51 = vpop.f32.mrf.mxu1 }
 0x894   :  { %v5743_v57 = vmax.f32 %v2542_v19, %v2602_v51 }
 0x895   :  { %v2604_v53 = vpop.f32.mrf.mxu1 }
 0x896   :  { %2652 = vrot.lane.b32.xlu1 %v5727_v49, %s4469_s8  ;;  %2690 = vrot.lane.b32.xlu0 %v5733_v52, %s4468_s19 }
 0x897   :  { %v2607_v54 = vpop.f32.mrf.mxu1 }
 0x898   :  { %v5757_v60 = vmax.f32 %v5679_v21, %v2607_v54 }
 0x899   :  { %v2609_v55 = vpop.f32.mrf.mxu1 }
 0x89a   :  { %2724 = vrot.lane.b32.xlu1 %v5727_v49, %s4467_s5  ;;  %2654 = vrot.lane.b32.xlu0 %v5733_v52, %s4469_s8  ;;  %v2840_v55 = vld [vmem:[%s6259_s7 + $0xa0] sm:$0xff] }
 0x89b   :  { %v2612_v56 = vpop.f32.mrf.mxu1 }
 0x89c   :  { %v5768_v61 = vmax.f32 %v5681_v23, %v2612_v56  ;;  %v2846_v56 = vld [vmem:[%s6259_s7 + $0xd0] sm:$0xff] }
 0x89d   :  { %v2614_v58 = vpop.f32.mrf.mxu1 }
 0x89e   :  { %2726 = vrot.lane.b32.xlu1 %v5733_v52, %s4467_s5  ;;  %2658 = vrot.lane.b32.xlu0 %v5743_v57, %s4469_s8 }
 0x8a2   :  { %2656 = vrot.lane.b32.xlu1 %v5750_v59, %s4469_s8  ;;  %2766 = vrot.lane.b32.xlu0 %v5743_v57, %s4470_s20 }
 0x8a6   :  { %2728 = vrot.lane.b32.xlu1 %v5750_v59, %s4467_s5  ;;  %2732 = vrot.lane.b32.xlu0 %v5757_v60, %s4467_s5 }
 0x8aa   :  { %2730 = vrot.lane.b32.xlu1 %v5743_v57, %s4467_s5  ;;  %2768 = vrot.lane.b32.xlu0 %v5757_v60, %s4470_s20 }
 0x8ae   :  { %2660 = vrot.lane.b32.xlu1 %v5757_v60, %s4469_s8  ;;  %2662 = vrot.lane.b32.xlu0 %v5768_v61, %s4469_s8 }
 0x8b2   :  { %2720 = vrot.lane.b32.xlu1 %v5711_v41, %s4467_s5  ;;  %2764 = vrot.lane.b32.xlu0 %v5750_v59, %s4470_s20 }
 0x8b6   :  { %2734 = vrot.lane.b32.xlu1 %v5768_v61, %s4467_s5  ;;  %2762 = vrot.lane.b32.xlu0 %v5733_v52, %s4470_s20 }
 0x8ba   :  { %2718 = vrot.lane.b32.xlu1 %v5701_v36, %s4467_s5  ;;  %2760 = vrot.lane.b32.xlu0 %v5727_v49, %s4470_s20 }
 0x8be   :  { %2716 = vrot.lane.b32.xlu1 %v5699_v35, %s4467_s5  ;;  %2770 = vrot.lane.b32.xlu0 %v5768_v61, %s4470_s20 }
 0x8c2   :  { %2714 = vrot.lane.b32.xlu1 %v5689_v30, %s4467_s5  ;;  %2758 = vrot.lane.b32.xlu0 %v5717_v44, %s4470_s20 }
 0x8c6   :  { %2712 = vrot.lane.b32.xlu1 %v5683_v27, %s4467_s5  ;;  %2756 = vrot.lane.b32.xlu0 %v5711_v41, %s4470_s20 }
 0x8ca   :  { %2696 = vrot.lane.b32.xlu1 %v5757_v60, %s4468_s19  ;;  %2754 = vrot.lane.b32.xlu0 %v5701_v36, %s4470_s20 }
 0x8ce   :  { %2698 = vrot.lane.b32.xlu1 %v5768_v61, %s4468_s19  ;;  %2752 = vrot.lane.b32.xlu0 %v5699_v35, %s4470_s20 }
 0x8d2   :  { %2694 = vrot.lane.b32.xlu1 %v5743_v57, %s4468_s19  ;;  %2750 = vrot.lane.b32.xlu0 %v5689_v30, %s4470_s20 }
 0x8d6   :  { %2692 = vrot.lane.b32.xlu1 %v5750_v59, %s4468_s19  ;;  %2748 = vrot.lane.b32.xlu0 %v5683_v27, %s4470_s20 }
 0x8da   :  { %2804 = vrot.lane.b32.xlu1 %v5757_v60, %s4474_s13  ;;  %2806 = vrot.lane.b32.xlu0 %v5768_v61, %s4474_s13 }
 0x8de   :  { %2800 = vrot.lane.b32.xlu1 %v5750_v59, %s4474_s13  ;;  %2802 = vrot.lane.b32.xlu0 %v5743_v57, %s4474_s13 }
 0x8e2   :  { %2796 = vrot.lane.b32.xlu1 %v5727_v49, %s4474_s13  ;;  %2798 = vrot.lane.b32.xlu0 %v5733_v52, %s4474_s13 }
 0x8e4   :  { %v5832_v1 = vpop.permute.xlu0 %2784  ;;  %v2641_v2 = vpop.permute.xlu1 %2640 }
 0x8e6   :  { %2792 = vrot.lane.b32.xlu1 %v5711_v41, %s4474_s13  ;;  %2794 = vrot.lane.b32.xlu0 %v5717_v44, %s4474_s13 }
 0x8e8   :  { %v2677_v3 = vpop.permute.xlu1 %2676  ;;  %v2679_v4 = vpop.permute.xlu0 %2678 }
 0x8ec   :  { %v2787_v5 = vpop.permute.xlu0 %2786  ;;  %v2643_v6 = vpop.permute.xlu1 %2642 }
 0x8f0   :  { %v2645_v7 = vpop.permute.xlu1 %2644  ;;  %v2683_v8 = vpop.permute.xlu0 %2682 }
 0x8f4   :  { %v2681_v9 = vpop.permute.xlu1 %2680  ;;  %v2791_v10 = vpop.permute.xlu0 %2790 }
 0x8f5   :  { %3939 = vmatprep.subr.mxu1 %v2791_v10  ;;  %v2827_v10 = vld [vmem:[%s6259_s7 + $0x38] sm:$0xff] }
 0x8f8   :  { %v2789_v11 = vpop.permute.xlu1 %2788  ;;  %v2685_v12 = vpop.permute.xlu0 %2684 }
 0x8fc   :  { %v2647_v13 = vpop.permute.xlu1 %2646  ;;  %v2687_v14 = vpop.permute.xlu0 %2686 }
 0x900   :  { %v2649_v15 = vpop.permute.xlu1 %2648  ;;  %v2651_v16 = vpop.permute.xlu0 %2650 }
 0x904   :  { %v5838_v17 = vpop.permute.xlu1 %2722  ;;  %v2689_v18 = vpop.permute.xlu0 %2688 }
 0x908   :  { %v2653_v19 = vpop.permute.xlu1 %2652  ;;  %v2691_v20 = vpop.permute.xlu0 %2690 }
 0x909   :  { %3859 = vmatprep.subr.mxu0 %v2691_v20 }
 0x90a   :  { %3860 = vmatpush3.msra.mxu0 %v2647_v13  ;;  %v2866_v13 = vld [vmem:[%s6259_s7 + $0x170] sm:$0xff] }
 0x90b   :  { %3861 = vmatprep.subr.mxu0 %v2689_v18  ;;  %v2865_v18 = vld [vmem:[%s6259_s7 + $0x168] sm:$0xff] }
 0x90c   :  { %v5840_v21 = vpop.permute.xlu1 %2724  ;;  %3862 = vmatpush3.msra.mxu0 %v2645_v7  ;;  %v2655_v22 = vpop.permute.xlu0 %2654  ;;  %v2861_v7 = vld [vmem:[%s6259_s7 + $0x148] sm:$0xff] }
 0x90d   :  { %3863 = vmatprep.subr.mxu0 %v2687_v14 }
 0x90e   :  { %3864 = vmatpush3.msra.mxu0 %v2643_v6  ;;  %v2855_v6 = vld [vmem:[%s6259_s7 + $0x118] sm:$0xff] }
 0x90f   :  { %3865 = vmatprep.subr.mxu0 %v2685_v12  ;;  %v2860_v12 = vld [vmem:[%s6259_s7 + $0x140] sm:$0xff] }
 0x910   :  { %v2727_v23 = vpop.permute.xlu1 %2726  ;;  %3866 = vmatpush3.msra.mxu0 %v2641_v2  ;;  %v2659_v24 = vpop.permute.xlu0 %2658 }
 0x911   :  { %3867 = vmatprep.subr.mxu0 %v2683_v8 }
 0x912   :  { %3868 = vmatpush3.msra.mxu0 %v5768_v61 }
 0x913   :  { %3869 = vmatprep.subr.mxu0 %v2681_v9 }
 0x914   :  { %v2657_v25 = vpop.permute.xlu1 %2656  ;;  %v2767_v28 = vpop.permute.xlu0 %2766  ;;  %3870 = vmatpush3.msra.mxu0 %v5757_v60  ;;  %v2851_v60 = vld [vmem:[%s6259_s7 + $0xf8] sm:$0xff] }
 0x915   :  { %3871 = vmatprep.subr.mxu0 %v2679_v4  ;;  %v2822_v4 = vld [vmem:[%s6259_s7 + $0x10] sm:$0xff] }
 0x916   :  { %3872 = vmatpush3.msra.mxu0 %v5743_v57 }
 0x917   :  { %3873 = vmatprep.subr.mxu0 %v2677_v3 }
 0x918   :  { %v2729_v29 = vpop.permute.xlu1 %2728  ;;  %v2733_v31 = vpop.permute.xlu0 %2732  ;;  %3874 = vmatpush3.msra.mxu0 %v5750_v59  ;;  %v2845_v59 = vld [vmem:[%s6259_s7 + $0xc8] sm:$0xff] }
 0x91c   :  { %v2731_v32 = vpop.permute.xlu1 %2730  ;;  %v2769_v33 = vpop.permute.xlu0 %2768 }
 0x920   :  { %v2661_v34 = vpop.permute.xlu1 %2660  ;;  %v2663_v37 = vpop.permute.xlu0 %2662 }
 0x921   :  { %3875 = vmatprep.subr.mxu0 %v2663_v37  ;;  %v2847_v37 = vld [vmem:[%s6259_s7 + $0xd8] sm:$0xff] }
 0x922   :  { %3876 = vmatpush3.msra.mxu0 %v5733_v52  ;;  %v2841_v52 = vld [vmem:[%s6259_s7 + $0xa8] sm:$0xff] }
 0x923   :  { %3877 = vmatprep.subr.mxu0 %v2661_v34  ;;  %v2881_v34 = vld [vmem:[%s6259_s7 + $0x1e8] sm:$0xff] }
 0x924   :  { %v2721_v38 = vpop.permute.xlu1 %2720  ;;  %v2765_v39 = vpop.permute.xlu0 %2764  ;;  %3878 = vmatpush3.msra.mxu0 %v5727_v49  ;;  %v2836_v49 = vld [vmem:[%s6259_s7 + $0x80] sm:$0xff] }
 0x925   :  { %3879 = vmatprep.subr.mxu0 %v2659_v24  ;;  %v2870_v24 = vld [vmem:[%s6259_s7 + $0x190] sm:$0xff] }
 0x926   :  { %3880 = vmatpush3.msra.mxu0 %v5717_v44 }
 0x927   :  { %3881 = vmatprep.subr.mxu0 %v2657_v25  ;;  %v2876_v25 = vld [vmem:[%s6259_s7 + $0x1c0] sm:$0xff] }
 0x928   :  { %v2735_v40 = vpop.permute.xlu1 %2734  ;;  %v2763_v42 = vpop.permute.xlu0 %2762  ;;  %3882 = vmatpush3.msra.mxu0 %v5711_v41  ;;  %v2820_v41 = vld [vmem:[%s6259_s7] sm:$0xff] }
 0x929   :  { %3883 = vmatprep.subr.mxu0 %v2655_v22  ;;  %3940 = vmatpush3.msra.mxu1 %v2735_v40  ;;  %v2837_v22 = vld [vmem:[%s6259_s7 + $0x88] sm:$0xff]  ;;  %v2886_v40 = vld [vmem:[%s6259_s7 + $0x210] sm:$0xff] }
 0x92a   :  { %3884 = vmatpush3.msra.mxu0 %v5701_v36  ;;  %3941 = vmatprep.subr.mxu1 %v2789_v11  ;;  %v2826_v36 = vld [vmem:[%s6259_s7 + $0x30] sm:$0xff]  ;;  %v2833_v11 = vld [vmem:[%s6259_s7 + $0x68] sm:$0xff] }
 0x92b   :  { %3885 = vmatprep.subr.mxu0 %v2653_v19  ;;  %3942 = vmatpush3.msra.mxu1 %v2733_v31  ;;  %v2871_v19 = vld [vmem:[%s6259_s7 + $0x198] sm:$0xff]  ;;  %v2848_v31 = vld [vmem:[%s6259_s7 + $0xe0] sm:$0xff] }
 0x92c   :  { %3943 = vmatprep.subr.mxu1 %v2787_v5  ;;  %v2719_v43 = vpop.permute.xlu1 %2718  ;;  %v2761_v45 = vpop.permute.xlu0 %2760  ;;  %3886 = vmatpush3.msra.mxu0 %v5699_v35  ;;  %v2831_v35 = vld [vmem:[%s6259_s7 + $0x58] sm:$0xff]  ;;  %v2828_v5 = vld [vmem:[%s6259_s7 + $0x40] sm:$0xff] }
 0x92d   :  { %3887 = vmatprep.subr.mxu0 %v2651_v16  ;;  %3944 = vmatpush3.msra.mxu1 %v2731_v32  ;;  %v2832_v16 = vld [vmem:[%s6259_s7 + $0x60] sm:$0xff] }
 0x92e   :  { %3888 = vmatpush3.msra.mxu0 %v5689_v30  ;;  %3945 = vmatprep.subr.mxu1 %v5832_v1  ;;  %v2825_v30 = vld [vmem:[%s6259_s7 + $0x28] sm:$0xff]  ;;  %v2856_v1 = vld [vmem:[%s6259_s7 + $0x120] sm:$0xff] }
 0x92f   :  { %3889 = vmatprep.subr.mxu0 %v2649_v15  ;;  %3946 = vmatpush3.msra.mxu1 %v2729_v29  ;;  %v2842_v29 = vld [vmem:[%s6259_s7 + $0xb0] sm:$0xff] }
 0x930   :  { %v2717_v44 = vpop.permute.xlu1 %2716  ;;  %v2771_v46 = vpop.permute.xlu0 %2770  ;;  %3890 = vmatpush3.msra.mxu0 %v5683_v27 }
 0x931   :  { %3014 = vmatmul.mubr.f32.vlgmr.msra.gmra.mxu0 %v2820_v41  ;;  %3947 = vmatprep.subr.mxu1 %v2771_v46  ;;  %v2891_v41 = vld [vmem:[%s6259_s7 + $0x238] sm:$0xff]  ;;  %v2890_v46 = vld [vmem:[%s6259_s7 + $0x230] sm:$0xff] }
 0x932   :  { %3948 = vmatpush3.msra.mxu1 %v2727_v23  ;;  %3018 = vmatprep.mubr.f32.mxu0 %v2826_v36  ;;  %v2843_v23 = vld [vmem:[%s6259_s7 + $0xb8] sm:$0xff]  ;;  %v2857_v36 = vld [vmem:[%s6259_s7 + $0x128] sm:$0xff] }
 0x933   :  { %3949 = vmatprep.subr.mxu1 %v2769_v33  ;;  %4177 = vmatprep.subr.msk.mxu0 %vm295_vm1, %v4471_v26  ;;  %v2875_v33 = vld [vmem:[%s6259_s7 + $0x1b8] sm:$0xff] }
 0x934   :  { %v2715_v47 = vpop.permute.xlu1 %2714  ;;  %3950 = vmatpush3.msra.mxu1 %v5840_v21  ;;  %v2759_v27 = vpop.permute.xlu0 %2758  ;;  %4178 = vmatpush3.msk.msra.mxu0 %vm295_vm1, %v4471_v26  ;;  %v2835_v26 = vld [vmem:[%s6259_s7 + $0x78] sm:$0xff] }
 0x935   :  { %3019 = vmatmul.mubr.f32.gmra.mxu0 %v2825_v30  ;;  %3951 = vmatprep.subr.mxu1 %v2767_v28  ;;  %v2896_v30 = vld [vmem:[%s6259_s7 + $0x260] sm:$0xff] }
 0x936   :  { %3952 = vmatpush3.msra.mxu1 %v5838_v17  ;;  %3023 = vmatprep.mubr.f32.mxu0 %v2831_v35  ;;  %v2838_v17 = vld [vmem:[%s6259_s7 + $0x90] sm:$0xff] }
 0x937   :  { %3953 = vmatprep.subr.mxu1 %v2765_v39  ;;  %v2880_v39 = vld [vmem:[%s6259_s7 + $0x1e0] sm:$0xff]  ;;  %v2862_v35 = vld [vmem:[%s6259_s7 + $0x150] sm:$0xff] }
 0x938   :  { %v2713_v50 = vpop.permute.xlu1 %2712  ;;  %3954 = vmatpush3.msra.mxu1 %v2721_v38  ;;  %v2757_v51 = vpop.permute.xlu0 %2756  ;;  %v2853_v38 = vld [vmem:[%s6259_s7 + $0x108] sm:$0xff] }
 0x939   :  { %3024 = vmatmul.mubr.f32.gmra.mxu0 %v2830_v48  ;;  %3955 = vmatprep.subr.mxu1 %v2763_v42  ;;  %v2852_v42 = vld [vmem:[%s6259_s7 + $0x100] sm:$0xff] }
 0x93a   :  { %3956 = vmatpush3.msra.mxu1 %v2719_v43  ;;  %3028 = vmatprep.mubr.f32.mxu0 %v2836_v49  ;;  %v2858_v43 = vld [vmem:[%s6259_s7 + $0x130] sm:$0xff]  ;;  %v2824_v48 = vld [vmem:[%s6259_s7 + $0x20] sm:$0xff]  ;;  %v2867_v49 = vld [vmem:[%s6259_s7 + $0x178] sm:$0xff] }
 0x93b   :  { %3957 = vmatprep.subr.mxu1 %v2761_v45  ;;  %v2885_v45 = vld [vmem:[%s6259_s7 + $0x208] sm:$0xff] }
 0x93c   :  { %v2697_v53 = vpop.permute.xlu1 %2696  ;;  %3958 = vmatpush3.msra.mxu1 %v2717_v44  ;;  %v2755_v54 = vpop.permute.xlu0 %2754  ;;  %v2863_v44 = vld [vmem:[%s6259_s7 + $0x158] sm:$0xff] }
 0x93d   :  { %3029 = vmatmul.mubr.f32.gmra.mxu0 %v2835_v26  ;;  %3959 = vmatprep.subr.mxu1 %v2759_v27  ;;  %v2895_v27 = vld [vmem:[%s6259_s7 + $0x258] sm:$0xff]  ;;  %v2834_v26 = vld [vmem:[%s6259_s7 + $0x70] sm:$0xff] }
 0x93e   :  { %3960 = vmatpush3.msra.mxu1 %v2715_v47  ;;  %3033 = vmatprep.mubr.f32.mxu0 %v2841_v52  ;;  %v2868_v47 = vld [vmem:[%s6259_s7 + $0x180] sm:$0xff] }
 0x93f   :  { %3961 = vmatprep.subr.mxu1 %v2757_v51  ;;  %v2829_v51 = vld [vmem:[%s6259_s7 + $0x48] sm:$0xff]  ;;  %v2872_v52 = vld [vmem:[%s6259_s7 + $0x1a0] sm:$0xff] }
 0x940   :  { %v2699_v57 = vpop.permute.xlu1 %2698  ;;  %3962 = vmatpush3.msra.mxu1 %v2713_v50  ;;  %v2753_v58 = vpop.permute.xlu0 %2752  ;;  %v2873_v50 = vld [vmem:[%s6259_s7 + $0x1a8] sm:$0xff] }
 0x941   :  { %3034 = vmatmul.mubr.f32.gmra.mxu0 %v2840_v55  ;;  %3963 = vmatprep.subr.mxu1 %v2755_v54  ;;  %v2839_v54 = vld [vmem:[%s6259_s7 + $0x98] sm:$0xff]  ;;  %v2844_v55 = vld [vmem:[%s6259_s7 + $0xc0] sm:$0xff] }
 0x942   :  { %3964 = vmatpush3.msra.mxu1 %v2699_v57  ;;  %3038 = vmatprep.mubr.f32.mxu0 %v2846_v56  ;;  %v2877_v56 = vld [vmem:[%s6259_s7 + $0x1c8] sm:$0xff]  ;;  %v2883_v57 = vld [vmem:[%s6259_s7 + $0x1f8] sm:$0xff] }
 0x943   :  { %3965 = vmatprep.subr.mxu1 %v2753_v58  ;;  %v2849_v58 = vld [vmem:[%s6259_s7 + $0xe8] sm:$0xff] }
 0x944   :  { %v2695_v61 = vpop.permute.xlu1 %2694  ;;  %3966 = vmatpush3.msra.mxu1 %v2697_v53  ;;  %v2751_v62 = vpop.permute.xlu0 %2750  ;;  %v2878_v53 = vld [vmem:[%s6259_s7 + $0x1d0] sm:$0xff] }
 0x945   :  { %3039 = vmatmul.mubr.f32.gmra.mxu0 %v2845_v59  ;;  %3967 = vmatprep.subr.mxu1 %v2751_v62  ;;  %v2854_v59 = vld [vmem:[%s6259_s7 + $0x110] sm:$0xff]  ;;  %v2859_v62 = vld [vmem:[%s6259_s7 + $0x138] sm:$0xff] }
 0x946   :  { %3968 = vmatpush3.msra.mxu1 %v2695_v61  ;;  %3043 = vmatprep.mubr.f32.mxu0 %v2851_v60  ;;  %v2882_v60 = vld [vmem:[%s6259_s7 + $0x1f0] sm:$0xff]  ;;  %v2888_v61 = vld [vmem:[%s6259_s7 + $0x220] sm:$0xff] }
 0x948   :  { %v2693_v2 = vpop.permute.xlu1 %2692  ;;  %v2749_v3 = vpop.permute.xlu0 %2748 }
 0x949   :  { %3044 = vmatmul.mubr.f32.gmra.mxu0 %v2850_v63  ;;  %3969 = vmatprep.subr.mxu1 %v2749_v3  ;;  %v2864_v63 = vld [vmem:[%s6259_s7 + $0x160] sm:$0xff]  ;;  %v2869_v3 = vld [vmem:[%s6259_s7 + $0x188] sm:$0xff] }
 0x94a   :  { %3970 = vmatpush3.msra.mxu1 %v2693_v2  ;;  %3048 = vmatprep.mubr.f32.mxu0 %v2856_v1  ;;  %v2887_v1 = vld [vmem:[%s6259_s7 + $0x218] sm:$0xff]  ;;  %v2893_v2 = vld [vmem:[%s6259_s7 + $0x248] sm:$0xff] }
 0x94b   :  { %3159 = vmatmul.mubr.f32.vlgmr.msra.gmra.mxu1 %v2822_v4  ;;  %4284 = vmatprep.subr.mxu1 %v6263_v0  ;;  %v2874_v4 = vld [vmem:[%s6259_s7 + $0x1b0] sm:$0xff] }
 0x94c   :  { %v2805_v8 = vpop.permute.xlu1 %2804  ;;  %v2807_v9 = vpop.permute.xlu0 %2806  ;;  %3163 = vmatprep.mubr.f32.mxu1 %v2828_v5  ;;  %v2892_v5 = vld [vmem:[%s6259_s7 + $0x240] sm:$0xff] }
 0x94d   :  { %3049 = vmatmul.mubr.f32.gmra.mxu0 %v2855_v6  ;;  %4179 = vmatprep.subr.mxu0 %v2807_v9  ;;  %v2898_v6 = vld [vmem:[%s6259_s7 + $0x270] sm:$0xff] }
 0x94e   :  { %4180 = vmatpush3.msra.mxu0 %v2807_v9  ;;  %3053 = vmatprep.mubr.f32.mxu0 %v2861_v7  ;;  %v2879_v7 = vld [vmem:[%s6259_s7 + $0x1d8] sm:$0xff]  ;;  %v2897_v9 = vld [vmem:[%s6259_s7 + $0x268] sm:$0xff] }
 0x94f   :  { %3164 = vmatmul.mubr.f32.gmra.mxu1 %v2827_v10  ;;  %4181 = vmatprep.subr.mxu0 %v2805_v8  ;;  %v2889_v10 = vld [vmem:[%s6259_s7 + $0x228] sm:$0xff] }
 0x950   :  { %v2801_v14 = vpop.permute.xlu1 %2800  ;;  %v2803_v15 = vpop.permute.xlu0 %2802  ;;  %4182 = vmatpush3.msra.mxu0 %v2805_v8  ;;  %3168 = vmatprep.mubr.f32.mxu1 %v2833_v11  ;;  %v2884_v8 = vld [vmem:[%s6259_s7 + $0x200] sm:$0xff]  ;;  %v2894_v11 = vld [vmem:[%s6259_s7 + $0x250] sm:$0xff] }
 0x951   :  { %3054 = vmatmul.mubr.f32.gmra.mxu0 %v2860_v12  ;;  %4183 = vmatprep.subr.mxu0 %v2803_v15  ;;  %v2899_v12 = vld [vmem:[%s6259_s7 + $0x278] sm:$0xff] }
 0x952   :  { %4184 = vmatpush3.msra.mxu0 %v2803_v15  ;;  %3058 = vmatprep.mubr.f32.mxu0 %v2866_v13 }
 0x953   :  { %3169 = vmatmul.mubr.f32.gmra.mxu1 %v2832_v16  ;;  %4185 = vmatprep.subr.mxu0 %v2801_v14 }
 0x954   :  { %v2797_v20 = vpop.permute.xlu1 %2796  ;;  %v2799_v21 = vpop.permute.xlu0 %2798  ;;  %4186 = vmatpush3.msra.mxu0 %v2801_v14  ;;  %3173 = vmatprep.mubr.f32.mxu1 %v2838_v17 }
 0x955   :  { %3059 = vmatmul.mubr.f32.gmra.mxu0 %v2865_v18  ;;  %4187 = vmatprep.subr.mxu0 %v2799_v21 }
 0x956   :  { %4188 = vmatpush3.msra.mxu0 %v2799_v21  ;;  %3063 = vmatprep.mubr.f32.mxu0 %v2871_v19 }
 0x957   :  { %3174 = vmatmul.mubr.f32.gmra.mxu1 %v2837_v22  ;;  %4189 = vmatprep.subr.mxu0 %v2797_v20 }
 0x958   :  { %v2795_v28 = vpop.permute.xlu0 %2794  ;;  %4190 = vmatpush3.msra.mxu0 %v2797_v20  ;;  %3178 = vmatprep.mubr.f32.mxu1 %v2843_v23  ;;  %v2793_v32 = vpop.permute.xlu1 %2792 }
 0x959   :  { %3064 = vmatmul.mubr.f32.gmra.mxu0 %v2870_v24  ;;  %4191 = vmatprep.subr.mxu0 %v2795_v28 }
 0x95a   :  { %4192 = vmatpush3.msra.mxu0 %v2795_v28  ;;  %3068 = vmatprep.mubr.f32.mxu0 %v2876_v25 }
 0x95b   :  { %3179 = vmatmul.mubr.f32.gmra.mxu1 %v2842_v29  ;;  %4193 = vmatprep.subr.mxu0 %v2793_v32 }
 0x95c   :  { %4194 = vmatpush3.msra.mxu0 %v2793_v32  ;;  %3183 = vmatprep.mubr.f32.mxu1 %v2848_v31 }
 0x95d   :  { %3069 = vmatmul.mubr.f32.gmra.mxu0 %v2875_v33  ;;  %4219 = vmatprep.subr.mxu0 %v6263_v0 }
 0x95e   :  { %3073 = vmatprep.mubr.f32.mxu0 %v2881_v34 }
 0x95f   :  { %3184 = vmatmul.mubr.f32.gmra.mxu1 %v2847_v37 }
 0x960   :  { %3188 = vmatprep.mubr.f32.mxu1 %v2853_v38 }
 0x961   :  { %3074 = vmatmul.mubr.f32.gmra.mxu0 %v2880_v39 }
 0x962   :  { %3078 = vmatprep.mubr.f32.mxu0 %v2886_v40 }
 0x963   :  { %3189 = vmatmul.mubr.f32.gmra.mxu1 %v2852_v42 }
 0x964   :  { %3193 = vmatprep.mubr.f32.mxu1 %v2858_v43 }
 0x965   :  { %3079 = vmatmul.mubr.f32.gmra.mxu0 %v2885_v45 }
 0x966   :  { %3083 = vmatprep.mubr.f32.mxu0 %v2891_v41 }
 0x967   :  { %3194 = vmatmul.mubr.f32.gmra.mxu1 %v2857_v36 }
 0x968   :  { %3198 = vmatprep.mubr.f32.mxu1 %v2863_v44 }
 0x969   :  { %3084 = vmatmul.mubr.f32.gmra.mxu0 %v2890_v46 }
 0x96a   :  { %3088 = vmatprep.mubr.f32.mxu0 %v2896_v30 }
 0x96b   :  { %3199 = vmatmul.mubr.f32.gmra.mxu1 %v2862_v35 }
 0x96c   :  { %3203 = vmatprep.mubr.f32.mxu1 %v2868_v47 }
 0x96d   :  { %3089 = vmatmul.mubr.f32.gmra.mxu0 %v2895_v27 }
 0x96e   :  { %4195 = vmatprep.mubr.msk.f32.mxu0 %vm2900_vm5, %v2824_v48 }
 0x96f   :  { %3204 = vmatmul.mubr.f32.gmra.mxu1 %v2867_v49 }
 0x970   :  { %3208 = vmatprep.mubr.f32.mxu1 %v2873_v50 }
 0x971   :  { %4196 = vmatmul.mubr.msk.f32.vlgmr.msra.gmra.mxu0 %vm2900_vm5, %v2829_v51 }
 0x972   :  { %4198 = vmatprep.mubr.msk.f32.mxu0 %vm2900_vm5, %v2834_v26 }
 0x973   :  { %3209 = vmatmul.mubr.f32.gmra.mxu1 %v2872_v52 }
 0x974   :  { %3213 = vmatprep.mubr.f32.mxu1 %v2878_v53 }
 0x975   :  { %4199 = vmatmul.mubr.msk.f32.gmra.mxu0 %vm2900_vm5, %v2839_v54 }
 0x976   :  { %4201 = vmatprep.mubr.msk.f32.mxu0 %vm2900_vm5, %v2844_v55 }
 0x977   :  { %3214 = vmatmul.mubr.f32.gmra.mxu1 %v2877_v56 }
 0x978   :  { %3218 = vmatprep.mubr.f32.mxu1 %v2883_v57 }
 0x979   :  { %4202 = vmatmul.mubr.msk.f32.gmra.mxu0 %vm2900_vm5, %v2849_v58 }
 0x97a   :  { %4204 = vmatprep.mubr.msk.f32.mxu0 %vm2900_vm5, %v2854_v59 }
 0x97b   :  { %3219 = vmatmul.mubr.f32.gmra.mxu1 %v2882_v60 }
 0x97c   :  { %3223 = vmatprep.mubr.f32.mxu1 %v2888_v61 }
 0x97d   :  { %4205 = vmatmul.mubr.msk.f32.gmra.mxu0 %vm2900_vm5, %v2859_v62 }
 0x97e   :  { %4207 = vmatprep.mubr.msk.f32.mxu0 %vm2900_vm5, %v2864_v63 }
 0x97f   :  { %3224 = vmatmul.mubr.f32.gmra.mxu1 %v2887_v1 }
 0x980   :  { %3228 = vmatprep.mubr.f32.mxu1 %v2893_v2 }
 0x981   :  { %4208 = vmatmul.mubr.msk.f32.gmra.mxu0 %vm2900_vm5, %v2869_v3 }
 0x982   :  { %4210 = vmatprep.mubr.msk.f32.mxu0 %vm2900_vm5, %v2874_v4 }
 0x983   :  { %3229 = vmatmul.mubr.f32.gmra.mxu1 %v2892_v5 }
 0x984   :  { %3233 = vmatprep.mubr.f32.mxu1 %v2898_v6 }
 0x985   :  { %4211 = vmatmul.mubr.msk.f32.gmra.mxu0 %vm2900_vm5, %v2879_v7 }
 0x986   :  { %4213 = vmatprep.mubr.msk.f32.mxu0 %vm2900_vm5, %v2884_v8 }
 0x987   :  { %3234 = vmatmul.mubr.f32.gmra.mxu1 %v2897_v9 }
 0x988   :  { %4306 = vmatprep.mubr.msk.f32.mxu1 %vm4475_vm6, %v6263_v0 }
 0x989   :  { %4214 = vmatmul.mubr.msk.f32.gmra.mxu0 %vm2900_vm5, %v2889_v10 }
 0x98a   :  { %4216 = vmatprep.mubr.msk.f32.mxu0 %vm2900_vm5, %v2894_v11 }
 0x98d   :  { %4217 = vmatmul.mubr.msk.f32.gmra.mxu0 %vm2900_vm5, %v2899_v12 }
 0x98e   :  { %4251 = vmatprep.mubr.msk.f32.mxu0 %vm4475_vm6, %v6263_v0 }
 0x9f1   :  { %v3891_v13 = vpop.f32.mrf.mxu0 }
 0x9f3   :  { %v3892_v14 = vpop.f32.mrf.mxu0 }
 0x9f4   :  { %v3893_v15 = vadd.f32 %v3892_v14, %v3891_v13 }
 0x9f5   :  { %v3894_v16 = vpop.f32.mrf.mxu0 }
 0x9f7   :  { %v3895_v17 = vpop.f32.mrf.mxu0 }
 0x9f8   :  { %v3896_v18 = vadd.f32 %v3895_v17, %v3894_v16 }
 0x9f9   :  { %v3897_v19 = vpop.f32.mrf.mxu0 }
 0x9fb   :  { %v3898_v20 = vpop.f32.mrf.mxu0 }
 0x9fc   :  { %v3899_v21 = vadd.f32 %v3898_v20, %v3897_v19 }
 0x9fd   :  { %v3900_v22 = vpop.f32.mrf.mxu0 }
 0x9ff   :  { %v3901_v23 = vpop.f32.mrf.mxu0 }
 0xa00   :  { %v3902_v24 = vadd.f32 %v3901_v23, %v3900_v22 }
 0xa01   :  { %v3903_v25 = vpop.f32.mrf.mxu0 }
 0xa03   :  { %v3904_v28 = vpop.f32.mrf.mxu0 }
 0xa04   :  { %v3905_v29 = vadd.f32 %v3904_v28, %v3903_v25 }
 0xa05   :  { %v3906_v31 = vpop.f32.mrf.mxu0 }
 0xa07   :  { %v3907_v32 = vpop.f32.mrf.mxu0 }
 0xa08   :  { %v6117_v33 = vadd.f32 %v3907_v32, %v3906_v31 }
 0xa09   :  { %v3909_v34 = vpop.f32.mrf.mxu0 }
 0xa0a   :  { %6265 = vst [vmem:[#allocation16_spill] sm:$0xff] %v6117_v33 }
 0xa0b   :  { %v3910_v37 = vpop.f32.mrf.mxu0  ;;  %v3971_v38 = vpop.f32.mrf.mxu1 }
 0xa0c   :  { %v6119_v39 = vadd.f32 %v3910_v37, %v3909_v34 }
 0xa0d   :  { %v3912_v40 = vpop.f32.mrf.mxu0  ;;  %v3972_v42 = vpop.f32.mrf.mxu1 }
 0xa0e   :  { %v3973_v43 = vadd.f32 %v3972_v42, %v3971_v38 }
 0xa0f   :  { %v3913_v45 = vpop.f32.mrf.mxu0  ;;  %v3974_v41 = vpop.f32.mrf.mxu1 }
 0xa10   :  { %v6121_v36 = vadd.f32 %v3913_v45, %v3912_v40  ;;  %v6123_v44 = vadd.f32 %v3973_v43, %v3893_v15 }
 0xa11   :  { %v3915_v46 = vpop.f32.mrf.mxu0  ;;  %v3975_v30 = vpop.f32.mrf.mxu1 }
 0xa12   :  { %6266 = vst [vmem:[#allocation17_spill] sm:$0xff] %v6123_v44  ;;  %v3976_v35 = vadd.f32 %v3975_v30, %v3974_v41 }
 0xa13   :  { %v3916_v47 = vpop.f32.mrf.mxu0  ;;  %v3977_v27 = vpop.f32.mrf.mxu1 }
 0xa14   :  { %v6125_v48 = vadd.f32 %v3916_v47, %v3915_v46  ;;  %v6127_v49 = vadd.f32 %v3976_v35, %v3896_v18 }
 0xa15   :  { %v6129_v50 = vpop.f32.mrf.mxu0  ;;  %v3978_v51 = vpop.f32.mrf.mxu1 }
 0xa16   :  { %6267 = vst [vmem:[#allocation18_spill] sm:$0xff] %v6127_v49  ;;  %v3979_v26 = vadd.f32 %v3978_v51, %v3977_v27 }
 0xa17   :  { %v6131_v52 = vpop.f32.mrf.mxu0  ;;  %v3980_v53 = vpop.f32.mrf.mxu1 }
 0xa18   :  { %v6133_v54 = vadd.f32 %v3979_v26, %v3899_v21 }
 0xa19   :  { %v6135_v55 = vpop.f32.mrf.mxu0  ;;  %v3981_v56 = vpop.f32.mrf.mxu1 }
 0xa1a   :  { %6268 = vst [vmem:[#allocation19_spill] sm:$0xff] %v6133_v54  ;;  %v3982_v57 = vadd.f32 %v3981_v56, %v3980_v53 }
 0xa1b   :  { %v6137_v58 = vpop.f32.mrf.mxu0  ;;  %v3983_v59 = vpop.f32.mrf.mxu1 }
 0xa1c   :  { %v6139_v60 = vadd.f32 %v3982_v57, %v3902_v24 }
 0xa1d   :  { %v6141_v61 = vpop.f32.mrf.mxu0  ;;  %v3984_v62 = vpop.f32.mrf.mxu1 }
 0xa1e   :  { %6269 = vst [vmem:[#allocation20_spill] sm:$0xff] %v6139_v60  ;;  %v3985_v63 = vadd.f32 %v3984_v62, %v3983_v59 }
 0xa1f   :  { %v3925_v1 = vpop.f32.mrf.mxu0  ;;  %v6143_v2 = vpop.f32.mrf.mxu1 }
 0xa20   :  { %v6145_v3 = vadd.f32 %v3985_v63, %v3905_v29 }
 0xa21   :  { %v3927_v4 = vpop.f32.mrf.mxu0  ;;  %v6147_v5 = vpop.f32.mrf.mxu1 }
 0xa22   :  { %6270 = vst [vmem:[#allocation21_spill] sm:$0xff] %v6145_v3  ;;  %v3926_v3 = vadd.f32 %v3925_v1, %v6141_v61 }
 0xa23   :  { %v3928_v6 = vpop.f32.mrf.mxu0  ;;  %v6149_v7 = vpop.f32.mrf.mxu1 }
 0xa24   :  { %v3929_v49 = vadd.f32 %v3928_v6, %v3927_v4  ;;  %v6278_v6 = vmov 0.0  }
 0xa25   :  { %v3930_v8 = vpop.f32.mrf.mxu0  ;;  %v6151_v9 = vpop.f32.mrf.mxu1 }
 0xa27   :  { %v3931_v10 = vpop.f32.mrf.mxu0  ;;  %v6153_v11 = vpop.f32.mrf.mxu1 }
 0xa28   :  { %v3932_v0 = vadd.f32 %v3931_v10, %v3930_v8  ;;  %v3923_v8 = vadd.f32 %v6137_v58, %v6135_v55 }
 0xa29   :  { %v3933_v12 = vpop.f32.mrf.mxu0  ;;  %v6155_v13 = vpop.f32.mrf.mxu1 }
 0xa2b   :  { %v3934_v14 = vpop.f32.mrf.mxu0  ;;  %v3995_v15 = vpop.f32.mrf.mxu1 }
 0xa2d   :  { %v3936_v16 = vpop.f32.mrf.mxu0  ;;  %v3996_v17 = vpop.f32.mrf.mxu1 }
 0xa2e   :  { %v3997_v61 = vadd.f32 %v3996_v17, %v3995_v15 }
 0xa2f   :  { %v3937_v18 = vpop.f32.mrf.mxu0  ;;  %v3998_v19 = vpop.f32.mrf.mxu1 }
 0xa30   :  { %v3938_v56 = vadd.f32 %v3937_v18, %v3936_v16  ;;  %v3201_v58 = vadd.f32 %v3997_v61, %v6125_v48  ;;  %v6279_v48 = vld [vmem:[#allocation16_spill] sm:$0xff] }
 0xa31   :  { %v3999_v20 = vpop.f32.mrf.mxu1  ;;  %v6157_v21 = vpop.f32.mrf.mxu0 }
 0xa32   :  { %6271 = vst [vmem:[#allocation22_spill] sm:$0xff] %v6157_v21  ;;  %v4000_v10 = vadd.f32 %v3999_v20, %v3998_v19 }
 0xa33   :  { %v4001_v22 = vpop.f32.mrf.mxu1  ;;  %v6159_v23 = vpop.f32.mrf.mxu0 }
 0xa34   :  { %6272 = vst [vmem:[#allocation23_spill] sm:$0xff] %v6159_v23  ;;  %v3935_v23 = vadd.f32 %v3934_v14, %v3933_v12 }
 0xa35   :  { %v4002_v24 = vpop.f32.mrf.mxu1  ;;  %v6161_v25 = vpop.f32.mrf.mxu0 }
 0xa36   :  { %6273 = vst [vmem:[#allocation24_spill] sm:$0xff] %v6161_v25 }
 0xa37   :  { %v4004_v28 = vpop.f32.mrf.mxu1  ;;  %v6163_v29 = vpop.f32.mrf.mxu0 }
 0xa38   :  { %6274 = vst [vmem:[#allocation25_spill] sm:$0xff] %v6163_v29 }
 0xa39   :  { %v4005_v31 = vpop.f32.mrf.mxu1  ;;  %v6165_v32 = vpop.f32.mrf.mxu0 }
 0xa3a   :  { %6275 = vst [vmem:[#allocation26_spill] sm:$0xff] %v6165_v32  ;;  %v4006_v54 = vadd.f32 %v4005_v31, %v4004_v28  ;;  %v4003_v32 = vadd.f32 %v4002_v24, %v4001_v22  ;;  %v6282_v24 = vld [vmem:[#allocation21_spill] sm:$0xff] }
 0xa3b   :  { %v4007_v34 = vpop.f32.mrf.mxu1  ;;  %v6167_v37 = vpop.f32.mrf.mxu0 }
 0xa3c   :  { %6276 = vst [vmem:[#allocation27_spill] sm:$0xff] %v6167_v37  ;;  %v3216_v12 = vadd.f32 %v4006_v54, %v3926_v3 }
 0xa3d   :  { %v4008_v38 = vpop.f32.mrf.mxu1  ;;  %v6169_v40 = vpop.f32.mrf.mxu0  ;;  %v6285_v31 = vld [vmem:[#allocation24_spill] sm:$0xff] }
 0xa3e   :  { %v4009_v44 = vadd.f32 %v4008_v38, %v4007_v34 }
 0xa3f   :  { %v4010_v42 = vpop.f32.mrf.mxu1  ;;  %v6171_v43 = vpop.f32.mrf.mxu0  ;;  %v6287_v38 = vld [vmem:[#allocation25_spill] sm:$0xff] }
 0xa40   :  { %6277 = vst [vmem:[#allocation28_spill] sm:$0xff] %v6171_v43  ;;  %v3221_v16 = vadd.f32 %v4009_v44, %v3929_v49  ;;  %v3994_v44 = vadd.f32 %v6155_v13, %v6153_v11 }
 0xa41   :  { %v4011_v45 = vpop.f32.mrf.mxu1  ;;  %v4209_v41 = vpop.f32.mrf.mxu0 }
 0xa42   :  { %v4012_v57 = vadd.f32 %v4011_v45, %v4010_v42  ;;  %v3196_v3 = vadd.f32 %v3994_v44, %v6121_v36  ;;  %v6281_v36 = vld [vmem:[#allocation26_spill] sm:$0xff] }
 0xa43   :  { %v4013_v46 = vpop.f32.mrf.mxu1  ;;  %v3345_v30 = vpop.f32.mrf.mxu0  ;;  %v6288_v45 = vld [vmem:[#allocation18_spill] sm:$0xff] }
 0xa44   :  { %v3226_v25 = vadd.f32 %v4012_v57, %v3932_v0  ;;  %v3920_v0 = vadd.f32 %v6131_v52, %v6129_v50  ;;  %v3991_v50 = vadd.f32 %v6151_v9, %v6149_v7  ;;  %v3346_v11 = vadd.f32 %v3345_v30, %v3201_v58  ;;  %v3401_v57 = vld [vmem:[#allocation10 + $0x8] sm:$0xff] }
 0xa45   :  { %v4014_v35 = vpop.f32.mrf.mxu1  ;;  %v4212_v47 = vpop.f32.mrf.mxu0  ;;  %v3341_v15 = vadd.f32 %v6169_v40, %v3196_v3 }
 0xa46   :  { %v4015_v59 = vadd.f32 %v4014_v35, %v4013_v46  ;;  %v3361_v1 = vadd.f32 %v4212_v47, %v3216_v12  ;;  %v3206_v49 = vadd.f32 %v4000_v10, %v3920_v0  ;;  %v3191_v7 = vadd.f32 %v3991_v50, %v6119_v39  ;;  %v6283_v39 = vld [vmem:[#allocation27_spill] sm:$0xff]  ;;  %v6290_v35 = vld [vmem:[#allocation17_spill] sm:$0xff] }
 0xa47   :  { %v4016_v27 = vpop.f32.mrf.mxu1  ;;  %v3355_v51 = vpop.f32.mrf.mxu0  ;;  %v6280_v19 = vld [vmem:[#allocation28_spill] sm:$0xff]  ;;  %v6291_v47 = vld [vmem:[#allocation23_spill] sm:$0xff]  ;;  %v3409_v10 = vld [vmem:[#allocation10 + $0x48] sm:$0xff] }
 0xa48   :  { %v3231_v37 = vadd.f32 %v4015_v59, %v3935_v23  ;;  %v3351_v52 = vadd.f32 %v4209_v41, %v3206_v49  ;;  %v3336_v20 = vadd.f32 %v6280_v19, %v3191_v7  ;;  %v3391_v23 = vmax.f32 %v3341_v15, 0.0  ;;  %v6289_v41 = vld [vmem:[#allocation22_spill] sm:$0xff] }
 0xa49   :  { %v4017_v26 = vpop.f32.mrf.mxu1  ;;  %v4215_v53 = vpop.f32.mrf.mxu0  ;;  %v3311_v46 = vadd.f32 %v6289_v41, %v6288_v45  ;;  %v3402_v59 = vld [vmem:[#allocation10 + $0x10] sm:$0xff] }
 0xa4a   :  { %v4018_v62 = vadd.f32 %v4017_v26, %v4016_v27  ;;  %v3371_v33 = vadd.f32 %v4215_v53, %v3226_v25  ;;  %v3393_v9 = vmax.f32 %v3351_v52, 0.0  ;;  %v3326_v25 = vadd.f32 %v6283_v39, %v6282_v24  ;;  %v3410_v12 = vld [vmem:[#allocation10 + $0x50] sm:$0xff] }
 0xa4b   :  { %v3365_v63 = vpop.f32.mrf.mxu0  ;;  %v3390_v28 = vmax.f32 %v3336_v20, 0.0  ;;  %v3306_v27 = vadd.f32 %v6291_v47, %v6290_v35  ;;  %v3385_v26 = vmax.f32 %v3311_v46, 0.0 }
 0xa4c   :  { %v3236_v21 = vadd.f32 %v4018_v62, %v3938_v56  ;;  %v3366_v14 = vadd.f32 %v3365_v63, %v3221_v16  ;;  %v3397_v22 = vmax.f32 %v3371_v33, 0.0  ;;  %v3988_v33 = vadd.f32 %v6147_v5, %v6143_v2  ;;  %v3400_v56 = vld [vmem:[#allocation10] sm:$0xff]  ;;  %v3403_v62 = vld [vmem:[#allocation10 + $0x18] sm:$0xff]  ;;  %v3405_v16 = vld [vmem:[#allocation10 + $0x28] sm:$0xff] }
 0xa4d   :  { %v4218_v29 = vpop.f32.mrf.mxu0  ;;  %v3392_v2 = vmax.f32 %v3346_v11, 0.0  ;;  %v3384_v53 = vmax.f32 %v3306_v27, 0.0  ;;  %v3404_v63 = vld [vmem:[#allocation10 + $0x20] sm:$0xff] }
 0xa4e   :  { %v3381_v60 = vadd.f32 %v4218_v29, %v3236_v21  ;;  %v3211_v21 = vadd.f32 %v4003_v32, %v3923_v8  ;;  %v3396_v55 = vmax.f32 %v3366_v14, 0.0  ;;  %v3186_v17 = vadd.f32 %v3988_v33, %v6279_v48  ;;  %v6284_v29 = vld [vmem:[#allocation20_spill] sm:$0xff] }
 0xa4f   :  { %v3375_v43 = vpop.f32.mrf.mxu0  ;;  %v3321_v32 = vadd.f32 %v6285_v31, %v6284_v29  ;;  %v3408_v8 = vld [vmem:[#allocation10 + $0x40] sm:$0xff] }
 0xa50   :  { %v3399_v18 = vmax.f32 %v3381_v60, 0.0  ;;  %v3376_v42 = vadd.f32 %v3375_v43, %v3231_v37  ;;  %v3356_v54 = vadd.f32 %v3355_v51, %v3211_v21  ;;  %v3395_v60 = vmax.f32 %v3361_v1, 0.0  ;;  %v6286_v37 = vld [vmem:[#allocation19_spill] sm:$0xff] }
 0xa51   :  { %v3331_v5 = vadd.f32 %v6281_v36, %v3186_v17  ;;  %v3316_v40 = vadd.f32 %v6287_v38, %v6286_v37  ;;  %v3388_v43 = vmax.f32 %v3326_v25, 0.0  ;;  %v3387_v30 = vmax.f32 %v3321_v32, 0.0 }
 0xa52   :  { %v3398_v4 = vmax.f32 %v3376_v42, 0.0  ;;  %4220 = vmatpush3.msra.mxu0 %v3399_v18  ;;  %v3394_v13 = vmax.f32 %v3356_v54, 0.0  ;;  %v3406_v18 = vld [vmem:[#allocation10 + $0x30] sm:$0xff]  ;;  %v3407_v42 = vld [vmem:[#allocation10 + $0x38] sm:$0xff] }
 0xa53   :  { %4221 = vmatprep.subr.mxu0 %v6278_v6  ;;  %v3389_v34 = vmax.f32 %v3331_v5, 0.0  ;;  %v3386_v51 = vmax.f32 %v3316_v40, 0.0 }
 0xa54   :  { %4222 = vmatpush3.msra.mxu0 %v3398_v4 }
 0xa55   :  { %4223 = vmatprep.subr.mxu0 %v6278_v6 }
 0xa56   :  { %4224 = vmatpush3.msra.mxu0 %v3397_v22 }
 0xa57   :  { %4225 = vmatprep.subr.mxu0 %v6278_v6 }
 0xa58   :  { %4226 = vmatpush3.msra.mxu0 %v3396_v55 }
 0xa59   :  { %4227 = vmatprep.subr.mxu0 %v6278_v6 }
 0xa5a   :  { %4228 = vmatpush3.msra.mxu0 %v3395_v60 }
 0xa5b   :  { %4229 = vmatprep.subr.mxu0 %v6278_v6 }
 0xa5c   :  { %4230 = vmatpush3.msra.mxu0 %v3394_v13 }
 0xa5d   :  { %4231 = vmatprep.subr.mxu0 %v6278_v6 }
 0xa5e   :  { %4232 = vmatpush3.msra.mxu0 %v3393_v9 }
 0xa5f   :  { %4233 = vmatprep.subr.mxu0 %v6278_v6 }
 0xa60   :  { %4234 = vmatpush3.msra.mxu0 %v3392_v2 }
 0xa61   :  { %4235 = vmatprep.subr.mxu0 %v6278_v6 }
 0xa62   :  { %4236 = vmatpush3.msra.mxu0 %v3391_v23 }
 0xa63   :  { %4237 = vmatprep.subr.mxu0 %v6278_v6 }
 0xa64   :  { %4238 = vmatpush3.msra.mxu0 %v3390_v28  ;;  %v3542_v28 = vld [vmem:[%s6261_s9] sm:$0x3] }
 0xa65   :  { %4239 = vmatprep.subr.mxu0 %v6278_v6 }
 0xa66   :  { %4240 = vmatpush3.msra.mxu0 %v3389_v34 }
 0xa67   :  { %4241 = vmatprep.subr.mxu0 %v6278_v6 }
 0xa68   :  { %4242 = vmatpush3.msra.mxu0 %v3388_v43 }
 0xa69   :  { %4243 = vmatprep.subr.mxu0 %v6278_v6 }
 0xa6a   :  { %4244 = vmatpush3.msra.mxu0 %v3387_v30 }
 0xa6b   :  { %4245 = vmatprep.subr.mxu0 %v6278_v6 }
 0xa6c   :  { %4246 = vmatpush3.msra.mxu0 %v3386_v51 }
 0xa6d   :  { %4247 = vmatprep.subr.mxu0 %v6278_v6 }
 0xa6e   :  { %4248 = vmatpush3.msra.mxu0 %v3385_v26 }
 0xa6f   :  { %4249 = vmatprep.subr.mxu0 %v6278_v6 }
 0xa70   :  { %4250 = vmatpush3.msra.mxu0 %v3384_v53 }
 0xa71   :  { %4252 = vmatmul.mubr.f32.vlgmr.msra.gmra.mxu0 %v3400_v56 }
 0xa72   :  { %4254 = vmatprep.mubr.msk.f32.mxu0 %vm4475_vm6, %v6278_v6 }
 0xa75   :  { %4255 = vmatmul.mubr.f32.gmra.mxu0 %v3401_v57 }
 0xa76   :  { %4257 = vmatprep.mubr.msk.f32.mxu0 %vm4475_vm6, %v6278_v6 }
 0xa79   :  { %4258 = vmatmul.mubr.f32.gmra.mxu0 %v3402_v59 }
 0xa7a   :  { %4260 = vmatprep.mubr.msk.f32.mxu0 %vm4475_vm6, %v6278_v6 }
 0xa7d   :  { %4261 = vmatmul.mubr.f32.gmra.mxu0 %v3403_v62 }
 0xa7e   :  { %4263 = vmatprep.mubr.msk.f32.mxu0 %vm4475_vm6, %v6278_v6 }
 0xa81   :  { %4264 = vmatmul.mubr.f32.gmra.mxu0 %v3404_v63 }
 0xa82   :  { %4266 = vmatprep.mubr.msk.f32.mxu0 %vm4475_vm6, %v6278_v6 }
 0xa85   :  { %4267 = vmatmul.mubr.f32.gmra.mxu0 %v3405_v16 }
 0xa86   :  { %4269 = vmatprep.mubr.msk.f32.mxu0 %vm4475_vm6, %v6278_v6 }
 0xa89   :  { %4270 = vmatmul.mubr.f32.gmra.mxu0 %v3406_v18 }
 0xa8a   :  { %4272 = vmatprep.mubr.msk.f32.mxu0 %vm4475_vm6, %v6278_v6 }
 0xa8d   :  { %4273 = vmatmul.mubr.f32.gmra.mxu0 %v3407_v42 }
 0xa8e   :  { %4275 = vmatprep.mubr.msk.f32.mxu0 %vm4475_vm6, %v6278_v6 }
 0xa91   :  { %4276 = vmatmul.mubr.f32.gmra.mxu0 %v3408_v8 }
 0xa92   :  { %4278 = vmatprep.mubr.msk.f32.mxu0 %vm4475_vm6, %v6278_v6 }
 0xa95   :  { %4279 = vmatmul.mubr.f32.gmra.mxu0 %v3409_v10 }
 0xa96   :  { %4281 = vmatprep.mubr.msk.f32.mxu0 %vm4475_vm6, %v6278_v6 }
 0xa99   :  { %4282 = vmatmul.mubr.f32.gmra.mxu0 %v3410_v12 }
 0xb31   :  { %v3477_v14 = vpop.f32.mrf.mxu0 }
 0xb32   :  { %v3531_v25 = vmax.f32 %v3477_v14, 0.0 }
 0xb33   :  { %v4253_v4 = vpop.f32.mrf.mxu0 }
 0xb35   :  { %v3482_v0 = vpop.f32.mrf.mxu0 }
 0xb36   :  { %v3532_v39 = vmax.f32 %v3482_v0, 0.0 }
 0xb37   :  { %v4256_v61 = vpop.f32.mrf.mxu0 }
 0xb39   :  { %v3487_v1 = vpop.f32.mrf.mxu0 }
 0xb3a   :  { %v3533_v24 = vmax.f32 %v3487_v1, 0.0 }
 0xb3b   :  { %v4259_v21 = vpop.f32.mrf.mxu0 }
 0xb3d   :  { %v3492_v22 = vpop.f32.mrf.mxu0 }
 0xb3e   :  { %v3534_v23 = vmax.f32 %v3492_v22, 0.0 }
 0xb3f   :  { %v4262_v44 = vpop.f32.mrf.mxu0 }
 0xb41   :  { %v3497_v49 = vpop.f32.mrf.mxu0 }
 0xb42   :  { %v3535_v5 = vmax.f32 %v3497_v49, 0.0 }
 0xb43   :  { %v4265_v54 = vpop.f32.mrf.mxu0 }
 0xb45   :  { %v3502_v55 = vpop.f32.mrf.mxu0 }
 0xb46   :  { %v3536_v36 = vmax.f32 %v3502_v55, 0.0 }
 0xb47   :  { %v4268_v50 = vpop.f32.mrf.mxu0 }
 0xb49   :  { %v3507_v52 = vpop.f32.mrf.mxu0 }
 0xb4a   :  { %v3537_v2 = vmax.f32 %v3507_v52, 0.0 }
 0xb4b   :  { %v4271_v58 = vpop.f32.mrf.mxu0 }
 0xb4d   :  { %v3512_v60 = vpop.f32.mrf.mxu0 }
 0xb4e   :  { %v3538_v20 = vmax.f32 %v3512_v60, 0.0 }
 0xb4f   :  { %v4274_v33 = vpop.f32.mrf.mxu0 }
 0xb51   :  { %v3517_v3 = vpop.f32.mrf.mxu0 }
 0xb52   :  { %v3539_v19 = vmax.f32 %v3517_v3, 0.0 }
 0xb53   :  { %v4277_v11 = vpop.f32.mrf.mxu0 }
 0xb55   :  { %v3522_v13 = vpop.f32.mrf.mxu0 }
 0xb56   :  { %v3540_v17 = vmax.f32 %v3522_v13, 0.0 }
 0xb57   :  { %v4280_v15 = vpop.f32.mrf.mxu0 }
 0xb59   :  { %v3527_v7 = vpop.f32.mrf.mxu0 }
 0xb5a   :  { %v3541_v9 = vmax.f32 %v3527_v7, 0.0 }
 0xb5b   :  { %v4283_v48 = vpop.f32.mrf.mxu0 }
 0xb5c   :  { %4285 = vmatpush3.msra.mxu1 %v3541_v9 }
 0xb5d   :  { %4286 = vmatprep.subr.mxu1 %v6278_v6 }
 0xb5e   :  { %4287 = vmatpush3.msra.mxu1 %v3540_v17 }
 0xb5f   :  { %4288 = vmatprep.subr.mxu1 %v6278_v6 }
 0xb60   :  { %4289 = vmatpush3.msra.mxu1 %v3539_v19 }
 0xb61   :  { %4290 = vmatprep.subr.mxu1 %v6278_v6 }
 0xb62   :  { %4291 = vmatpush3.msra.mxu1 %v3538_v20 }
 0xb63   :  { %4292 = vmatprep.subr.mxu1 %v6278_v6 }
 0xb64   :  { %4293 = vmatpush3.msra.mxu1 %v3537_v2 }
 0xb65   :  { %4294 = vmatprep.subr.mxu1 %v6278_v6 }
 0xb66   :  { %4295 = vmatpush3.msra.mxu1 %v3536_v36 }
 0xb67   :  { %4296 = vmatprep.subr.mxu1 %v6278_v6 }
 0xb68   :  { %4297 = vmatpush3.msra.mxu1 %v3535_v5 }
 0xb69   :  { %4298 = vmatprep.subr.mxu1 %v6278_v6 }
 0xb6a   :  { %4299 = vmatpush3.msra.mxu1 %v3534_v23 }
 0xb6b   :  { %4300 = vmatprep.subr.mxu1 %v6278_v6 }
 0xb6c   :  { %4301 = vmatpush3.msra.mxu1 %v3533_v24 }
 0xb6d   :  { %4302 = vmatprep.subr.mxu1 %v6278_v6 }
 0xb6e   :  { %4303 = vmatpush3.msra.mxu1 %v3532_v39 }
 0xb6f   :  { %4304 = vmatprep.subr.mxu1 %v6278_v6 }
 0xb70   :  { %4305 = vmatpush3.msra.mxu1 %v3531_v25 }
 0xb71   :  { %4307 = vmatmul.mubr.msk.f32.vlgmr.msra.gmra.mxu1 %vm3543_vm7, %v3542_v28 }
 0xc31   :  { %v3613_v29 = vpop.f32.mrf.mxu1 }
 0xc32   :  { %3618 = vst.msk [vmem:[#allocation11] sm:$0x3] %vm3617_vm8, %v3613_v29 }
 0xc33   :  { %v4308_v31 = vpop.f32.mrf.mxu1 }
 0xc34   :  { %4440 = shalt.err (!%p4437_p1)
}
 0xc35   :  { %3628 = dma.vmem_to_hbm [thread:$0]  %s3626_s30, 32, %s6262_s10, [#allocation4]  }
 0xc36   :  { %4455 = dma.done.wait [#allocation4], 32  }
 0xc37   :  { %4456 = vsyncadd [#allocation4], 4294967264 }
 0xc38   :  { %3632 = vsyncpa [#allocation3], 1 }
 0xc39   :  { %3633 = vsyncpa [#allocation6], 1 }
 0xc3a   :  { %3634 = vsyncpa [#allocation9], 1 }
 0xc3b   :  { %3635 = vsyncpa [#allocation4], 1 }

</bundles_post_ra>
